<compile_context>
chip_gen: v5e
topology: v5e:2x2
jax: 0.10.0
libtpu: 0.0.40
codegen_flags: <defaults>
</compile_context>

<pallas_src>
import functools

import jax
import jax.numpy as jnp
import numpy as np
from jax.experimental import pallas as pl
from jax.experimental.pallas import tpu as pltpu


def _round_up(x, m):
    return ((x + m - 1) // m) * m


def _largest_divisor_leq(n, cap):
    cap = max(1, min(n, cap))
    for d in range(cap, 0, -1):
        if n % d == 0:
            return d
    return 1


# ----------------------------------------------------------------------------
# Kernel 1: fused 3x3 conv (in-kernel im2col as 9 shifted MXU matmuls) plus
#           fused per-channel sum / sum-of-squares for the BN batch stats.
#
#   x_ref : (H+2, (W+2)*Np, Cin)  bf16, whole padded input, resident in VMEM
#   w_ref : (9, Cin, CP)          bf16, resident (CP = Cout padded to 128)
#   y_ref : (TH, W*Np, CP)        f32 conv output rows for this grid step
#   sum_ref, ssq_ref : (1, CP)    f32, accumulated across the whole grid
# ----------------------------------------------------------------------------
def _conv3x3_kernel(x_ref, w_ref, y_ref, sum_ref, ssq_ref, *, TH, W, Np, CP):
    i = pl.program_id(0)
    row0 = i * TH
    WN = W * Np

    @pl.when(i == 0)
    def _():
        sum_ref[...] = jnp.zeros_like(sum_ref)
        ssq_ref[...] = jnp.zeros_like(ssq_ref)

    @pl.loop(0, TH)
    def _(t):
        acc = jnp.zeros((WN, CP), jnp.float32)
        for kh in range(3):
            for kw in range(3):
                # shifted slab: rows (w*Np + n) of padded columns w+kw, all n.
                xs = x_ref[row0 + t + kh, pl.ds(kw * Np, WN), :]   # (WN, Cin)
                acc = acc + jnp.dot(xs, w_ref[3 * kh + kw],
                                    preferred_element_type=jnp.float32)
        y_ref[t] = acc
        sum_ref[...] += jnp.sum(acc, axis=0, keepdims=True)
        ssq_ref[...] += jnp.sum(acc * acc, axis=0, keepdims=True)


def conv3x3_with_stats(x_pad, w_mat, *, H, W, Np, Cin, CP):
    """x_pad: (H+2, (W+2)*Np, Cin) bf16;  w_mat: (9, Cin, CP) bf16."""
    # Biggest row block whose f32 output tile stays around <= 4 MiB.
    cap = max(1, (4 * 1024 * 1024) // (W * Np * CP * 4))
    TH = _largest_divisor_leq(H, cap)

    kernel = functools.partial(_conv3x3_kernel, TH=TH, W=W, Np=Np, CP=CP)
    out_shapes = (
        jax.ShapeDtypeStruct((H, W * Np, CP), jnp.float32),
        jax.ShapeDtypeStruct((1, CP), jnp.float32),
        jax.ShapeDtypeStruct((1, CP), jnp.float32),
    )
    # TODO(synk): for very large H*W*N*Cin the resident padded-input slab would
    # exceed VMEM; that case needs an H-tiled (haloed) input pipeline.
    grid_spec = pltpu.PrefetchScalarGridSpec(
        num_scalar_prefetch=0,
        grid=(H // TH,),
        in_specs=[
            pl.BlockSpec((H + 2, (W + 2) * Np, Cin), lambda i: (0, 0, 0)),
            pl.BlockSpec((9, Cin, CP), lambda i: (0, 0, 0)),
        ],
        out_specs=[
            pl.BlockSpec((TH, W * Np, CP), lambda i: (i, 0, 0)),
            pl.BlockSpec((1, CP), lambda i: (0, 0)),
            pl.BlockSpec((1, CP), lambda i: (0, 0)),
        ],
    )
    return pl.pallas_call(
        kernel,
        out_shape=out_shapes,
        grid_spec=grid_spec,
        compiler_params=pltpu.CompilerParams(
            dimension_semantics=("arbitrary",)),   # stats accumulate over rows
    )(x_pad, w_mat)


# ----------------------------------------------------------------------------
# Kernel 2: fused BatchNorm (precomputed scale/shift) + ReLU + 2x2/2 MaxPool.
#           Operates on large full-width row blocks of the (H, W, Np, CP)
#           conv-output layout; pooling only touches leading dims.
# ----------------------------------------------------------------------------
def _bn_relu_pool_kernel(y_ref, scale_ref, shift_ref, o_ref, *, TH2, Wp, Np, CP):
    z = y_ref[...] * scale_ref[...] + shift_ref[...]        # BN affine
    z = jnp.maximum(z, 0.0)                                 # ReLU
    # 2x2 max pool: pairs along H, then pairs along W (leading dims only).
    z = z.reshape(TH2, 2, 2 * Wp, Np, CP)
    z = jnp.maximum(z[:, 0], z[:, 1])                       # (TH2, W, Np, CP)
    z = z.reshape(TH2, Wp, 2, Np, CP)
    z = jnp.maximum(z[:, :, 0], z[:, :, 1])                 # (TH2, Wp, Np, CP)
    o_ref[...] = z


def bn_relu_pool(y4, scale, shift, *, Np, CP):
    H, W = y4.shape[0], y4.shape[1]
    Hp, Wp = H // 2, W // 2
    cap = max(1, (4 * 1024 * 1024) // (2 * W * Np * CP * 4))
    TH2 = _largest_divisor_leq(Hp, cap)

    kernel = functools.partial(_bn_relu_pool_kernel, TH2=TH2, Wp=Wp, Np=Np, CP=CP)
    grid_spec = pltpu.PrefetchScalarGridSpec(
        num_scalar_prefetch=0,
        grid=(Hp // TH2,),
        in_specs=[
            pl.BlockSpec((2 * TH2, W, Np, CP), lambda i: (i, 0, 0, 0)),
            pl.BlockSpec((1, CP), lambda i: (0, 0)),
            pl.BlockSpec((1, CP), lambda i: (0, 0)),
        ],
        out_specs=pl.BlockSpec((TH2, Wp, Np, CP), lambda i: (i, 0, 0, 0)),
    )
    return pl.pallas_call(
        kernel,
        out_shape=jax.ShapeDtypeStruct((Hp, Wp, Np, CP), jnp.float32),
        grid_spec=grid_spec,
        compiler_params=pltpu.CompilerParams(
            dimension_semantics=("parallel",)),
    )(y4, scale, shift)


# ----------------------------------------------------------------------------
# BasicConv forward (use_pool=True), kernel_size=3, padding=1, stride=1.
# ----------------------------------------------------------------------------
def basic_conv_forward(x_nchw, conv_w, conv_b, gamma, beta, *, eps=1e-3):
    # conv_b is intentionally unused: with train-mode BatchNorm immediately
    # after the conv, a per-channel bias shifts the batch mean by exactly that
    # amount and leaves the normalized output unchanged.
    del conv_b
    N, Cin, H, W = x_nchw.shape
    Cout = conv_w.shape[0]
    Np = _round_up(N, 8)          # batch padded -> aligned sublane tiles
    CP = _round_up(Cout, 128)     # channels padded -> lane-dense stores

    # --- layout + zero padding only (no im2col materialization) -------------
    xt = jnp.transpose(x_nchw, (2, 3, 0, 1)).astype(jnp.float32)   # (H, W, N, Cin)
    xt = jnp.pad(xt, ((1, 1), (1, 1), (0, Np - N), (0, 0)))        # (H+2, W+2, Np, Cin)
    x_pad = xt.reshape(H + 2, (W + 2) * Np, Cin).astype(jnp.bfloat16)

    w_mat = jnp.transpose(conv_w, (2, 3, 1, 0)).reshape(9, Cin, Cout)
    w_mat = jnp.pad(w_mat, ((0, 0), (0, 0), (0, CP - Cout))).astype(jnp.bfloat16)

    # --- fused conv + BN-stat accumulation (Pallas, bf16 MXU / f32 acc) ------
    y, ch_sum, ch_ssq = conv3x3_with_stats(x_pad, w_mat,
                                           H=H, W=W, Np=Np, Cin=Cin, CP=CP)

    # --- BN scale/shift from batch statistics (training mode, biased var) ---
    m = float(N * H * W)          # padded batch entries are all-zero -> contribute 0
    mean = ch_sum / m
    var = ch_ssq / m - mean * mean
    gamma_p = jnp.pad(gamma.astype(jnp.float32), (0, CP - Cout)).reshape(1, CP)
    beta_p = jnp.pad(beta.astype(jnp.float32), (0, CP - Cout)).reshape(1, CP)
    scale = gamma_p * jax.lax.rsqrt(var + eps)
    shift = beta_p - mean * scale

    # --- fused BN + ReLU + MaxPool (Pallas) ----------------------------------
    y4 = y.reshape(H, W, Np, CP)                               # free reshape
    pooled = bn_relu_pool(y4, scale, shift, Np=Np, CP=CP)      # (H/2, W/2, Np, CP)

    out = pooled[:, :, :N, :Cout]                              # drop padding
    return jnp.transpose(out, (2, 3, 0, 1))                    # NCHW


# ----------------------------------------------------------------------------
# Pure-JAX reference (numerical sanity check, includes the conv bias).
# ----------------------------------------------------------------------------
def basic_conv_reference(x, w, b, gamma, beta, *, eps=1e-3):
    y = jax.lax.conv_general_dilated(
        x, w, window_strides=(1, 1), padding=((1, 1), (1, 1)),
        dimension_numbers=("NCHW", "OIHW", "NCHW"))
    y = y + b[None, :, None, None]
    mean = y.mean(axis=(0, 2, 3))
    var = y.var(axis=(0, 2, 3))                                # biased
    xhat = (y - mean[None, :, None, None]) / jnp.sqrt(var + eps)[None, :, None, None]
    z = jnp.maximum(gamma[None, :, None, None] * xhat + beta[None, :, None, None], 0.0)
    N, C, H, W = z.shape
    return z.reshape(N, C, H // 2, 2, W // 2, 2).max(axis=(3, 5))


if __name__ == "__main__":
    N, Cin, H, W = 2, 4, 16, 16
    Cout = 8

    key = jax.random.PRNGKey(0)
    kx, kw, kb, kg, kbeta = jax.random.split(key, 5)

    x = jax.random.normal(kx, (N, Cin, H, W), dtype=jnp.float32)
    conv_w = 0.1 * jax.random.normal(kw, (Cout, Cin, 3, 3), dtype=jnp.float32)
    conv_b = 0.05 * jax.random.normal(kb, (Cout,), dtype=jnp.float32)
    gamma = 1.0 + 0.1 * jax.random.normal(kg, (Cout,), dtype=jnp.float32)
    beta = 0.05 * jax.random.normal(kbeta, (Cout,), dtype=jnp.float32)

    fwd = jax.jit(basic_conv_forward)
    out = jax.block_until_ready(fwd(x, conv_w, conv_b, gamma, beta))

    ref = basic_conv_reference(x, conv_w, conv_b, gamma, beta)
    assert out.shape == (N, Cout, H // 2, W // 2), out.shape
    np.testing.assert_allclose(np.asarray(out), np.asarray(ref),
                               rtol=2e-2, atol=2e-2)

    print("KERNEL_OK")
</pallas_src>

<mosaic_0001>
module attributes {stable_mosaic.version = 11 : i64} {
  func.func @_conv3x3_kernel(%arg0: i32, %arg1: memref<18x144x4xbf16, #tpu.memory_space<vmem>>, %arg2: memref<9x4x128xbf16, #tpu.memory_space<vmem>>, %arg3: memref<16x128x128xf32, #tpu.memory_space<vmem>>, %arg4: memref<1x128xf32, #tpu.memory_space<vmem>>, %arg5: memref<1x128xf32, #tpu.memory_space<vmem>>) attributes {dimension_semantics = [#tpu.dimension_semantics<arbitrary>], iteration_bounds = array<i64: 1>, scalar_prefetch = 0 : i64, scratch_operands = 0 : i64, tpu.core_type = #tpu.core_type<tc>, window_params = [{pipeline_mode = #tpu.pipeline_mode<synchronous>, transform_indices = @transform_0, window_bounds = array<i64: 18, 144, 4>}, {pipeline_mode = #tpu.pipeline_mode<synchronous>, transform_indices = @transform_1, window_bounds = array<i64: 9, 4, 128>}, {transform_indices = @transform_2, window_bounds = array<i64: 16, 128, 128>}, {pipeline_mode = #tpu.pipeline_mode<synchronous>, transform_indices = @transform_3, window_bounds = array<i64: 1, 128>}, {pipeline_mode = #tpu.pipeline_mode<synchronous>, transform_indices = @transform_4, window_bounds = array<i64: 1, 128>}]} {
    %c16_i32 = arith.constant 16 : i32
    %0 = arith.muli %arg0, %c16_i32 : i32
    %c0_i32 = arith.constant 0 : i32
    %1 = arith.cmpi eq, %arg0, %c0_i32 : i32
    %2 = arith.extui %1 : i1 to i32
    %c0_i32_0 = arith.constant 0 : i32
    %3 = arith.cmpi ne, %2, %c0_i32_0 : i32
    scf.if %3 {
      %cst = arith.constant 0.000000e+00 : f32
      %5 = vector.broadcast %cst : f32 to vector<1x128xf32>
      %c0 = arith.constant 0 : index
      %c0_4 = arith.constant 0 : index
      %6 = vector.load %arg4[%c0, %c0_4] : memref<1x128xf32, #tpu.memory_space<vmem>>, vector<1x128xf32>
      tpu.vector_store %arg4[%c0, %c0_4], %5 {strides = array<i32>} : memref<1x128xf32, #tpu.memory_space<vmem>>, vector<1x128xf32>,
      %cst_5 = arith.constant 0.000000e+00 : f32
      %7 = vector.broadcast %cst_5 : f32 to vector<1x128xf32>
      %c0_6 = arith.constant 0 : index
      %c0_7 = arith.constant 0 : index
      %8 = vector.load %arg5[%c0_6, %c0_7] : memref<1x128xf32, #tpu.memory_space<vmem>>, vector<1x128xf32>
      tpu.vector_store %arg5[%c0_6, %c0_7], %7 {strides = array<i32>} : memref<1x128xf32, #tpu.memory_space<vmem>>, vector<1x128xf32>,
    } else {
    }
    %c0_i32_1 = arith.constant 0 : i32
    %c16_i32_2 = arith.constant 16 : i32
    %4 = arith.addi %c0_i32_1, %c16_i32_2 : i32
    %c1_i32 = arith.constant 1 : i32
    scf.for %arg6 = %c0_i32_1 to %4 step %c1_i32  : i32 {
      %c1_i32_4 = arith.constant 1 : i32
      %5 = arith.muli %arg6, %c1_i32_4 : i32
      %c0_i32_5 = arith.constant 0 : i32
      %6 = arith.addi %c0_i32_5, %5 : i32
      %cst = arith.constant 0.000000e+00 : f32
      %7 = vector.broadcast %cst : f32 to vector<128x128xf32>
      %8 = arith.addi %0, %6 : i32
      %c0_i32_6 = arith.constant 0 : i32
      %9 = arith.addi %8, %c0_i32_6 : i32
      %10 = arith.index_cast %9 : i32 to index
      %c0 = arith.constant 0 : index
      %c0_7 = arith.constant 0 : index
      %11 = vector.load %arg1[%10, %c0, %c0_7] : memref<18x144x4xbf16, #tpu.memory_space<vmem>>, vector<1x128x4xbf16>
      %12 = vector.shape_cast %11 : vector<1x128x4xbf16> to vector<128x4xbf16>
      %c0_8 = arith.constant 0 : index
      %c0_9 = arith.constant 0 : index
      %c0_10 = arith.constant 0 : index
      %13 = vector.load %arg2[%c0_8, %c0_9, %c0_10] : memref<9x4x128xbf16, #tpu.memory_space<vmem>>, vector<1x4x128xbf16>
      %14 = vector.shape_cast %13 : vector<1x4x128xbf16> to vector<4x128xbf16>
      %cst_11 = arith.constant dense<0.000000e+00> : vector<128x128xf32>
      %15 = tpu.matmul %12, %14, %cst_11 {dimension_numbers = #tpu.dot_dimension_numbers<[1], [0], [0], [1], [0, 0, 1, 1], [], []>} : vector<128x4xbf16>, vector<4x128xbf16>, vector<128x128xf32> -> vector<128x128xf32>
      %16 = arith.addf %7, %15 : vector<128x128xf32>
      %17 = arith.addi %0, %6 : i32
      %c0_i32_12 = arith.constant 0 : i32
      %18 = arith.addi %17, %c0_i32_12 : i32
      %19 = arith.index_cast %18 : i32 to index
      %c8 = arith.constant 8 : index
      %c0_13 = arith.constant 0 : index
      %20 = vector.load %arg1[%19, %c8, %c0_13] : memref<18x144x4xbf16, #tpu.memory_space<vmem>>, vector<1x128x4xbf16>
      %21 = vector.shape_cast %20 : vector<1x128x4xbf16> to vector<128x4xbf16>
      %c1 = arith.constant 1 : index
      %c0_14 = arith.constant 0 : index
      %c0_15 = arith.constant 0 : index
      %22 = vector.load %arg2[%c1, %c0_14, %c0_15] : memref<9x4x128xbf16, #tpu.memory_space<vmem>>, vector<1x4x128xbf16>
      %23 = vector.shape_cast %22 : vector<1x4x128xbf16> to vector<4x128xbf16>
      %cst_16 = arith.constant dense<0.000000e+00> : vector<128x128xf32>
      %24 = tpu.matmul %21, %23, %cst_16 {dimension_numbers = #tpu.dot_dimension_numbers<[1], [0], [0], [1], [0, 0, 1, 1], [], []>} : vector<128x4xbf16>, vector<4x128xbf16>, vector<128x128xf32> -> vector<128x128xf32>
      %25 = arith.addf %16, %24 : vector<128x128xf32>
      %26 = arith.addi %0, %6 : i32
      %c0_i32_17 = arith.constant 0 : i32
      %27 = arith.addi %26, %c0_i32_17 : i32
      %28 = arith.index_cast %27 : i32 to index
      %c16 = arith.constant 16 : index
      %c0_18 = arith.constant 0 : index
      %29 = vector.load %arg1[%28, %c16, %c0_18] : memref<18x144x4xbf16, #tpu.memory_space<vmem>>, vector<1x128x4xbf16>
      %30 = vector.shape_cast %29 : vector<1x128x4xbf16> to vector<128x4xbf16>
      %c2 = arith.constant 2 : index
      %c0_19 = arith.constant 0 : index
      %c0_20 = arith.constant 0 : index
      %31 = vector.load %arg2[%c2, %c0_19, %c0_20] : memref<9x4x128xbf16, #tpu.memory_space<vmem>>, vector<1x4x128xbf16>
      %32 = vector.shape_cast %31 : vector<1x4x128xbf16> to vector<4x128xbf16>
      %cst_21 = arith.constant dense<0.000000e+00> : vector<128x128xf32>
      %33 = tpu.matmul %30, %32, %cst_21 {dimension_numbers = #tpu.dot_dimension_numbers<[1], [0], [0], [1], [0, 0, 1, 1], [], []>} : vector<128x4xbf16>, vector<4x128xbf16>, vector<128x128xf32> -> vector<128x128xf32>
      %34 = arith.addf %25, %33 : vector<128x128xf32>
      %35 = arith.addi %0, %6 : i32
      %c1_i32_22 = arith.constant 1 : i32
      %36 = arith.addi %35, %c1_i32_22 : i32
      %37 = arith.index_cast %36 : i32 to index
      %c0_23 = arith.constant 0 : index
      %c0_24 = arith.constant 0 : index
      %38 = vector.load %arg1[%37, %c0_23, %c0_24] : memref<18x144x4xbf16, #tpu.memory_space<vmem>>, vector<1x128x4xbf16>
      %39 = vector.shape_cast %38 : vector<1x128x4xbf16> to vector<128x4xbf16>
      %c3 = arith.constant 3 : index
      %c0_25 = arith.constant 0 : index
      %c0_26 = arith.constant 0 : index
      %40 = vector.load %arg2[%c3, %c0_25, %c0_26] : memref<9x4x128xbf16, #tpu.memory_space<vmem>>, vector<1x4x128xbf16>
      %41 = vector.shape_cast %40 : vector<1x4x128xbf16> to vector<4x128xbf16>
      %cst_27 = arith.constant dense<0.000000e+00> : vector<128x128xf32>
      %42 = tpu.matmul %39, %41, %cst_27 {dimension_numbers = #tpu.dot_dimension_numbers<[1], [0], [0], [1], [0, 0, 1, 1], [], []>} : vector<128x4xbf16>, vector<4x128xbf16>, vector<128x128xf32> -> vector<128x128xf32>
      %43 = arith.addf %34, %42 : vector<128x128xf32>
      %44 = arith.addi %0, %6 : i32
      %c1_i32_28 = arith.constant 1 : i32
      %45 = arith.addi %44, %c1_i32_28 : i32
      %46 = arith.index_cast %45 : i32 to index
      %c8_29 = arith.constant 8 : index
      %c0_30 = arith.constant 0 : index
      %47 = vector.load %arg1[%46, %c8_29, %c0_30] : memref<18x144x4xbf16, #tpu.memory_space<vmem>>, vector<1x128x4xbf16>
      %48 = vector.shape_cast %47 : vector<1x128x4xbf16> to vector<128x4xbf16>
      %c4 = arith.constant 4 : index
      %c0_31 = arith.constant 0 : index
      %c0_32 = arith.constant 0 : index
      %49 = vector.load %arg2[%c4, %c0_31, %c0_32] : memref<9x4x128xbf16, #tpu.memory_space<vmem>>, vector<1x4x128xbf16>
      %50 = vector.shape_cast %49 : vector<1x4x128xbf16> to vector<4x128xbf16>
      %cst_33 = arith.constant dense<0.000000e+00> : vector<128x128xf32>
      %51 = tpu.matmul %48, %50, %cst_33 {dimension_numbers = #tpu.dot_dimension_numbers<[1], [0], [0], [1], [0, 0, 1, 1], [], []>} : vector<128x4xbf16>, vector<4x128xbf16>, vector<128x128xf32> -> vector<128x128xf32>
      %52 = arith.addf %43, %51 : vector<128x128xf32>
      %53 = arith.addi %0, %6 : i32
      %c1_i32_34 = arith.constant 1 : i32
      %54 = arith.addi %53, %c1_i32_34 : i32
      %55 = arith.index_cast %54 : i32 to index
      %c16_35 = arith.constant 16 : index
      %c0_36 = arith.constant 0 : index
      %56 = vector.load %arg1[%55, %c16_35, %c0_36] : memref<18x144x4xbf16, #tpu.memory_space<vmem>>, vector<1x128x4xbf16>
      %57 = vector.shape_cast %56 : vector<1x128x4xbf16> to vector<128x4xbf16>
      %c5 = arith.constant 5 : index
      %c0_37 = arith.constant 0 : index
      %c0_38 = arith.constant 0 : index
      %58 = vector.load %arg2[%c5, %c0_37, %c0_38] : memref<9x4x128xbf16, #tpu.memory_space<vmem>>, vector<1x4x128xbf16>
      %59 = vector.shape_cast %58 : vector<1x4x128xbf16> to vector<4x128xbf16>
      %cst_39 = arith.constant dense<0.000000e+00> : vector<128x128xf32>
      %60 = tpu.matmul %57, %59, %cst_39 {dimension_numbers = #tpu.dot_dimension_numbers<[1], [0], [0], [1], [0, 0, 1, 1], [], []>} : vector<128x4xbf16>, vector<4x128xbf16>, vector<128x128xf32> -> vector<128x128xf32>
      %61 = arith.addf %52, %60 : vector<128x128xf32>
      %62 = arith.addi %0, %6 : i32
      %c2_i32 = arith.constant 2 : i32
      %63 = arith.addi %62, %c2_i32 : i32
      %64 = arith.index_cast %63 : i32 to index
      %c0_40 = arith.constant 0 : index
      %c0_41 = arith.constant 0 : index
      %65 = vector.load %arg1[%64, %c0_40, %c0_41] : memref<18x144x4xbf16, #tpu.memory_space<vmem>>, vector<1x128x4xbf16>
      %66 = vector.shape_cast %65 : vector<1x128x4xbf16> to vector<128x4xbf16>
      %c6 = arith.constant 6 : index
      %c0_42 = arith.constant 0 : index
      %c0_43 = arith.constant 0 : index
      %67 = vector.load %arg2[%c6, %c0_42, %c0_43] : memref<9x4x128xbf16, #tpu.memory_space<vmem>>, vector<1x4x128xbf16>
      %68 = vector.shape_cast %67 : vector<1x4x128xbf16> to vector<4x128xbf16>
      %cst_44 = arith.constant dense<0.000000e+00> : vector<128x128xf32>
      %69 = tpu.matmul %66, %68, %cst_44 {dimension_numbers = #tpu.dot_dimension_numbers<[1], [0], [0], [1], [0, 0, 1, 1], [], []>} : vector<128x4xbf16>, vector<4x128xbf16>, vector<128x128xf32> -> vector<128x128xf32>
      %70 = arith.addf %61, %69 : vector<128x128xf32>
      %71 = arith.addi %0, %6 : i32
      %c2_i32_45 = arith.constant 2 : i32
      %72 = arith.addi %71, %c2_i32_45 : i32
      %73 = arith.index_cast %72 : i32 to index
      %c8_46 = arith.constant 8 : index
      %c0_47 = arith.constant 0 : index
      %74 = vector.load %arg1[%73, %c8_46, %c0_47] : memref<18x144x4xbf16, #tpu.memory_space<vmem>>, vector<1x128x4xbf16>
      %75 = vector.shape_cast %74 : vector<1x128x4xbf16> to vector<128x4xbf16>
      %c7 = arith.constant 7 : index
      %c0_48 = arith.constant 0 : index
      %c0_49 = arith.constant 0 : index
      %76 = vector.load %arg2[%c7, %c0_48, %c0_49] : memref<9x4x128xbf16, #tpu.memory_space<vmem>>, vector<1x4x128xbf16>
      %77 = vector.shape_cast %76 : vector<1x4x128xbf16> to vector<4x128xbf16>
      %cst_50 = arith.constant dense<0.000000e+00> : vector<128x128xf32>
      %78 = tpu.matmul %75, %77, %cst_50 {dimension_numbers = #tpu.dot_dimension_numbers<[1], [0], [0], [1], [0, 0, 1, 1], [], []>} : vector<128x4xbf16>, vector<4x128xbf16>, vector<128x128xf32> -> vector<128x128xf32>
      %79 = arith.addf %70, %78 : vector<128x128xf32>
      %80 = arith.addi %0, %6 : i32
      %c2_i32_51 = arith.constant 2 : i32
      %81 = arith.addi %80, %c2_i32_51 : i32
      %82 = arith.index_cast %81 : i32 to index
      %c16_52 = arith.constant 16 : index
      %c0_53 = arith.constant 0 : index
      %83 = vector.load %arg1[%82, %c16_52, %c0_53] : memref<18x144x4xbf16, #tpu.memory_space<vmem>>, vector<1x128x4xbf16>
      %84 = vector.shape_cast %83 : vector<1x128x4xbf16> to vector<128x4xbf16>
      %c8_54 = arith.constant 8 : index
      %c0_55 = arith.constant 0 : index
      %c0_56 = arith.constant 0 : index
      %85 = vector.load %arg2[%c8_54, %c0_55, %c0_56] : memref<9x4x128xbf16, #tpu.memory_space<vmem>>, vector<1x4x128xbf16>
      %86 = vector.shape_cast %85 : vector<1x4x128xbf16> to vector<4x128xbf16>
      %cst_57 = arith.constant dense<0.000000e+00> : vector<128x128xf32>
      %87 = tpu.matmul %84, %86, %cst_57 {dimension_numbers = #tpu.dot_dimension_numbers<[1], [0], [0], [1], [0, 0, 1, 1], [], []>} : vector<128x4xbf16>, vector<4x128xbf16>, vector<128x128xf32> -> vector<128x128xf32>
      %88 = arith.addf %79, %87 : vector<128x128xf32>
      %89 = arith.index_cast %6 : i32 to index
      %c0_58 = arith.constant 0 : index
      %c0_59 = arith.constant 0 : index
      %90 = vector.load %arg3[%89, %c0_58, %c0_59] : memref<16x128x128xf32, #tpu.memory_space<vmem>>, vector<1x128x128xf32>
      %91 = vector.shape_cast %90 : vector<1x128x128xf32> to vector<128x128xf32>
      %92 = vector.shape_cast %88 : vector<128x128xf32> to vector<1x128x128xf32>
      tpu.vector_store %arg3[%89, %c0_58, %c0_59], %92 {strides = array<i32>} : memref<16x128x128xf32, #tpu.memory_space<vmem>>, vector<1x128x128xf32>,
      %c0_60 = arith.constant 0 : index
      %c0_61 = arith.constant 0 : index
      %93 = vector.load %arg4[%c0_60, %c0_61] : memref<1x128xf32, #tpu.memory_space<vmem>>, vector<1x128xf32>
      %cst_62 = arith.constant dense<0.000000e+00> : vector<128xf32>
      %94 = vector.multi_reduction <add>, %88, %cst_62 [0] : vector<128x128xf32> to vector<128xf32>
      %95 = vector.shape_cast %94 : vector<128xf32> to vector<1x128xf32>
      %96 = arith.addf %93, %95 : vector<1x128xf32>
      %c0_63 = arith.constant 0 : index
      %c0_64 = arith.constant 0 : index
      %97 = vector.load %arg4[%c0_63, %c0_64] : memref<1x128xf32, #tpu.memory_space<vmem>>, vector<1x128xf32>
      tpu.vector_store %arg4[%c0_63, %c0_64], %96 {strides = array<i32>} : memref<1x128xf32, #tpu.memory_space<vmem>>, vector<1x128xf32>,
      %c0_65 = arith.constant 0 : index
      %c0_66 = arith.constant 0 : index
      %98 = vector.load %arg5[%c0_65, %c0_66] : memref<1x128xf32, #tpu.memory_space<vmem>>, vector<1x128xf32>
      %99 = arith.mulf %88, %88 : vector<128x128xf32>
      %cst_67 = arith.constant dense<0.000000e+00> : vector<128xf32>
      %100 = vector.multi_reduction <add>, %99, %cst_67 [0] : vector<128x128xf32> to vector<128xf32>
      %101 = vector.shape_cast %100 : vector<128xf32> to vector<1x128xf32>
      %102 = arith.addf %98, %101 : vector<1x128xf32>
      %c0_68 = arith.constant 0 : index
      %c0_69 = arith.constant 0 : index
      %103 = vector.load %arg5[%c0_68, %c0_69] : memref<1x128xf32, #tpu.memory_space<vmem>>, vector<1x128xf32>
      tpu.vector_store %arg5[%c0_68, %c0_69], %102 {strides = array<i32>} : memref<1x128xf32, #tpu.memory_space<vmem>>, vector<1x128xf32>,
    }
    %c16_i32_3 = arith.constant 16 : i32
    return
  }
  func.func @transform_0(%arg0: i32) -> (i32, i32, i32) {
    %c0_i32 = arith.constant 0 : i32
    %c0_i32_0 = arith.constant 0 : i32
    %c0_i32_1 = arith.constant 0 : i32
    %c0_i32_2 = arith.constant 0 : i32
    return %c0_i32, %c0_i32_0, %c0_i32_1 : i32, i32, i32
  }
  func.func @transform_1(%arg0: i32) -> (i32, i32, i32) {
    %c0_i32 = arith.constant 0 : i32
    %c0_i32_0 = arith.constant 0 : i32
    %c0_i32_1 = arith.constant 0 : i32
    %c0_i32_2 = arith.constant 0 : i32
    return %c0_i32, %c0_i32_0, %c0_i32_1 : i32, i32, i32
  }
  func.func @transform_2(%arg0: i32) -> (i32, i32, i32) {
    %c0_i32 = arith.constant 0 : i32
    %c0_i32_0 = arith.constant 0 : i32
    %c0_i32_1 = arith.constant 0 : i32
    return %arg0, %c0_i32, %c0_i32_0 : i32, i32, i32
  }
  func.func @transform_3(%arg0: i32) -> (i32, i32) {
    %c0_i32 = arith.constant 0 : i32
    %c0_i32_0 = arith.constant 0 : i32
    %c0_i32_1 = arith.constant 0 : i32
    return %c0_i32, %c0_i32_0 : i32, i32
  }
  func.func @transform_4(%arg0: i32) -> (i32, i32) {
    %c0_i32 = arith.constant 0 : i32
    %c0_i32_0 = arith.constant 0 : i32
    %c0_i32_1 = arith.constant 0 : i32
    return %c0_i32, %c0_i32_0 : i32, i32
  }
}

module attributes {stable_mosaic.version = 11 : i64} {
  func.func @_bn_relu_pool_kernel(%arg0: i32, %arg1: memref<16x16x8x128xf32, #tpu.memory_space<vmem>>, %arg2: memref<1x128xf32, #tpu.memory_space<vmem>>, %arg3: memref<1x128xf32, #tpu.memory_space<vmem>>, %arg4: memref<8x8x8x128xf32, #tpu.memory_space<vmem>>) attributes {dimension_semantics = [#tpu.dimension_semantics<parallel>], iteration_bounds = array<i64: 1>, scalar_prefetch = 0 : i64, scratch_operands = 0 : i64, tpu.core_type = #tpu.core_type<tc>, window_params = [{transform_indices = @transform_0, window_bounds = array<i64: 16, 16, 8, 128>}, {pipeline_mode = #tpu.pipeline_mode<synchronous>, transform_indices = @transform_1, window_bounds = array<i64: 1, 128>}, {pipeline_mode = #tpu.pipeline_mode<synchronous>, transform_indices = @transform_2, window_bounds = array<i64: 1, 128>}, {transform_indices = @transform_3, window_bounds = array<i64: 8, 8, 8, 128>}]} {
    %c0 = arith.constant 0 : index
    %c0_0 = arith.constant 0 : index
    %c0_1 = arith.constant 0 : index
    %c0_2 = arith.constant 0 : index
    %0 = vector.load %arg1[%c0, %c0_0, %c0_1, %c0_2] : memref<16x16x8x128xf32, #tpu.memory_space<vmem>>, vector<16x16x8x128xf32>
    %c0_3 = arith.constant 0 : index
    %c0_4 = arith.constant 0 : index
    %1 = vector.load %arg2[%c0_3, %c0_4] : memref<1x128xf32, #tpu.memory_space<vmem>>, vector<1x128xf32>
    %2 = vector.shape_cast %1 : vector<1x128xf32> to vector<1x1x1x128xf32>
    %3 = vector.broadcast %2 : vector<1x1x1x128xf32> to vector<16x16x8x128xf32>
    %4 = arith.mulf %0, %3 : vector<16x16x8x128xf32>
    %c0_5 = arith.constant 0 : index
    %c0_6 = arith.constant 0 : index
    %5 = vector.load %arg3[%c0_5, %c0_6] : memref<1x128xf32, #tpu.memory_space<vmem>>, vector<1x128xf32>
    %6 = vector.shape_cast %5 : vector<1x128xf32> to vector<1x1x1x128xf32>
    %7 = vector.broadcast %6 : vector<1x1x1x128xf32> to vector<16x16x8x128xf32>
    %8 = arith.addf %4, %7 : vector<16x16x8x128xf32>
    %cst = arith.constant 0.000000e+00 : f32
    %9 = vector.broadcast %cst : f32 to vector<16x16x8x128xf32>
    %10 = arith.maximumf %8, %9 : vector<16x16x8x128xf32>
    %11 = vector.shape_cast %10 : vector<16x16x8x128xf32> to vector<8x2x16x8x128xf32>
    %12 = vector.extract_strided_slice %11 {offsets = [0, 0, 0, 0, 0], sizes = [8, 1, 16, 8, 128], strides = [1, 1, 1, 1, 1]} : vector<8x2x16x8x128xf32> to vector<8x1x16x8x128xf32>
    %13 = vector.shape_cast %12 : vector<8x1x16x8x128xf32> to vector<8x16x8x128xf32>
    %14 = vector.extract_strided_slice %11 {offsets = [0, 1, 0, 0, 0], sizes = [8, 1, 16, 8, 128], strides = [1, 1, 1, 1, 1]} : vector<8x2x16x8x128xf32> to vector<8x1x16x8x128xf32>
    %15 = vector.shape_cast %14 : vector<8x1x16x8x128xf32> to vector<8x16x8x128xf32>
    %16 = arith.maximumf %13, %15 : vector<8x16x8x128xf32>
    %17 = vector.shape_cast %16 : vector<8x16x8x128xf32> to vector<8x8x2x8x128xf32>
    %18 = vector.extract_strided_slice %17 {offsets = [0, 0, 0, 0, 0], sizes = [8, 8, 1, 8, 128], strides = [1, 1, 1, 1, 1]} : vector<8x8x2x8x128xf32> to vector<8x8x1x8x128xf32>
    %19 = vector.shape_cast %18 : vector<8x8x1x8x128xf32> to vector<8x8x8x128xf32>
    %20 = vector.extract_strided_slice %17 {offsets = [0, 0, 1, 0, 0], sizes = [8, 8, 1, 8, 128], strides = [1, 1, 1, 1, 1]} : vector<8x8x2x8x128xf32> to vector<8x8x1x8x128xf32>
    %21 = vector.shape_cast %20 : vector<8x8x1x8x128xf32> to vector<8x8x8x128xf32>
    %22 = arith.maximumf %19, %21 : vector<8x8x8x128xf32>
    %c0_7 = arith.constant 0 : index
    %c0_8 = arith.constant 0 : index
    %c0_9 = arith.constant 0 : index
    %c0_10 = arith.constant 0 : index
    %23 = vector.load %arg4[%c0_7, %c0_8, %c0_9, %c0_10] : memref<8x8x8x128xf32, #tpu.memory_space<vmem>>, vector<8x8x8x128xf32>
    tpu.vector_store %arg4[%c0_7, %c0_8, %c0_9, %c0_10], %22 {strides = array<i32>} : memref<8x8x8x128xf32, #tpu.memory_space<vmem>>, vector<8x8x8x128xf32>,
    return
  }
  func.func @transform_0(%arg0: i32) -> (i32, i32, i32, i32) {
    %c0_i32 = arith.constant 0 : i32
    %c0_i32_0 = arith.constant 0 : i32
    %c0_i32_1 = arith.constant 0 : i32
    %c0_i32_2 = arith.constant 0 : i32
    return %arg0, %c0_i32, %c0_i32_0, %c0_i32_1 : i32, i32, i32, i32
  }
  func.func @transform_1(%arg0: i32) -> (i32, i32) {
    %c0_i32 = arith.constant 0 : i32
    %c0_i32_0 = arith.constant 0 : i32
    %c0_i32_1 = arith.constant 0 : i32
    return %c0_i32, %c0_i32_0 : i32, i32
  }
  func.func @transform_2(%arg0: i32) -> (i32, i32) {
    %c0_i32 = arith.constant 0 : i32
    %c0_i32_0 = arith.constant 0 : i32
    %c0_i32_1 = arith.constant 0 : i32
    return %c0_i32, %c0_i32_0 : i32, i32
  }
  func.func @transform_3(%arg0: i32) -> (i32, i32, i32, i32) {
    %c0_i32 = arith.constant 0 : i32
    %c0_i32_0 = arith.constant 0 : i32
    %c0_i32_1 = arith.constant 0 : i32
    %c0_i32_2 = arith.constant 0 : i32
    return %arg0, %c0_i32, %c0_i32_0, %c0_i32_1 : i32, i32, i32, i32
  }
}

</mosaic_0001>

<bundles_post_ra>
// kernel: basic_conv_forward.2
= control target key start
LH: loop header
LB: loop body
LE: loop exit
PB: predicated region body
PF: predicated region fallthrough
CT: control target
= control target key end

     0   :  { %v1997_v0 = vmov 0.0   ;;  %s2029_s19 = smov 0   ;;  %s2341_s0 = inlined_call_operand.vmem [shape: bf16[18,144,4], index: 0, kind: input, shape index: {}]   ;;  %s2342_s1 = inlined_call_operand.vmem [shape: bf16[9,4,128], index: 1, kind: input, shape index: {}]   ;;  %s2343_s2 = inlined_call_operand.vmem [shape: f32[16,128,128], index: 2, kind: output, shape index: {0}]   ;;  %s2344_s3 = inlined_call_operand.vmem [shape: f32[1,128], index: 3, kind: output, shape index: {1}]   ;;  %s2345_s4 = inlined_call_operand.vmem [shape: f32[1,128], index: 4, kind: output, shape index: {2}]  }
   0x1   :  { %20 = vst [vmem:[%s2344_s3] sm:$0x1] %v1997_v0 }
   0x2   :  { %21 = vst [vmem:[%s2345_s4] sm:$0x1] %v1997_v0 }
   0x3 LB: > { %v1424_v1 = vld [vmem:[%s2342_s1 + $0x2] sm:$0x3]  ;;  %vm117_vm0 = vcmask 1041408   ;;  %v1441_v2 = vld [vmem:[%s2342_s1 + $0x4] sm:$0x3]  ;;  %s1825_s28 = smul.u32 72, %s1995_s19  ;;  %s1995_s19 = sphi %s2029_s19, %s27_s19  }
   0x4   : > { %v119_v3 = vsel %vm117_vm0, %v1424_v1, 0  ;;  %v339_v4 = vsel %vm117_vm0, %v1441_v2, 0  ;;  %v1498_v5 = vld [vmem:[%s2342_s1 + $0x6] sm:$0x3]  ;;  %v48_v6 = vld [vmem:[%s2342_s1] sm:$0x3] }
   0x5   : > { %1961 = vmatpush.bf16.msra.mxu1 %v119_v3  ;;  %1962 = vmatpush.bf16.msra.mxu2 %v119_v3  ;;  %v493_v7 = vsel %vm117_vm0, %v1498_v5, 0  ;;  %v205_v8 = vsel %vm117_vm0, %v48_v6, 0  ;;  %v1555_v9 = vld [vmem:[%s2342_s1 + $0x8] sm:$0x3]  ;;  %s2058_s7 = scalar_lea.vmem %s2341_s0, %s1825_s28  ;;  %vm92_vm1 = vcmask 31744   ;;  %s1824_s16 = sshll.u32 %s1995_s19, 7 }
   0x6   : > { %1963 = vmatpush.bf16.msra.mxu3 %v119_v3  ;;  %128 = vmatpush.bf16.msra.mxu0 %v119_v3  ;;  %v643_v10 = vsel %vm117_vm0, %v1555_v9, 0  ;;  %v1970_v11 = vld [vmem:[%s2058_s7 + $0x14] sm:$0xff]   ;;  %v1974_v12 = vld [vmem:[%s2058_s7 + $0x24] sm:$0xff]   ;;  %v1669_v15 = vld [vmem:[%s2342_s1 + $0xc] sm:$0x3]  ;;  %s2293_s20 = scalar_lea.vmem %s2343_s2, %s1824_s16  ;;  %s27_s19 = sadd.s32 1, %s1995_s19  }
   0x7   : > { %v1978_v13 = vld [vmem:[%s2058_s7 + $0x34] sm:$0xff]   ;;  %v1966_v14 = vld [vmem:[%s2058_s7 + $0x4] sm:$0xff]   ;;  %v947_v16 = vsel %vm117_vm0, %v1669_v15, 0  ;;  %v1726_v17 = vld [vmem:[%s2342_s1 + $0xe] sm:$0x3]  ;;  %p24_p0 = scmp.ge.s32.totalorder %s27_s19, 16  }
   0x8   : > { %1427 = vmatmul.msk.bf16.vlgmr.msra.gmra.mxu1 %vm92_vm1, %v1970_v11  ;;  %1429 = vmatmul.msk.bf16.vlgmr.msra.gmra.mxu2 %vm92_vm1, %v1974_v12  ;;  %v1612_v18 = vld [vmem:[%s2342_s1 + $0xa] sm:$0x3]  ;;  %v1097_v19 = vsel %vm117_vm0, %v1726_v17, 0  ;;  %v1783_v21 = vld [vmem:[%s2342_s1 + $0x10] sm:$0x3]  ;;  %v1972_v23 = vld [vmem:[%s2058_s7 + $0x1c] sm:$0xff]  }
   0x9   : > { %348 = vmatpush.bf16.msrb.mxu2 %v339_v4  ;;  %214 = vmatpush.bf16.msrb.mxu1 %v205_v8  ;;  %v793_v20 = vsel %vm117_vm0, %v1612_v18, 0  ;;  %v1247_v22 = vsel %vm117_vm0, %v1783_v21, 0  ;;  %v1976_v24 = vld [vmem:[%s2058_s7 + $0x2c] sm:$0xff]   ;;  %v1979_v25 = vld [vmem:[%s2058_s7 + $0x3c] sm:$0xff]  ;;  %v1843_v34 = vld [vmem:[%s2058_s7 + $0x54] sm:$0xff] }
   0xa   : > { %502 = vmatpush.bf16.msrb.mxu3 %v493_v7  ;;  %652 = vmatpush.bf16.msrb.mxu0 %v643_v10  ;;  %v1968_v26 = vld [vmem:[%s2058_s7 + $0xc] sm:$0xff]   ;;  %v1883_v28 = vld [vmem:[%s2058_s7] sm:$0xff]   ;;  %v1828_v35 = vld [vmem:[%s2058_s7 + $0x18] sm:$0xff] }
   0xb   : > { %1431 = vmatmul.msk.bf16.vlgmr.msra.gmra.mxu3 %vm92_vm1, %v1978_v13  ;;  %1425 = vmatmul.msk.bf16.vlgmr.msra.gmra.mxu0 %vm92_vm1, %v1966_v14  ;;  %v1826_v27 = vld [vmem:[%s2058_s7 + $0x8] sm:$0xff]  ;;  %v1827_v31 = vld [vmem:[%s2058_s7 + $0x10] sm:$0xff]  ;;  %v1836_v37 = vld [vmem:[%s2058_s7 + $0x58] sm:$0xff] }
   0xc   : > { %v1834_v29 = vld [vmem:[%s2058_s7 + $0x48] sm:$0xff]  ;;  %v1835_v33 = vld [vmem:[%s2058_s7 + $0x50] sm:$0xff]  ;;  %v1844_v38 = vld [vmem:[%s2058_s7 + $0x5c] sm:$0xff] }
   0xd   : > { %956 = vmatpush.bf16.msra.mxu2 %v947_v16  ;;  %802 = vmatpush.bf16.msra.mxu1 %v793_v20  ;;  %v1842_v30 = vld [vmem:[%s2058_s7 + $0x4c] sm:$0xff]  ;;  %v1829_v39 = vld [vmem:[%s2058_s7 + $0x20] sm:$0xff]  ;;  %v1916_v40 = vld [vmem:[%s2058_s7 + $0x18] sm:$0xff]  }
   0xe   : > { %1106 = vmatpush.bf16.msra.mxu3 %v1097_v19  ;;  %1256 = vmatpush.bf16.msra.mxu0 %v1247_v22  ;;  %v1914_v32 = vld [vmem:[%s2058_s7 + $0x8] sm:$0xff]   ;;  %v1915_v36 = vld [vmem:[%s2058_s7 + $0x10] sm:$0xff]   ;;  %v1837_v41 = vld [vmem:[%s2058_s7 + $0x60] sm:$0xff] }
   0xf   : > { %v1845_v42 = vld [vmem:[%s2058_s7 + $0x64] sm:$0xff]  ;;  %v1846_v46 = vld [vmem:[%s2058_s7 + $0x6c] sm:$0xff]  ;;  %v1847_v50 = vld [vmem:[%s2058_s7 + $0x74] sm:$0xff] }
  0x10   : > { %v1830_v43 = vld [vmem:[%s2058_s7 + $0x28] sm:$0xff]  ;;  %v1917_v44 = vld [vmem:[%s2058_s7 + $0x20] sm:$0xff]   ;;  %v1831_v47 = vld [vmem:[%s2058_s7 + $0x30] sm:$0xff] }
  0x11   : > { %v1838_v45 = vld [vmem:[%s2058_s7 + $0x68] sm:$0xff]  ;;  %v1839_v49 = vld [vmem:[%s2058_s7 + $0x70] sm:$0xff]  ;;  %v1832_v51 = vld [vmem:[%s2058_s7 + $0x38] sm:$0xff] }
  0x12   : > { %v1918_v48 = vld [vmem:[%s2058_s7 + $0x28] sm:$0xff]   ;;  %v1919_v53 = vld [vmem:[%s2058_s7 + $0x30] sm:$0xff]   ;;  %v1840_v54 = vld [vmem:[%s2058_s7 + $0x78] sm:$0xff] }
  0x13   : > { %v1848_v55 = vld [vmem:[%s2058_s7 + $0x7c] sm:$0xff]  ;;  %v1849_v3 = vld [vmem:[%s2058_s7 + $0x84] sm:$0xff]  ;;  %v1850_v11 = vld [vmem:[%s2058_s7 + $0x50] sm:$0xff] }
  0x14   : > { %v1833_v63 = vld [vmem:[%s2058_s7 + $0x40] sm:$0xff]  ;;  %v1920_v1 = vld [vmem:[%s2058_s7 + $0x38] sm:$0xff]   ;;  %v1858_v12 = vld [vmem:[%s2058_s7 + $0x90] sm:$0xff] }
  0x15   : > { %v1841_v2 = vld [vmem:[%s2058_s7 + $0x80] sm:$0xff]  ;;  %v1866_v14 = vld [vmem:[%s2058_s7 + $0x94] sm:$0xff] }
  0x16   : > { %v1874_v15 = vld [vmem:[%s2058_s7 + $0x98] sm:$0xff] }
  0x18   : > { %1428 = vmatmul.msk.bf16.gmra.mxu1 %vm92_vm1, %v1972_v23  ;;  %1430 = vmatmul.msk.bf16.gmra.mxu2 %vm92_vm1, %v1976_v24 }
  0x1b   : > { %1432 = vmatmul.msk.bf16.gmra.mxu3 %vm92_vm1, %v1979_v25  ;;  %1426 = vmatmul.msk.bf16.gmra.mxu0 %vm92_vm1, %v1968_v26 }
  0x28   : > { %1433 = vmatmul.msk.bf16.vlgmr.msrb.gmra.mxu1 %vm92_vm1, %v1883_v28  ;;  %1474 = vmatmul.msk.bf16.vlgmr.msrb.gmra.mxu2 %vm92_vm1, %v1826_v27 }
  0x2b   : > { %1531 = vmatmul.msk.bf16.vlgmr.msrb.gmra.mxu3 %vm92_vm1, %v1834_v29  ;;  %1588 = vmatmul.msk.bf16.vlgmr.msrb.gmra.mxu0 %vm92_vm1, %v1842_v30  ;;  %v1851_v29 = vld [vmem:[%s2058_s7 + $0x58] sm:$0xff] }
  0x2c   : > { %v1859_v30 = vld [vmem:[%s2058_s7 + $0x98] sm:$0xff] }
  0x38   : > { %1434 = vmatmul.msk.bf16.gmra.mxu1 %vm92_vm1, %v1914_v32  ;;  %1475 = vmatmul.msk.bf16.gmra.mxu2 %vm92_vm1, %v1827_v31  ;;  %v1867_v32 = vld [vmem:[%s2058_s7 + $0x9c] sm:$0xff] }
  0x3b   : > { %1532 = vmatmul.msk.bf16.gmra.mxu3 %vm92_vm1, %v1835_v33  ;;  %1589 = vmatmul.msk.bf16.gmra.mxu0 %vm92_vm1, %v1843_v34  ;;  %v1875_v33 = vld [vmem:[%s2058_s7 + $0xa0] sm:$0xff] }
  0x48   : > { %1435 = vmatmul.msk.bf16.gmra.mxu1 %vm92_vm1, %v1915_v36  ;;  %1476 = vmatmul.msk.bf16.gmra.mxu2 %vm92_vm1, %v1828_v35 }
  0x4b   : > { %1533 = vmatmul.msk.bf16.gmra.mxu3 %vm92_vm1, %v1836_v37  ;;  %1590 = vmatmul.msk.bf16.gmra.mxu0 %vm92_vm1, %v1844_v38 }
  0x58   : > { %1436 = vmatmul.msk.bf16.gmra.mxu1 %vm92_vm1, %v1916_v40  ;;  %1477 = vmatmul.msk.bf16.gmra.mxu2 %vm92_vm1, %v1829_v39 }
  0x5b   : > { %1534 = vmatmul.msk.bf16.gmra.mxu3 %vm92_vm1, %v1837_v41  ;;  %1591 = vmatmul.msk.bf16.gmra.mxu0 %vm92_vm1, %v1845_v42 }
  0x68   : > { %1437 = vmatmul.msk.bf16.gmra.mxu1 %vm92_vm1, %v1917_v44  ;;  %1478 = vmatmul.msk.bf16.gmra.mxu2 %vm92_vm1, %v1830_v43 }
  0x6b   : > { %1535 = vmatmul.msk.bf16.gmra.mxu3 %vm92_vm1, %v1838_v45  ;;  %1592 = vmatmul.msk.bf16.gmra.mxu0 %vm92_vm1, %v1846_v46 }
  0x78   : > { %1438 = vmatmul.msk.bf16.gmra.mxu1 %vm92_vm1, %v1918_v48  ;;  %1479 = vmatmul.msk.bf16.gmra.mxu2 %vm92_vm1, %v1831_v47 }
  0x7b   : > { %1536 = vmatmul.msk.bf16.gmra.mxu3 %vm92_vm1, %v1839_v49  ;;  %1593 = vmatmul.msk.bf16.gmra.mxu0 %vm92_vm1, %v1847_v50  ;;  %v1852_v49 = vld [vmem:[%s2058_s7 + $0x60] sm:$0xff] }
  0x7c   : > { %v1860_v50 = vld [vmem:[%s2058_s7 + $0xa0] sm:$0xff] }
  0x85   : > { %v2141_v52 = vpop.f32.mrf.mxu1 }
  0x88   : > { %v130_v56 = vpop.f32.mrf.mxu0  ;;  %1439 = vmatmul.msk.bf16.gmra.mxu1 %vm92_vm1, %v1919_v53  ;;  %1480 = vmatmul.msk.bf16.gmra.mxu2 %vm92_vm1, %v1832_v51  ;;  %v1868_v53 = vld [vmem:[%s2058_s7 + $0xa4] sm:$0xff] }
  0x8b   : > { %1537 = vmatmul.msk.bf16.gmra.mxu3 %vm92_vm1, %v1840_v54  ;;  %1594 = vmatmul.msk.bf16.gmra.mxu0 %vm92_vm1, %v1848_v55  ;;  %v2150_v57 = vpop.f32.mrf.mxu2  ;;  %v1876_v54 = vld [vmem:[%s2058_s7 + $0xa8] sm:$0xff] }
  0x8d   : > { %v2154_v59 = vpop.f32.mrf.mxu1 }
  0x8e   : > { %v2152_v58 = vpop.f32.mrf.mxu3 }
  0x90   : > { %v132_v60 = vpop.f32.mrf.mxu0 }
  0x93   : > { %v2156_v61 = vpop.f32.mrf.mxu2 }
  0x95   : > { %v2161_v0 = vpop.f32.mrf.mxu1 }
  0x96   : > { %v2158_v62 = vpop.f32.mrf.mxu3 }
  0x98   : > { %v135_v4 = vpop.f32.mrf.mxu0  ;;  %1440 = vmatmul.msk.bf16.gmra.mxu1 %vm92_vm1, %v1920_v1  ;;  %1481 = vmatmul.msk.bf16.gmra.mxu2 %vm92_vm1, %v1833_v63 }
  0x9b   : > { %1538 = vmatmul.msk.bf16.gmra.mxu3 %vm92_vm1, %v1841_v2  ;;  %1595 = vmatmul.msk.bf16.gmra.mxu0 %vm92_vm1, %v1849_v3  ;;  %v2170_v5 = vpop.f32.mrf.mxu2 }
  0x9d   : > { %v2174_v7 = vpop.f32.mrf.mxu1 }
  0x9e   : > { %v2172_v6 = vpop.f32.mrf.mxu3 }
  0xa0   : > { %v137_v8 = vpop.f32.mrf.mxu0 }
  0xa3   : > { %v2176_v9 = vpop.f32.mrf.mxu2 }
  0xa5   : > { %v216_v13 = vpop.f32.mrf.mxu1 }
  0xa6   : > { %v2178_v10 = vpop.f32.mrf.mxu3  ;;  %v217_v16 = vadd.f32 %v216_v13, %v130_v56 }
  0xa8   : > { %v654_v17 = vpop.f32.mrf.mxu0  ;;  %1645 = vmatmul.msk.bf16.vlgmr.msra.gmra.mxu1 %vm92_vm1, %v1850_v11  ;;  %1702 = vmatmul.msk.bf16.vlgmr.msra.gmra.mxu2 %vm92_vm1, %v1858_v12 }
  0xab   : > { %1759 = vmatmul.msk.bf16.vlgmr.msra.gmra.mxu3 %vm92_vm1, %v1866_v14  ;;  %1816 = vmatmul.msk.bf16.vlgmr.msra.gmra.mxu0 %vm92_vm1, %v1874_v15  ;;  %v350_v18 = vpop.f32.mrf.mxu2 }
  0xac   : > { %v390_v19 = vadd.f32 %v350_v18, %v217_v16  ;;  %v1853_v16 = vld [vmem:[%s2058_s7 + $0x68] sm:$0xff] }
  0xad   : > { %v218_v21 = vpop.f32.mrf.mxu1 }
  0xae   : > { %v504_v20 = vpop.f32.mrf.mxu3  ;;  %v219_v23 = vadd.f32 %v218_v21, %v132_v60 }
  0xaf   : > { %v544_v22 = vadd.f32 %v504_v20, %v390_v19  ;;  %v1869_v19 = vld [vmem:[%s2058_s7 + $0xac] sm:$0xff] }
  0xb0   : > { %v656_v24 = vpop.f32.mrf.mxu0  ;;  %v1877_v20 = vld [vmem:[%s2058_s7 + $0xb0] sm:$0xff] }
  0xb1   : > { %v2188_v25 = vadd.f32 %v654_v17, %v544_v22  ;;  %v1861_v17 = vld [vmem:[%s2058_s7 + $0xa8] sm:$0xff] }
  0xb3   : > { %v352_v26 = vpop.f32.mrf.mxu2 }
  0xb4   : > { %v391_v27 = vadd.f32 %v352_v26, %v219_v23 }
  0xb5   : > { %v221_v31 = vpop.f32.mrf.mxu1 }
  0xb6   : > { %v506_v28 = vpop.f32.mrf.mxu3  ;;  %v222_v35 = vadd.f32 %v221_v31, %v135_v4 }
  0xb7   : > { %v545_v34 = vadd.f32 %v506_v28, %v391_v27 }
  0xb8   : > { %v659_v36 = vpop.f32.mrf.mxu0  ;;  %1646 = vmatmul.msk.bf16.gmra.mxu1 %vm92_vm1, %v1851_v29  ;;  %1703 = vmatmul.msk.bf16.gmra.mxu2 %vm92_vm1, %v1859_v30 }
  0xb9   : > { %v2196_v37 = vadd.f32 %v656_v24, %v545_v34 }
  0xbb   : > { %1760 = vmatmul.msk.bf16.gmra.mxu3 %vm92_vm1, %v1867_v32  ;;  %1817 = vmatmul.msk.bf16.gmra.mxu0 %vm92_vm1, %v1875_v33  ;;  %v355_v38 = vpop.f32.mrf.mxu2 }
  0xbc   : > { %v392_v39 = vadd.f32 %v355_v38, %v222_v35  ;;  %v1854_v35 = vld [vmem:[%s2058_s7 + $0x70] sm:$0xff] }
  0xbd   : > { %v223_v41 = vpop.f32.mrf.mxu1 }
  0xbe   : > { %v509_v40 = vpop.f32.mrf.mxu3  ;;  %v224_v43 = vadd.f32 %v223_v41, %v137_v8 }
  0xbf   : > { %v546_v42 = vadd.f32 %v509_v40, %v392_v39  ;;  %v1870_v39 = vld [vmem:[%s2058_s7 + $0xb4] sm:$0xff] }
  0xc0   : > { %v661_v44 = vpop.f32.mrf.mxu0  ;;  %v1878_v40 = vld [vmem:[%s2058_s7 + $0xb8] sm:$0xff] }
  0xc1   : > { %v2200_v45 = vadd.f32 %v659_v36, %v546_v42  ;;  %v1862_v36 = vld [vmem:[%s2058_s7 + $0xb0] sm:$0xff] }
  0xc3   : > { %v357_v46 = vpop.f32.mrf.mxu2 }
  0xc4   : > { %v393_v47 = vadd.f32 %v357_v46, %v224_v43 }
  0xc5   : > { %v226_v51 = vpop.f32.mrf.mxu1 }
  0xc6   : > { %v511_v48 = vpop.f32.mrf.mxu3  ;;  %v227_v56 = vadd.f32 %v226_v51, %v2141_v52 }
  0xc7   : > { %v547_v55 = vadd.f32 %v511_v48, %v393_v47 }
  0xc8   : > { %v664_v60 = vpop.f32.mrf.mxu0  ;;  %1647 = vmatmul.msk.bf16.gmra.mxu1 %vm92_vm1, %v1852_v49  ;;  %1704 = vmatmul.msk.bf16.gmra.mxu2 %vm92_vm1, %v1860_v50 }
  0xc9   : > { %v2209_v63 = vadd.f32 %v661_v44, %v547_v55 }
  0xcb   : > { %1761 = vmatmul.msk.bf16.gmra.mxu3 %vm92_vm1, %v1868_v53  ;;  %1818 = vmatmul.msk.bf16.gmra.mxu0 %vm92_vm1, %v1876_v54  ;;  %v360_v1 = vpop.f32.mrf.mxu2 }
  0xcc   : > { %v394_v2 = vadd.f32 %v360_v1, %v227_v56  ;;  %v1863_v1 = vld [vmem:[%s2058_s7 + $0xb8] sm:$0xff] }
  0xcd   : > { %v228_v4 = vpop.f32.mrf.mxu1 }
  0xce   : > { %v514_v3 = vpop.f32.mrf.mxu3  ;;  %v229_v8 = vadd.f32 %v228_v4, %v2154_v59  ;;  %v1879_v4 = vld [vmem:[%s2058_s7 + $0xc0] sm:$0xff] }
  0xcf   : > { %v548_v52 = vadd.f32 %v514_v3, %v394_v2  ;;  %v1871_v3 = vld [vmem:[%s2058_s7 + $0xbc] sm:$0xff] }
  0xd0   : > { %v666_v11 = vpop.f32.mrf.mxu0 }
  0xd1   : > { %v2214_v12 = vadd.f32 %v664_v60, %v548_v52  ;;  %v1855_v60 = vld [vmem:[%s2058_s7 + $0x78] sm:$0xff] }
  0xd3   : > { %v362_v13 = vpop.f32.mrf.mxu2 }
  0xd4   : > { %v395_v14 = vadd.f32 %v362_v13, %v229_v8 }
  0xd5   : > { %v231_v18 = vpop.f32.mrf.mxu1 }
  0xd6   : > { %v516_v15 = vpop.f32.mrf.mxu3  ;;  %v232_v22 = vadd.f32 %v231_v18, %v2161_v0 }
  0xd7   : > { %v549_v21 = vadd.f32 %v516_v15, %v395_v14 }
  0xd8   : > { %v669_v23 = vpop.f32.mrf.mxu0  ;;  %1648 = vmatmul.msk.bf16.gmra.mxu1 %vm92_vm1, %v1853_v16  ;;  %1705 = vmatmul.msk.bf16.gmra.mxu2 %vm92_vm1, %v1861_v17 }
  0xd9   : > { %v2223_v59 = vadd.f32 %v666_v11, %v549_v21 }
  0xdb   : > { %1762 = vmatmul.msk.bf16.gmra.mxu3 %vm92_vm1, %v1869_v19  ;;  %1819 = vmatmul.msk.bf16.gmra.mxu0 %vm92_vm1, %v1877_v20  ;;  %v365_v24 = vpop.f32.mrf.mxu2 }
  0xdc   : > { %v396_v26 = vadd.f32 %v365_v24, %v232_v22  ;;  %v1864_v24 = vld [vmem:[%s2058_s7 + $0xc0] sm:$0xff] }
  0xdd   : > { %v233_v28 = vpop.f32.mrf.mxu1 }
  0xde   : > { %v519_v27 = vpop.f32.mrf.mxu3  ;;  %v234_v29 = vadd.f32 %v233_v28, %v2174_v7  ;;  %v1880_v28 = vld [vmem:[%s2058_s7 + $0xc8] sm:$0xff] }
  0xdf   : > { %v550_v0 = vadd.f32 %v519_v27, %v396_v26  ;;  %v1872_v27 = vld [vmem:[%s2058_s7 + $0xc4] sm:$0xff] }
  0xe0   : > { %v671_v30 = vpop.f32.mrf.mxu0 }
  0xe1   : > { %v2228_v31 = vadd.f32 %v669_v23, %v550_v0  ;;  %v1856_v23 = vld [vmem:[%s2058_s7 + $0x80] sm:$0xff] }
  0xe3   : > { %v367_v32 = vpop.f32.mrf.mxu2 }
  0xe4   : > { %v397_v33 = vadd.f32 %v367_v32, %v234_v29 }
  0xe5   : > { %v236_v38 = vpop.f32.mrf.mxu1 }
  0xe6   : > { %v521_v34 = vpop.f32.mrf.mxu3  ;;  %v237_v7 = vadd.f32 %v236_v38, %v2150_v57 }
  0xe7   : > { %v551_v41 = vadd.f32 %v521_v34, %v397_v33 }
  0xe8   : > { %v674_v42 = vpop.f32.mrf.mxu0  ;;  %1649 = vmatmul.msk.bf16.gmra.mxu1 %vm92_vm1, %v1854_v35  ;;  %1706 = vmatmul.msk.bf16.gmra.mxu2 %vm92_vm1, %v1862_v36 }
  0xe9   : > { %v2236_v43 = vadd.f32 %v671_v30, %v551_v41 }
  0xeb   : > { %1763 = vmatmul.msk.bf16.gmra.mxu3 %vm92_vm1, %v1870_v39  ;;  %1820 = vmatmul.msk.bf16.gmra.mxu0 %vm92_vm1, %v1878_v40  ;;  %v370_v44 = vpop.f32.mrf.mxu2 }
  0xec   : > { %v398_v46 = vadd.f32 %v370_v44, %v237_v7  ;;  %v1857_v7 = vld [vmem:[%s2058_s7 + $0x88] sm:$0xff] }
  0xed   : > { %v238_v48 = vpop.f32.mrf.mxu1  ;;  %v1865_v44 = vld [vmem:[%s2058_s7 + $0xc8] sm:$0xff] }
  0xee   : > { %v524_v47 = vpop.f32.mrf.mxu3  ;;  %v239_v53 = vadd.f32 %v238_v48, %v2156_v61  ;;  %v1881_v48 = vld [vmem:[%s2058_s7 + $0xd0] sm:$0xff] }
  0xef   : > { %v552_v49 = vadd.f32 %v524_v47, %v398_v46  ;;  %v1873_v47 = vld [vmem:[%s2058_s7 + $0xcc] sm:$0xff] }
  0xf0   : > { %v676_v50 = vpop.f32.mrf.mxu0 }
  0xf1   : > { %v2241_v51 = vadd.f32 %v674_v42, %v552_v49 }
  0xf3   : > { %v372_v54 = vpop.f32.mrf.mxu2 }
  0xf4   : > { %v399_v55 = vadd.f32 %v372_v54, %v239_v53 }
  0xf5   : > { %v241_v2 = vpop.f32.mrf.mxu1 }
  0xf6   : > { %v526_v56 = vpop.f32.mrf.mxu3  ;;  %v242_v61 = vadd.f32 %v241_v2, %v2170_v5 }
  0xf7   : > { %v553_v57 = vadd.f32 %v526_v56, %v399_v55 }
  0xf8   : > { %v679_v52 = vpop.f32.mrf.mxu0  ;;  %1650 = vmatmul.msk.bf16.gmra.mxu1 %vm92_vm1, %v1855_v60  ;;  %1707 = vmatmul.msk.bf16.gmra.mxu2 %vm92_vm1, %v1863_v1 }
  0xf9   : > { %v2250_v8 = vadd.f32 %v676_v50, %v553_v57 }
  0xfb   : > { %1764 = vmatmul.msk.bf16.gmra.mxu3 %vm92_vm1, %v1871_v3  ;;  %1821 = vmatmul.msk.bf16.gmra.mxu0 %vm92_vm1, %v1879_v4  ;;  %v375_v11 = vpop.f32.mrf.mxu2 }
  0xfc   : > { %v400_v13 = vadd.f32 %v375_v11, %v242_v61 }
  0xfd   : > { %v243_v15 = vpop.f32.mrf.mxu1 }
  0xfe   : > { %v529_v14 = vpop.f32.mrf.mxu3  ;;  %v244_v19 = vadd.f32 %v243_v15, %v2176_v9 }
  0xff   : > { %v554_v16 = vadd.f32 %v529_v14, %v400_v13 }
 0x100   : > { %v681_v17 = vpop.f32.mrf.mxu0 }
 0x101   : > { %v2255_v18 = vadd.f32 %v679_v52, %v554_v16 }
 0x103   : > { %v377_v20 = vpop.f32.mrf.mxu2 }
 0x104   : > { %v401_v21 = vadd.f32 %v377_v20, %v244_v19 }
 0x105   : > { %v246_v26 = vpop.f32.mrf.mxu1 }
 0x106   : > { %v531_v22 = vpop.f32.mrf.mxu3  ;;  %v247_v9 = vadd.f32 %v246_v26, %v2152_v58 }
 0x107   : > { %v555_v5 = vadd.f32 %v531_v22, %v401_v21 }
 0x108   : > { %v684_v0 = vpop.f32.mrf.mxu0  ;;  %1651 = vmatmul.msk.bf16.gmra.mxu1 %vm92_vm1, %v1856_v23  ;;  %1708 = vmatmul.msk.bf16.gmra.mxu2 %vm92_vm1, %v1864_v24 }
 0x109   : > { %v2264_v29 = vadd.f32 %v681_v17, %v555_v5 }
 0x10b   : > { %1765 = vmatmul.msk.bf16.gmra.mxu3 %vm92_vm1, %v1872_v27  ;;  %1822 = vmatmul.msk.bf16.gmra.mxu0 %vm92_vm1, %v1880_v28  ;;  %v380_v30 = vpop.f32.mrf.mxu2 }
 0x10c   : > { %v402_v32 = vadd.f32 %v380_v30, %v247_v9 }
 0x10d   : > { %v248_v34 = vpop.f32.mrf.mxu1 }
 0x10e   : > { %v534_v33 = vpop.f32.mrf.mxu3  ;;  %v249_v39 = vadd.f32 %v248_v34, %v2158_v62 }
 0x10f   : > { %v556_v35 = vadd.f32 %v534_v33, %v402_v32 }
 0x110   : > { %v686_v36 = vpop.f32.mrf.mxu0 }
 0x111   : > { %v2269_v38 = vadd.f32 %v684_v0, %v556_v35 }
 0x113   : > { %v382_v40 = vpop.f32.mrf.mxu2 }
 0x114   : > { %v403_v41 = vadd.f32 %v382_v40, %v249_v39 }
 0x115   : > { %v251_v46 = vpop.f32.mrf.mxu1 }
 0x116   : > { %v536_v42 = vpop.f32.mrf.mxu3  ;;  %v252_v62 = vadd.f32 %v251_v46, %v2172_v6 }
 0x117   : > { %v557_v58 = vadd.f32 %v536_v42, %v403_v41 }
 0x118   : > { %v689_v49 = vpop.f32.mrf.mxu0  ;;  %1652 = vmatmul.msk.bf16.gmra.mxu1 %vm92_vm1, %v1857_v7  ;;  %1709 = vmatmul.msk.bf16.gmra.mxu2 %vm92_vm1, %v1865_v44 }
 0x119   : > { %v2278_v50 = vadd.f32 %v686_v36, %v557_v58 }
 0x11b   : > { %1766 = vmatmul.msk.bf16.gmra.mxu3 %vm92_vm1, %v1873_v47  ;;  %1823 = vmatmul.msk.bf16.gmra.mxu0 %vm92_vm1, %v1881_v48  ;;  %v385_v53 = vpop.f32.mrf.mxu2 }
 0x11c   : > { %v404_v54 = vadd.f32 %v385_v53, %v252_v62 }
 0x11d   : > { %v253_v56 = vpop.f32.mrf.mxu1 }
 0x11e   : > { %v539_v55 = vpop.f32.mrf.mxu3  ;;  %v254_v3 = vadd.f32 %v253_v56, %v2178_v10 }
 0x11f   : > { %v558_v60 = vadd.f32 %v539_v55, %v404_v54 }
 0x120   : > { %v691_v1 = vpop.f32.mrf.mxu0 }
 0x121   : > { %v2283_v2 = vadd.f32 %v689_v49, %v558_v60 }
 0x123   : > { %v387_v4 = vpop.f32.mrf.mxu2 }
 0x124   : > { %v405_v57 = vadd.f32 %v387_v4, %v254_v3 }
 0x125   : > { %v804_v61 = vpop.f32.mrf.mxu1 }
 0x126   : > { %v541_v52 = vpop.f32.mrf.mxu3  ;;  %v844_v6 = vadd.f32 %v804_v61, %v2188_v25 }
 0x127   : > { %v559_v11 = vadd.f32 %v541_v52, %v405_v57 }
 0x128   : > { %v1258_v13 = vpop.f32.mrf.mxu0 }
 0x129   : > { %v2286_v14 = vadd.f32 %v691_v1, %v559_v11 }
 0x12b   : > { %v958_v15 = vpop.f32.mrf.mxu2 }
 0x12c   : > { %v998_v16 = vadd.f32 %v958_v15, %v844_v6 }
 0x12d   : > { %v806_v19 = vpop.f32.mrf.mxu1 }
 0x12e   : > { %v1108_v17 = vpop.f32.mrf.mxu3  ;;  %v845_v22 = vadd.f32 %v806_v19, %v2196_v37 }
 0x12f   : > { %v1148_v20 = vadd.f32 %v1108_v17, %v998_v16 }
 0x130   : > { %v1260_v21 = vpop.f32.mrf.mxu0 }
 0x131   : > { %v1298_v10 = vadd.f32 %v1258_v13, %v1148_v20 }
 0x133   : > { %1316 = vst [vmem:[%s2293_s20] sm:$0xff] %v1298_v10  ;;  %v960_v23 = vpop.f32.mrf.mxu2  ;;  %v1357_v0 = vmul.f32 %v1298_v10, %v1298_v10 }
 0x134   : > { %v999_v25 = vadd.f32 %v960_v23, %v845_v22 }
 0x135   : > { %v809_v26 = vpop.f32.mrf.mxu1 }
 0x136   : > { %v1110_v24 = vpop.f32.mrf.mxu3  ;;  %v846_v32 = vadd.f32 %v809_v26, %v2200_v45 }
 0x137   : > { %v1149_v27 = vadd.f32 %v1110_v24, %v999_v25 }
 0x138   : > { %v1263_v28 = vpop.f32.mrf.mxu0 }
 0x139   : > { %v1299_v5 = vadd.f32 %v1260_v21, %v1149_v27 }
 0x13b   : > { %1317 = vst [vmem:[%s2293_s20 + $0x8] sm:$0xff] %v1299_v5  ;;  %v1333_v9 = vadd.f32 %v1299_v5, %v1298_v10  ;;  %v1358_v30 = vmul.f32 %v1299_v5, %v1299_v5  ;;  %v963_v33 = vpop.f32.mrf.mxu2 }
 0x13c   : > { %v1000_v35 = vadd.f32 %v963_v33, %v846_v32 }
 0x13d   : > { %v1373_v34 = vadd.f32 %v1358_v30, %v1357_v0  ;;  %v811_v39 = vpop.f32.mrf.mxu1 }
 0x13e   : > { %v1113_v36 = vpop.f32.mrf.mxu3  ;;  %v847_v44 = vadd.f32 %v811_v39, %v2209_v63 }
 0x13f   : > { %v1150_v37 = vadd.f32 %v1113_v36, %v1000_v35 }
 0x140   : > { %v1265_v40 = vpop.f32.mrf.mxu0 }
 0x141   : > { %v1300_v41 = vadd.f32 %v1263_v28, %v1150_v37 }
 0x143   : > { %1318 = vst [vmem:[%s2293_s20 + $0x10] sm:$0xff] %v1300_v41  ;;  %v1334_v42 = vadd.f32 %v1333_v9, %v1300_v41  ;;  %v1359_v7 = vmul.f32 %v1300_v41, %v1300_v41  ;;  %v965_v46 = vpop.f32.mrf.mxu2 }
 0x144   : > { %v1001_v48 = vadd.f32 %v965_v46, %v847_v44 }
 0x145   : > { %v1374_v47 = vadd.f32 %v1373_v34, %v1359_v7  ;;  %v814_v49 = vpop.f32.mrf.mxu1 }
 0x146   : > { %v1115_v58 = vpop.f32.mrf.mxu3  ;;  %v848_v56 = vadd.f32 %v814_v49, %v2214_v12 }
 0x147   : > { %v1151_v45 = vadd.f32 %v1115_v58, %v1001_v48 }
 0x148   : > { %v1268_v62 = vpop.f32.mrf.mxu0 }
 0x149   : > { %v1301_v53 = vadd.f32 %v1265_v40, %v1151_v45 }
 0x14b   : > { %1319 = vst [vmem:[%s2293_s20 + $0x18] sm:$0xff] %v1301_v53  ;;  %v1335_v54 = vadd.f32 %v1334_v42, %v1301_v53  ;;  %v1360_v55 = vmul.f32 %v1301_v53, %v1301_v53  ;;  %v968_v60 = vpop.f32.mrf.mxu2 }
 0x14c   : > { %v1002_v3 = vadd.f32 %v968_v60, %v848_v56 }
 0x14d   : > { %v1375_v1 = vadd.f32 %v1374_v47, %v1360_v55  ;;  %v816_v57 = vpop.f32.mrf.mxu1 }
 0x14e   : > { %v1118_v4 = vpop.f32.mrf.mxu3  ;;  %v849_v6 = vadd.f32 %v816_v57, %v2223_v59 }
 0x14f   : > { %v1152_v63 = vadd.f32 %v1118_v4, %v1002_v3 }
 0x150   : > { %v1270_v52 = vpop.f32.mrf.mxu0 }
 0x151   : > { %v1302_v61 = vadd.f32 %v1268_v62, %v1152_v63 }
 0x153   : > { %1320 = vst [vmem:[%s2293_s20 + $0x20] sm:$0xff] %v1302_v61  ;;  %v1336_v11 = vadd.f32 %v1335_v54, %v1302_v61  ;;  %v1361_v13 = vmul.f32 %v1302_v61, %v1302_v61  ;;  %v970_v15 = vpop.f32.mrf.mxu2 }
 0x154   : > { %v1003_v17 = vadd.f32 %v970_v15, %v849_v6 }
 0x155   : > { %v1376_v16 = vadd.f32 %v1375_v1, %v1361_v13  ;;  %v819_v20 = vpop.f32.mrf.mxu1 }
 0x156   : > { %v1120_v19 = vpop.f32.mrf.mxu3  ;;  %v850_v25 = vadd.f32 %v819_v20, %v2228_v31 }
 0x157   : > { %v1153_v12 = vadd.f32 %v1120_v19, %v1003_v17 }
 0x158   : > { %v1273_v21 = vpop.f32.mrf.mxu0 }
 0x159   : > { %v1303_v10 = vadd.f32 %v1270_v52, %v1153_v12 }
 0x15b   : > { %1321 = vst [vmem:[%s2293_s20 + $0x28] sm:$0xff] %v1303_v10  ;;  %v1337_v22 = vadd.f32 %v1336_v11, %v1303_v10  ;;  %v1362_v23 = vmul.f32 %v1303_v10, %v1303_v10  ;;  %v973_v24 = vpop.f32.mrf.mxu2 }
 0x15c   : > { %v1004_v27 = vadd.f32 %v973_v24, %v850_v25 }
 0x15d   : > { %v1377_v26 = vadd.f32 %v1376_v16, %v1362_v23  ;;  %v821_v5 = vpop.f32.mrf.mxu1 }
 0x15e   : > { %v1123_v28 = vpop.f32.mrf.mxu3  ;;  %v851_v33 = vadd.f32 %v821_v5, %v2236_v43 }
 0x15f   : > { %v1154_v59 = vadd.f32 %v1123_v28, %v1004_v27 }
 0x160   : > { %v1275_v0 = vpop.f32.mrf.mxu0 }
 0x161   : > { %v1304_v9 = vadd.f32 %v1273_v21, %v1154_v59 }
 0x163   : > { %1322 = vst [vmem:[%s2293_s20 + $0x30] sm:$0xff] %v1304_v9  ;;  %v1338_v30 = vadd.f32 %v1337_v22, %v1304_v9  ;;  %v1363_v32 = vmul.f32 %v1304_v9, %v1304_v9  ;;  %v975_v34 = vpop.f32.mrf.mxu2 }
 0x164   : > { %v1005_v36 = vadd.f32 %v975_v34, %v851_v33 }
 0x165   : > { %v1378_v35 = vadd.f32 %v1377_v26, %v1363_v32  ;;  %v824_v37 = vpop.f32.mrf.mxu1 }
 0x166   : > { %v1125_v39 = vpop.f32.mrf.mxu3  ;;  %v852_v44 = vadd.f32 %v824_v37, %v2241_v51 }
 0x167   : > { %v1155_v31 = vadd.f32 %v1125_v39, %v1005_v36 }
 0x168   : > { %v1278_v40 = vpop.f32.mrf.mxu0 }
 0x169   : > { %v1305_v41 = vadd.f32 %v1275_v0, %v1155_v31 }
 0x16b   : > { %1323 = vst [vmem:[%s2293_s20 + $0x38] sm:$0xff] %v1305_v41  ;;  %v1339_v42 = vadd.f32 %v1338_v30, %v1305_v41  ;;  %v1364_v7 = vmul.f32 %v1305_v41, %v1305_v41  ;;  %v978_v46 = vpop.f32.mrf.mxu2 }
 0x16c   : > { %v1006_v48 = vadd.f32 %v978_v46, %v852_v44 }
 0x16d   : > { %v1379_v47 = vadd.f32 %v1378_v35, %v1364_v7  ;;  %v826_v49 = vpop.f32.mrf.mxu1 }
 0x16e   : > { %v1128_v58 = vpop.f32.mrf.mxu3  ;;  %v853_v55 = vadd.f32 %v826_v49, %v2250_v8 }
 0x16f   : > { %v1156_v43 = vadd.f32 %v1128_v58, %v1006_v48 }
 0x170   : > { %v1280_v45 = vpop.f32.mrf.mxu0 }
 0x171   : > { %v1306_v62 = vadd.f32 %v1278_v40, %v1156_v43 }
 0x173   : > { %1324 = vst [vmem:[%s2293_s20 + $0x40] sm:$0xff] %v1306_v62  ;;  %v1340_v53 = vadd.f32 %v1339_v42, %v1306_v62  ;;  %v1365_v54 = vmul.f32 %v1306_v62, %v1306_v62  ;;  %v980_v56 = vpop.f32.mrf.mxu2 }
 0x174   : > { %v1007_v1 = vadd.f32 %v980_v56, %v853_v55 }
 0x175   : > { %v1380_v60 = vadd.f32 %v1379_v47, %v1365_v54  ;;  %v829_v4 = vpop.f32.mrf.mxu1 }
 0x176   : > { %v1130_v3 = vpop.f32.mrf.mxu3  ;;  %v854_v11 = vadd.f32 %v829_v4, %v2255_v18 }
 0x177   : > { %v1157_v51 = vadd.f32 %v1130_v3, %v1007_v1 }
 0x178   : > { %v1283_v57 = vpop.f32.mrf.mxu0 }
 0x179   : > { %v1307_v63 = vadd.f32 %v1280_v45, %v1157_v51 }
 0x17b   : > { %1325 = vst [vmem:[%s2293_s20 + $0x48] sm:$0xff] %v1307_v63  ;;  %v1341_v52 = vadd.f32 %v1340_v53, %v1307_v63  ;;  %v1366_v61 = vmul.f32 %v1307_v63, %v1307_v63  ;;  %v983_v13 = vpop.f32.mrf.mxu2 }
 0x17c   : > { %v1008_v15 = vadd.f32 %v983_v13, %v854_v11 }
 0x17d   : > { %v1381_v6 = vadd.f32 %v1380_v60, %v1366_v61  ;;  %v831_v17 = vpop.f32.mrf.mxu1 }
 0x17e   : > { %v1133_v16 = vpop.f32.mrf.mxu3  ;;  %v855_v10 = vadd.f32 %v831_v17, %v2264_v29 }
 0x17f   : > { %v1158_v8 = vadd.f32 %v1133_v16, %v1008_v15 }
 0x180   : > { %v1285_v19 = vpop.f32.mrf.mxu0 }
 0x181   : > { %v1308_v20 = vadd.f32 %v1283_v57, %v1158_v8 }
 0x183   : > { %1326 = vst [vmem:[%s2293_s20 + $0x50] sm:$0xff] %v1308_v20  ;;  %v1342_v12 = vadd.f32 %v1341_v52, %v1308_v20  ;;  %v1367_v21 = vmul.f32 %v1308_v20, %v1308_v20  ;;  %v985_v22 = vpop.f32.mrf.mxu2 }
 0x184   : > { %v1009_v25 = vadd.f32 %v985_v22, %v855_v10 }
 0x185   : > { %v1382_v23 = vadd.f32 %v1381_v6, %v1367_v21  ;;  %v834_v18 = vpop.f32.mrf.mxu1  ;;  %v1332_v21 = vld [vmem:[%s2344_s3] sm:$0x1] }
 0x186   : > { %v1135_v24 = vpop.f32.mrf.mxu3  ;;  %v856_v0 = vadd.f32 %v834_v18, %v2269_v38 }
 0x187   : > { %v1159_v26 = vadd.f32 %v1135_v24, %v1009_v25 }
 0x188   : > { %v1288_v28 = vpop.f32.mrf.mxu0 }
 0x189   : > { %v1309_v27 = vadd.f32 %v1285_v19, %v1159_v26 }
 0x18b   : > { %1327 = vst [vmem:[%s2293_s20 + $0x58] sm:$0xff] %v1309_v27  ;;  %v1343_v5 = vadd.f32 %v1342_v12, %v1309_v27  ;;  %v1368_v59 = vmul.f32 %v1309_v27, %v1309_v27  ;;  %v988_v9 = vpop.f32.mrf.mxu2 }
 0x18c   : > { %v1010_v32 = vadd.f32 %v988_v9, %v856_v0 }
 0x18d   : > { %v1383_v30 = vadd.f32 %v1382_v23, %v1368_v59  ;;  %v836_v29 = vpop.f32.mrf.mxu1  ;;  %v1356_v23 = vld [vmem:[%s2345_s4] sm:$0x1] }
 0x18e   : > { %v1138_v33 = vpop.f32.mrf.mxu3  ;;  %v857_v37 = vadd.f32 %v836_v29, %v2278_v50 }
 0x18f   : > { %v1160_v34 = vadd.f32 %v1138_v33, %v1010_v32 }
 0x190   : > { %v1290_v31 = vpop.f32.mrf.mxu0 }
 0x191   : > { %v1310_v35 = vadd.f32 %v1288_v28, %v1160_v34 }
 0x193   : > { %1328 = vst [vmem:[%s2293_s20 + $0x60] sm:$0xff] %v1310_v35  ;;  %v1344_v36 = vadd.f32 %v1343_v5, %v1310_v35  ;;  %v1369_v39 = vmul.f32 %v1310_v35, %v1310_v35  ;;  %v990_v40 = vpop.f32.mrf.mxu2 }
 0x194   : > { %v1011_v42 = vadd.f32 %v990_v40, %v857_v37 }
 0x195   : > { %v1384_v41 = vadd.f32 %v1383_v30, %v1369_v39  ;;  %v839_v38 = vpop.f32.mrf.mxu1 }
 0x196   : > { %v1140_v7 = vpop.f32.mrf.mxu3  ;;  %v858_v58 = vadd.f32 %v839_v38, %v2283_v2 }
 0x197   : > { %v1161_v44 = vadd.f32 %v1140_v7, %v1011_v42 }
 0x198   : > { %v1293_v50 = vpop.f32.mrf.mxu0 }
 0x199   : > { %v1311_v46 = vadd.f32 %v1290_v31, %v1161_v44 }
 0x19b   : > { %1329 = vst [vmem:[%s2293_s20 + $0x68] sm:$0xff] %v1311_v46  ;;  %v1345_v47 = vadd.f32 %v1344_v36, %v1311_v46  ;;  %v1370_v48 = vmul.f32 %v1311_v46, %v1311_v46  ;;  %v993_v49 = vpop.f32.mrf.mxu2 }
 0x19c   : > { %v1012_v45 = vadd.f32 %v993_v49, %v858_v58 }
 0x19d   : > { %v1385_v43 = vadd.f32 %v1384_v41, %v1370_v48  ;;  %v841_v54 = vpop.f32.mrf.mxu1 }
 0x19e   : > { %v1143_v62 = vpop.f32.mrf.mxu3  ;;  %v859_v1 = vadd.f32 %v841_v54, %v2286_v14 }
 0x19f   : > { %v1162_v53 = vadd.f32 %v1143_v62, %v1012_v45 }
 0x1a0   : > { %v1295_v2 = vpop.f32.mrf.mxu0 }
 0x1a1   : > { %v1312_v55 = vadd.f32 %v1293_v50, %v1162_v53 }
 0x1a3   : > { %1330 = vst [vmem:[%s2293_s20 + $0x70] sm:$0xff] %v1312_v55  ;;  %v1346_v56 = vadd.f32 %v1345_v47, %v1312_v55  ;;  %v1371_v60 = vmul.f32 %v1312_v55, %v1312_v55  ;;  %v995_v3 = vpop.f32.mrf.mxu2 }
 0x1a4   : > { %v1013_v51 = vadd.f32 %v995_v3, %v859_v1 }
 0x1a5   : > { %v1386_v4 = vadd.f32 %v1385_v43, %v1371_v60 }
 0x1a6   : > { %v1145_v57 = vpop.f32.mrf.mxu3 }
 0x1a7   : > { %v1163_v63 = vadd.f32 %v1145_v57, %v1013_v51 }
 0x1a9   : > { %v1313_v52 = vadd.f32 %v1295_v2, %v1163_v63 }
 0x1ab   : > { %1331 = vst [vmem:[%s2293_s20 + $0x78] sm:$0xff] %v1313_v52  ;;  %v1347_v61 = vadd.f32 %v1346_v56, %v1313_v52  ;;  %v1372_v11 = vmul.f32 %v1313_v52, %v1313_v52 }
 0x1ad   : > { %v1348_v13 = vrot.slane %v1347_v61, 4  ;;  %v1387_v6 = vadd.f32 %v1386_v4, %v1372_v11 }
 0x1af   : > { %v1349_v15 = vadd.f32 %v1348_v13, %v1347_v61  ;;  %v1388_v16 = vrot.slane %v1387_v6, 4 }
 0x1b1   : > { %v1350_v17 = vrot.slane %v1349_v15, 2  ;;  %v1389_v8 = vadd.f32 %v1388_v16, %v1387_v6 }
 0x1b3   : > { %v1351_v19 = vadd.f32 %v1350_v17, %v1349_v15  ;;  %v1390_v20 = vrot.slane %v1389_v8, 2 }
 0x1b5   : > { %v1352_v12 = vrot.slane %v1351_v19, 1  ;;  %v1391_v14 = vadd.f32 %v1390_v20, %v1389_v8 }
 0x1b7   : > { %v1353_v10 = vadd.f32 %v1352_v12, %v1351_v19  ;;  %v1392_v22 = vrot.slane %v1391_v14, 1 }
 0x1b9   : > { %v1354_v25 = vadd.f32 %v1353_v10, %v1332_v21  ;;  %v1393_v24 = vadd.f32 %v1392_v22, %v1391_v14  ;;  %26 = sbr.rel (!%p24_p0) target bundleno = 3 (0x3), region = 67 }
 0x1bb   : > { %1355 = vst [vmem:[%s2344_s3] sm:$0x1] %v1354_v25  ;;  %v1394_v18 = vadd.f32 %v1393_v24, %v1356_v23 }
 0x1bd   : > { %1395 = vst [vmem:[%s2345_s4] sm:$0x1] %v1394_v18 }

// kernel: basic_conv_forward.3
= control target key start
LH: loop header
LB: loop body
LE: loop exit
PB: predicated region body
PF: predicated region fallthrough
CT: control target
= control target key end

     0   :  { %s2834_s0 = inlined_call_operand.vmem [shape: f32[16,16,8,128], index: 0, kind: input, shape index: {}]   ;;  %s2835_s1 = inlined_call_operand.vmem [shape: f32[1,128], index: 1, kind: input, shape index: {}]   ;;  %s2836_s2 = inlined_call_operand.vmem [shape: f32[1,128], index: 2, kind: input, shape index: {}]   ;;  %s2837_s3 = inlined_call_operand.vmem [shape: f32[8,8,8,128], index: 3, kind: output, shape index: {}]  }
   0x1   :  { %v14_v0 = vld [vmem:[%s2834_s0] sm:$0xff]  ;;  %v15_v1 = vld [vmem:[%s2834_s0 + $0x8] sm:$0xff]  ;;  %v16_v6 = vld [vmem:[%s2834_s0 + $0x10] sm:$0xff] }
   0x2   :  { %v30_v2 = vld [vmem:[%s2834_s0 + $0x80] sm:$0xff]  ;;  %v31_v3 = vld [vmem:[%s2834_s0 + $0x88] sm:$0xff]  ;;  %v17_v11 = vld [vmem:[%s2834_s0 + $0x18] sm:$0xff] }
   0x3   :  { %v1347_v4 = vld [vmem:[%s2835_s1] ss:$0 sm:$0xff]  ;;  %v32_v12 = vld [vmem:[%s2834_s0 + $0x90] sm:$0xff]  ;;  %v33_v13 = vld [vmem:[%s2834_s0 + $0x98] sm:$0xff] }
   0x4   :  { %v1352_v5 = vld [vmem:[%s2836_s2] ss:$0 sm:$0xff]  ;;  %v274_v7 = vmul.f32 %v1347_v4, %v14_v0  ;;  %v275_v8 = vmul.f32 %v1347_v4, %v15_v1  ;;  %v290_v9 = vmul.f32 %v1347_v4, %v30_v2  ;;  %v291_v10 = vmul.f32 %v1347_v4, %v31_v3  ;;  %v19_v27 = vld [vmem:[%s2834_s0 + $0x28] sm:$0xff]  ;;  %v20_v38 = vld [vmem:[%s2834_s0 + $0x30] sm:$0xff] }
   0x5   :  { %v276_v14 = vmul.f32 %v1347_v4, %v16_v6  ;;  %v277_v15 = vmul.f32 %v1347_v4, %v17_v11  ;;  %v292_v16 = vmul.f32 %v1347_v4, %v32_v12  ;;  %v293_v17 = vmul.f32 %v1347_v4, %v33_v13  ;;  %v18_v26 = vld [vmem:[%s2834_s0 + $0x20] sm:$0xff]  ;;  %v35_v33 = vld [vmem:[%s2834_s0 + $0xa8] sm:$0xff]  ;;  %v21_v43 = vld [vmem:[%s2834_s0 + $0x38] sm:$0xff] }
   0x6   :  { %v534_v18 = vadd.f32 %v1352_v5, %v274_v7  ;;  %v535_v19 = vadd.f32 %v1352_v5, %v275_v8  ;;  %v550_v20 = vadd.f32 %v1352_v5, %v290_v9  ;;  %v551_v21 = vadd.f32 %v1352_v5, %v291_v10  ;;  %v34_v32 = vld [vmem:[%s2834_s0 + $0xa0] sm:$0xff]  ;;  %v36_v48 = vld [vmem:[%s2834_s0 + $0xb0] sm:$0xff]  ;;  %v37_v49 = vld [vmem:[%s2834_s0 + $0xb8] sm:$0xff] }
   0x7   :  { %v536_v22 = vadd.f32 %v1352_v5, %v276_v14  ;;  %v537_v23 = vadd.f32 %v1352_v5, %v277_v15  ;;  %v552_v24 = vadd.f32 %v1352_v5, %v292_v16  ;;  %v553_v25 = vadd.f32 %v1352_v5, %v293_v17  ;;  %v22_v58 = vld [vmem:[%s2834_s0 + $0x40] sm:$0xff]  ;;  %v23_v59 = vld [vmem:[%s2834_s0 + $0x48] sm:$0xff]  ;;  %v24_v12 = vld [vmem:[%s2834_s0 + $0x50] sm:$0xff] }
   0x8   :  { %v790_v28 = vmax.f32 %v534_v18, 0.0  ;;  %v791_v29 = vmax.f32 %v535_v19, 0.0  ;;  %v806_v30 = vmax.f32 %v550_v20, 0.0  ;;  %v807_v31 = vmax.f32 %v551_v21, 0.0  ;;  %v38_v6 = vld [vmem:[%s2834_s0 + $0xc0] sm:$0xff]  ;;  %v39_v7 = vld [vmem:[%s2834_s0 + $0xc8] sm:$0xff] }
   0x9   :  { %v792_v34 = vmax.f32 %v536_v22, 0.0  ;;  %v793_v35 = vmax.f32 %v537_v23, 0.0  ;;  %v808_v36 = vmax.f32 %v552_v24, 0.0  ;;  %v809_v37 = vmax.f32 %v553_v25, 0.0  ;;  %v25_v21 = vld [vmem:[%s2834_s0 + $0x58] sm:$0xff]  ;;  %v40_v22 = vld [vmem:[%s2834_s0 + $0xd0] sm:$0xff] }
   0xa   :  { %v1046_v39 = vmax.f32 %v790_v28, %v806_v30  ;;  %v1047_v40 = vmax.f32 %v791_v29, %v807_v31  ;;  %v278_v41 = vmul.f32 %v1347_v4, %v18_v26  ;;  %v279_v42 = vmul.f32 %v1347_v4, %v19_v27  ;;  %v41_v26 = vld [vmem:[%s2834_s0 + $0xd8] sm:$0xff] }
   0xb   :  { %v1048_v44 = vmax.f32 %v792_v34, %v808_v36  ;;  %v1049_v45 = vmax.f32 %v793_v35, %v809_v37  ;;  %v294_v46 = vmul.f32 %v1347_v4, %v34_v32  ;;  %v295_v47 = vmul.f32 %v1347_v4, %v35_v33  ;;  %v26_v32 = vld [vmem:[%s2834_s0 + $0x60] sm:$0xff]  ;;  %v27_v37 = vld [vmem:[%s2834_s0 + $0x68] sm:$0xff] }
   0xc   :  { %v1174_v50 = vmax.f32 %v1046_v39, %v1047_v40  ;;  %v538_v51 = vadd.f32 %v1352_v5, %v278_v41  ;;  %v539_v52 = vadd.f32 %v1352_v5, %v279_v42  ;;  %v280_v53 = vmul.f32 %v1347_v4, %v20_v38  ;;  %v42_v42 = vld [vmem:[%s2834_s0 + $0xe0] sm:$0xff] }
   0xd   :  { %v1175_v54 = vmax.f32 %v1048_v44, %v1049_v45  ;;  %v554_v55 = vadd.f32 %v1352_v5, %v294_v46  ;;  %v555_v56 = vadd.f32 %v1352_v5, %v295_v47  ;;  %v281_v57 = vmul.f32 %v1347_v4, %v21_v43  ;;  %v43_v46 = vld [vmem:[%s2834_s0 + $0xe8] sm:$0xff] }
   0xe   :  { %1238 = vst [vmem:[%s2837_s3] sm:$0xff] %v1174_v50  ;;  %v794_v60 = vmax.f32 %v538_v51, 0.0  ;;  %v795_v61 = vmax.f32 %v539_v52, 0.0  ;;  %v296_v62 = vmul.f32 %v1347_v4, %v36_v48  ;;  %v297_v63 = vmul.f32 %v1347_v4, %v37_v49  ;;  %v28_v52 = vld [vmem:[%s2834_s0 + $0x70] sm:$0xff] }
   0xf   :  { %1239 = vst [vmem:[%s2837_s3 + $0x8] sm:$0xff] %v1175_v54  ;;  %v810_v0 = vmax.f32 %v554_v55, 0.0  ;;  %v811_v1 = vmax.f32 %v555_v56, 0.0  ;;  %v540_v2 = vadd.f32 %v1352_v5, %v280_v53  ;;  %v541_v3 = vadd.f32 %v1352_v5, %v281_v57  ;;  %v29_v57 = vld [vmem:[%s2834_s0 + $0x78] sm:$0xff] }
  0x10   :  { %v556_v8 = vadd.f32 %v1352_v5, %v296_v62  ;;  %v557_v9 = vadd.f32 %v1352_v5, %v297_v63  ;;  %v282_v10 = vmul.f32 %v1347_v4, %v22_v58  ;;  %v283_v11 = vmul.f32 %v1347_v4, %v23_v59  ;;  %v44_v62 = vld [vmem:[%s2834_s0 + $0xf0] sm:$0xff]  ;;  %v45_v63 = vld [vmem:[%s2834_s0 + $0xf8] sm:$0xff] }
  0x11   :  { %v1050_v13 = vmax.f32 %v794_v60, %v810_v0  ;;  %v1051_v14 = vmax.f32 %v795_v61, %v811_v1  ;;  %v796_v15 = vmax.f32 %v540_v2, 0.0  ;;  %v797_v16 = vmax.f32 %v541_v3, 0.0 }
  0x12   :  { %v812_v17 = vmax.f32 %v556_v8, 0.0  ;;  %v813_v18 = vmax.f32 %v557_v9, 0.0  ;;  %v298_v19 = vmul.f32 %v1347_v4, %v38_v6  ;;  %v299_v20 = vmul.f32 %v1347_v4, %v39_v7 }
  0x13   :  { %v1176_v23 = vmax.f32 %v1050_v13, %v1051_v14  ;;  %v542_v24 = vadd.f32 %v1352_v5, %v282_v10  ;;  %v543_v25 = vadd.f32 %v1352_v5, %v283_v11  ;;  %v284_v27 = vmul.f32 %v1347_v4, %v24_v12  ;;  %v46_v10 = vld [vmem:[%s2834_s0 + $0x100] sm:$0xff] }
  0x14   :  { %v1052_v28 = vmax.f32 %v796_v15, %v812_v17  ;;  %v1053_v29 = vmax.f32 %v797_v16, %v813_v18  ;;  %v558_v30 = vadd.f32 %v1352_v5, %v298_v19  ;;  %v559_v31 = vadd.f32 %v1352_v5, %v299_v20  ;;  %v47_v15 = vld [vmem:[%s2834_s0 + $0x108] sm:$0xff]  ;;  %v62_v20 = vld [vmem:[%s2834_s0 + $0x180] sm:$0xff] }
  0x15   :  { %1240 = vst [vmem:[%s2837_s3 + $0x10] sm:$0xff] %v1176_v23  ;;  %v798_v33 = vmax.f32 %v542_v24, 0.0  ;;  %v799_v34 = vmax.f32 %v543_v25, 0.0  ;;  %v285_v35 = vmul.f32 %v1347_v4, %v25_v21  ;;  %v300_v36 = vmul.f32 %v1347_v4, %v40_v22  ;;  %v63_v21 = vld [vmem:[%s2834_s0 + $0x188] sm:$0xff] }
  0x16   :  { %v1177_v38 = vmax.f32 %v1052_v28, %v1053_v29  ;;  %v814_v39 = vmax.f32 %v558_v30, 0.0  ;;  %v815_v40 = vmax.f32 %v559_v31, 0.0  ;;  %v301_v41 = vmul.f32 %v1347_v4, %v41_v26  ;;  %v48_v26 = vld [vmem:[%s2834_s0 + $0x110] sm:$0xff] }
  0x17   :  { %v544_v43 = vadd.f32 %v1352_v5, %v284_v27  ;;  %v545_v44 = vadd.f32 %v1352_v5, %v285_v35  ;;  %v560_v45 = vadd.f32 %v1352_v5, %v300_v36  ;;  %v286_v47 = vmul.f32 %v1347_v4, %v26_v32  ;;  %v49_v35 = vld [vmem:[%s2834_s0 + $0x118] sm:$0xff]  ;;  %v64_v36 = vld [vmem:[%s2834_s0 + $0x190] sm:$0xff] }
  0x18   :  { %1241 = vst [vmem:[%s2837_s3 + $0x18] sm:$0xff] %v1177_v38  ;;  %v1054_v48 = vmax.f32 %v798_v33, %v814_v39  ;;  %v1055_v49 = vmax.f32 %v799_v34, %v815_v40  ;;  %v561_v50 = vadd.f32 %v1352_v5, %v301_v41  ;;  %v287_v51 = vmul.f32 %v1347_v4, %v27_v37  ;;  %v65_v40 = vld [vmem:[%s2834_s0 + $0x198] sm:$0xff] }
  0x19   :  { %v800_v53 = vmax.f32 %v544_v43, 0.0  ;;  %v801_v54 = vmax.f32 %v545_v44, 0.0  ;;  %v816_v55 = vmax.f32 %v560_v45, 0.0  ;;  %v302_v56 = vmul.f32 %v1347_v4, %v42_v42 }
  0x1a   :  { %v1178_v58 = vmax.f32 %v1054_v48, %v1055_v49  ;;  %v817_v59 = vmax.f32 %v561_v50, 0.0  ;;  %v303_v60 = vmul.f32 %v1347_v4, %v43_v46  ;;  %v546_v61 = vadd.f32 %v1352_v5, %v286_v47  ;;  %v50_v46 = vld [vmem:[%s2834_s0 + $0x120] sm:$0xff] }
  0x1b   :  { %v1056_v0 = vmax.f32 %v800_v53, %v816_v55  ;;  %v547_v1 = vadd.f32 %v1352_v5, %v287_v51  ;;  %v562_v2 = vadd.f32 %v1352_v5, %v302_v56  ;;  %v288_v3 = vmul.f32 %v1347_v4, %v28_v52  ;;  %v51_v51 = vld [vmem:[%s2834_s0 + $0x128] sm:$0xff]  ;;  %v66_v56 = vld [vmem:[%s2834_s0 + $0x1a0] sm:$0xff] }
  0x1c   :  { %1242 = vst [vmem:[%s2837_s3 + $0x20] sm:$0xff] %v1178_v58  ;;  %v1057_v6 = vmax.f32 %v801_v54, %v817_v59  ;;  %v563_v7 = vadd.f32 %v1352_v5, %v303_v60  ;;  %v802_v8 = vmax.f32 %v546_v61, 0.0  ;;  %v289_v9 = vmul.f32 %v1347_v4, %v29_v57  ;;  %v67_v60 = vld [vmem:[%s2834_s0 + $0x1a8] sm:$0xff] }
  0x1d   :  { %v803_v11 = vmax.f32 %v547_v1, 0.0  ;;  %v818_v12 = vmax.f32 %v562_v2, 0.0  ;;  %v304_v13 = vmul.f32 %v1347_v4, %v44_v62  ;;  %v305_v14 = vmul.f32 %v1347_v4, %v45_v63  ;;  %v52_v2 = vld [vmem:[%s2834_s0 + $0x130] sm:$0xff] }
  0x1e   :  { %v1179_v16 = vmax.f32 %v1056_v0, %v1057_v6  ;;  %v819_v17 = vmax.f32 %v563_v7, 0.0  ;;  %v548_v18 = vadd.f32 %v1352_v5, %v288_v3  ;;  %v549_v19 = vadd.f32 %v1352_v5, %v289_v9  ;;  %v53_v9 = vld [vmem:[%s2834_s0 + $0x138] sm:$0xff] }
  0x1f   :  { %v1058_v22 = vmax.f32 %v802_v8, %v818_v12  ;;  %v564_v23 = vadd.f32 %v1352_v5, %v304_v13  ;;  %v565_v24 = vadd.f32 %v1352_v5, %v305_v14  ;;  %v306_v25 = vmul.f32 %v1347_v4, %v46_v10  ;;  %v68_v14 = vld [vmem:[%s2834_s0 + $0x1b0] sm:$0xff] }
  0x20   :  { %1243 = vst [vmem:[%s2837_s3 + $0x28] sm:$0xff] %v1179_v16  ;;  %v1059_v27 = vmax.f32 %v803_v11, %v819_v17  ;;  %v804_v28 = vmax.f32 %v548_v18, 0.0  ;;  %v805_v29 = vmax.f32 %v549_v19, 0.0  ;;  %v307_v30 = vmul.f32 %v1347_v4, %v47_v15  ;;  %v69_v15 = vld [vmem:[%s2834_s0 + $0x1b8] sm:$0xff] }
  0x21   :  { %v820_v31 = vmax.f32 %v564_v23, 0.0  ;;  %v821_v32 = vmax.f32 %v565_v24, 0.0  ;;  %v322_v33 = vmul.f32 %v1347_v4, %v62_v20  ;;  %v323_v34 = vmul.f32 %v1347_v4, %v63_v21  ;;  %v54_v24 = vld [vmem:[%s2834_s0 + $0x140] sm:$0xff] }
  0x22   :  { %v1180_v37 = vmax.f32 %v1058_v22, %v1059_v27  ;;  %v566_v38 = vadd.f32 %v1352_v5, %v306_v25  ;;  %v567_v39 = vadd.f32 %v1352_v5, %v307_v30  ;;  %v308_v41 = vmul.f32 %v1347_v4, %v48_v26 }
  0x23   :  { %v1060_v42 = vmax.f32 %v804_v28, %v820_v31  ;;  %v1061_v43 = vmax.f32 %v805_v29, %v821_v32  ;;  %v582_v44 = vadd.f32 %v1352_v5, %v322_v33  ;;  %v583_v45 = vadd.f32 %v1352_v5, %v323_v34  ;;  %v55_v29 = vld [vmem:[%s2834_s0 + $0x148] sm:$0xff]  ;;  %v70_v34 = vld [vmem:[%s2834_s0 + $0x1c0] sm:$0xff] }
  0x24   :  { %1244 = vst [vmem:[%s2837_s3 + $0x30] sm:$0xff] %v1180_v37  ;;  %v822_v47 = vmax.f32 %v566_v38, 0.0  ;;  %v823_v48 = vmax.f32 %v567_v39, 0.0  ;;  %v309_v49 = vmul.f32 %v1347_v4, %v49_v35  ;;  %v324_v50 = vmul.f32 %v1347_v4, %v64_v36  ;;  %v71_v35 = vld [vmem:[%s2834_s0 + $0x1c8] sm:$0xff] }
  0x25   :  { %v1181_v52 = vmax.f32 %v1060_v42, %v1061_v43  ;;  %v838_v53 = vmax.f32 %v582_v44, 0.0  ;;  %v839_v54 = vmax.f32 %v583_v45, 0.0  ;;  %v325_v55 = vmul.f32 %v1347_v4, %v65_v40  ;;  %v56_v40 = vld [vmem:[%s2834_s0 + $0x150] sm:$0xff] }
  0x26   :  { %v568_v57 = vadd.f32 %v1352_v5, %v308_v41  ;;  %v569_v58 = vadd.f32 %v1352_v5, %v309_v49  ;;  %v584_v59 = vadd.f32 %v1352_v5, %v324_v50  ;;  %v310_v61 = vmul.f32 %v1347_v4, %v50_v46  ;;  %v57_v49 = vld [vmem:[%s2834_s0 + $0x158] sm:$0xff]  ;;  %v72_v50 = vld [vmem:[%s2834_s0 + $0x1d0] sm:$0xff] }
  0x27   :  { %1245 = vst [vmem:[%s2837_s3 + $0x38] sm:$0xff] %v1181_v52  ;;  %v1062_v62 = vmax.f32 %v822_v47, %v838_v53  ;;  %v1063_v63 = vmax.f32 %v823_v48, %v839_v54  ;;  %v585_v0 = vadd.f32 %v1352_v5, %v325_v55  ;;  %v311_v1 = vmul.f32 %v1347_v4, %v51_v51  ;;  %v73_v54 = vld [vmem:[%s2834_s0 + $0x1d8] sm:$0xff] }
  0x28   :  { %v824_v3 = vmax.f32 %v568_v57, 0.0  ;;  %v825_v6 = vmax.f32 %v569_v58, 0.0  ;;  %v840_v7 = vmax.f32 %v584_v59, 0.0  ;;  %v326_v8 = vmul.f32 %v1347_v4, %v66_v56 }
  0x29   :  { %v1182_v10 = vmax.f32 %v1062_v62, %v1063_v63  ;;  %v841_v11 = vmax.f32 %v585_v0, 0.0  ;;  %v327_v12 = vmul.f32 %v1347_v4, %v67_v60  ;;  %v570_v13 = vadd.f32 %v1352_v5, %v310_v61  ;;  %v58_v60 = vld [vmem:[%s2834_s0 + $0x160] sm:$0xff] }
  0x2a   :  { %v1064_v16 = vmax.f32 %v824_v3, %v840_v7  ;;  %v571_v17 = vadd.f32 %v1352_v5, %v311_v1  ;;  %v586_v18 = vadd.f32 %v1352_v5, %v326_v8  ;;  %v312_v19 = vmul.f32 %v1347_v4, %v52_v2  ;;  %v59_v1 = vld [vmem:[%s2834_s0 + $0x168] sm:$0xff]  ;;  %v74_v8 = vld [vmem:[%s2834_s0 + $0x1e0] sm:$0xff] }
  0x2b   :  { %1246 = vst [vmem:[%s2837_s3 + $0x40] sm:$0xff] %v1182_v10  ;;  %v1065_v20 = vmax.f32 %v825_v6, %v841_v11  ;;  %v587_v21 = vadd.f32 %v1352_v5, %v327_v12  ;;  %v826_v22 = vmax.f32 %v570_v13, 0.0  ;;  %v313_v23 = vmul.f32 %v1347_v4, %v53_v9  ;;  %v75_v12 = vld [vmem:[%s2834_s0 + $0x1e8] sm:$0xff] }
  0x2c   :  { %v827_v25 = vmax.f32 %v571_v17, 0.0  ;;  %v842_v26 = vmax.f32 %v586_v18, 0.0  ;;  %v328_v27 = vmul.f32 %v1347_v4, %v68_v14  ;;  %v329_v28 = vmul.f32 %v1347_v4, %v69_v15  ;;  %v60_v18 = vld [vmem:[%s2834_s0 + $0x170] sm:$0xff] }
  0x2d   :  { %v1183_v30 = vmax.f32 %v1064_v16, %v1065_v20  ;;  %v843_v31 = vmax.f32 %v587_v21, 0.0  ;;  %v572_v32 = vadd.f32 %v1352_v5, %v312_v19  ;;  %v573_v33 = vadd.f32 %v1352_v5, %v313_v23  ;;  %v61_v23 = vld [vmem:[%s2834_s0 + $0x178] sm:$0xff] }
  0x2e   :  { %v1066_v36 = vmax.f32 %v826_v22, %v842_v26  ;;  %v588_v37 = vadd.f32 %v1352_v5, %v328_v27  ;;  %v589_v38 = vadd.f32 %v1352_v5, %v329_v28  ;;  %v314_v39 = vmul.f32 %v1347_v4, %v54_v24  ;;  %v76_v28 = vld [vmem:[%s2834_s0 + $0x1f0] sm:$0xff] }
  0x2f   :  { %1247 = vst [vmem:[%s2837_s3 + $0x48] sm:$0xff] %v1183_v30  ;;  %v1067_v41 = vmax.f32 %v827_v25, %v843_v31  ;;  %v828_v42 = vmax.f32 %v572_v32, 0.0  ;;  %v829_v43 = vmax.f32 %v573_v33, 0.0  ;;  %v315_v44 = vmul.f32 %v1347_v4, %v55_v29  ;;  %v77_v29 = vld [vmem:[%s2834_s0 + $0x1f8] sm:$0xff] }
  0x30   :  { %v844_v45 = vmax.f32 %v588_v37, 0.0  ;;  %v845_v46 = vmax.f32 %v589_v38, 0.0  ;;  %v330_v47 = vmul.f32 %v1347_v4, %v70_v34  ;;  %v331_v48 = vmul.f32 %v1347_v4, %v71_v35  ;;  %v78_v38 = vld [vmem:[%s2834_s0 + $0x200] sm:$0xff] }
  0x31   :  { %v1184_v51 = vmax.f32 %v1066_v36, %v1067_v41  ;;  %v574_v52 = vadd.f32 %v1352_v5, %v314_v39  ;;  %v575_v53 = vadd.f32 %v1352_v5, %v315_v44  ;;  %v316_v55 = vmul.f32 %v1347_v4, %v56_v40 }
  0x32   :  { %v1068_v56 = vmax.f32 %v828_v42, %v844_v45  ;;  %v1069_v57 = vmax.f32 %v829_v43, %v845_v46  ;;  %v590_v58 = vadd.f32 %v1352_v5, %v330_v47  ;;  %v591_v59 = vadd.f32 %v1352_v5, %v331_v48  ;;  %v79_v43 = vld [vmem:[%s2834_s0 + $0x208] sm:$0xff]  ;;  %v94_v48 = vld [vmem:[%s2834_s0 + $0x280] sm:$0xff] }
  0x33   :  { %1248 = vst [vmem:[%s2837_s3 + $0x50] sm:$0xff] %v1184_v51  ;;  %v830_v61 = vmax.f32 %v574_v52, 0.0  ;;  %v831_v62 = vmax.f32 %v575_v53, 0.0  ;;  %v317_v63 = vmul.f32 %v1347_v4, %v57_v49  ;;  %v332_v0 = vmul.f32 %v1347_v4, %v72_v50  ;;  %v95_v49 = vld [vmem:[%s2834_s0 + $0x288] sm:$0xff] }
  0x34   :  { %v1185_v2 = vmax.f32 %v1068_v56, %v1069_v57  ;;  %v846_v3 = vmax.f32 %v590_v58, 0.0  ;;  %v847_v6 = vmax.f32 %v591_v59, 0.0  ;;  %v333_v7 = vmul.f32 %v1347_v4, %v73_v54  ;;  %v80_v54 = vld [vmem:[%s2834_s0 + $0x210] sm:$0xff] }
  0x35   :  { %v576_v9 = vadd.f32 %v1352_v5, %v316_v55  ;;  %v577_v10 = vadd.f32 %v1352_v5, %v317_v63  ;;  %v592_v11 = vadd.f32 %v1352_v5, %v332_v0  ;;  %v318_v13 = vmul.f32 %v1347_v4, %v58_v60  ;;  %v81_v63 = vld [vmem:[%s2834_s0 + $0x218] sm:$0xff]  ;;  %v96_v0 = vld [vmem:[%s2834_s0 + $0x290] sm:$0xff] }
  0x36   :  { %1249 = vst [vmem:[%s2837_s3 + $0x58] sm:$0xff] %v1185_v2  ;;  %v1070_v14 = vmax.f32 %v830_v61, %v846_v3  ;;  %v1071_v15 = vmax.f32 %v831_v62, %v847_v6  ;;  %v593_v16 = vadd.f32 %v1352_v5, %v333_v7  ;;  %v319_v17 = vmul.f32 %v1347_v4, %v59_v1  ;;  %v97_v6 = vld [vmem:[%s2834_s0 + $0x298] sm:$0xff] }
  0x37   :  { %v832_v19 = vmax.f32 %v576_v9, 0.0  ;;  %v833_v20 = vmax.f32 %v577_v10, 0.0  ;;  %v848_v21 = vmax.f32 %v592_v11, 0.0  ;;  %v334_v22 = vmul.f32 %v1347_v4, %v74_v8 }
  0x38   :  { %v1186_v24 = vmax.f32 %v1070_v14, %v1071_v15  ;;  %v849_v25 = vmax.f32 %v593_v16, 0.0  ;;  %v335_v26 = vmul.f32 %v1347_v4, %v75_v12  ;;  %v578_v27 = vadd.f32 %v1352_v5, %v318_v13  ;;  %v82_v12 = vld [vmem:[%s2834_s0 + $0x220] sm:$0xff] }
  0x39   :  { %v1072_v30 = vmax.f32 %v832_v19, %v848_v21  ;;  %v579_v31 = vadd.f32 %v1352_v5, %v319_v17  ;;  %v594_v32 = vadd.f32 %v1352_v5, %v334_v22  ;;  %v320_v33 = vmul.f32 %v1347_v4, %v60_v18  ;;  %v83_v17 = vld [vmem:[%s2834_s0 + $0x228] sm:$0xff]  ;;  %v98_v22 = vld [vmem:[%s2834_s0 + $0x2a0] sm:$0xff] }
  0x3a   :  { %1250 = vst [vmem:[%s2837_s3 + $0x60] sm:$0xff] %v1186_v24  ;;  %v1073_v34 = vmax.f32 %v833_v20, %v849_v25  ;;  %v595_v35 = vadd.f32 %v1352_v5, %v335_v26  ;;  %v834_v36 = vmax.f32 %v578_v27, 0.0  ;;  %v321_v37 = vmul.f32 %v1347_v4, %v61_v23  ;;  %v99_v26 = vld [vmem:[%s2834_s0 + $0x2a8] sm:$0xff] }
  0x3b   :  { %v835_v39 = vmax.f32 %v579_v31, 0.0  ;;  %v850_v40 = vmax.f32 %v594_v32, 0.0  ;;  %v336_v41 = vmul.f32 %v1347_v4, %v76_v28  ;;  %v337_v42 = vmul.f32 %v1347_v4, %v77_v29  ;;  %v84_v32 = vld [vmem:[%s2834_s0 + $0x230] sm:$0xff] }
  0x3c   :  { %v1187_v44 = vmax.f32 %v1072_v30, %v1073_v34  ;;  %v851_v45 = vmax.f32 %v595_v35, 0.0  ;;  %v580_v46 = vadd.f32 %v1352_v5, %v320_v33  ;;  %v581_v47 = vadd.f32 %v1352_v5, %v321_v37  ;;  %v85_v37 = vld [vmem:[%s2834_s0 + $0x238] sm:$0xff] }
  0x3d   :  { %v1074_v50 = vmax.f32 %v834_v36, %v850_v40  ;;  %v596_v51 = vadd.f32 %v1352_v5, %v336_v41  ;;  %v597_v52 = vadd.f32 %v1352_v5, %v337_v42  ;;  %v338_v53 = vmul.f32 %v1347_v4, %v78_v38  ;;  %v100_v42 = vld [vmem:[%s2834_s0 + $0x2b0] sm:$0xff] }
  0x3e   :  { %1251 = vst [vmem:[%s2837_s3 + $0x68] sm:$0xff] %v1187_v44  ;;  %v1075_v55 = vmax.f32 %v835_v39, %v851_v45  ;;  %v836_v56 = vmax.f32 %v580_v46, 0.0  ;;  %v837_v57 = vmax.f32 %v581_v47, 0.0  ;;  %v339_v58 = vmul.f32 %v1347_v4, %v79_v43  ;;  %v101_v43 = vld [vmem:[%s2834_s0 + $0x2b8] sm:$0xff] }
  0x3f   :  { %v852_v59 = vmax.f32 %v596_v51, 0.0  ;;  %v853_v60 = vmax.f32 %v597_v52, 0.0  ;;  %v354_v61 = vmul.f32 %v1347_v4, %v94_v48  ;;  %v355_v62 = vmul.f32 %v1347_v4, %v95_v49  ;;  %v86_v52 = vld [vmem:[%s2834_s0 + $0x240] sm:$0xff] }
  0x40   :  { %v1188_v1 = vmax.f32 %v1074_v50, %v1075_v55  ;;  %v598_v2 = vadd.f32 %v1352_v5, %v338_v53  ;;  %v599_v3 = vadd.f32 %v1352_v5, %v339_v58  ;;  %v340_v7 = vmul.f32 %v1347_v4, %v80_v54 }
  0x41   :  { %v1076_v8 = vmax.f32 %v836_v56, %v852_v59  ;;  %v1077_v9 = vmax.f32 %v837_v57, %v853_v60  ;;  %v614_v10 = vadd.f32 %v1352_v5, %v354_v61  ;;  %v615_v11 = vadd.f32 %v1352_v5, %v355_v62  ;;  %v87_v57 = vld [vmem:[%s2834_s0 + $0x248] sm:$0xff]  ;;  %v102_v62 = vld [vmem:[%s2834_s0 + $0x2c0] sm:$0xff] }
  0x42   :  { %1252 = vst [vmem:[%s2837_s3 + $0x70] sm:$0xff] %v1188_v1  ;;  %v854_v13 = vmax.f32 %v598_v2, 0.0  ;;  %v855_v14 = vmax.f32 %v599_v3, 0.0  ;;  %v341_v15 = vmul.f32 %v1347_v4, %v81_v63  ;;  %v356_v16 = vmul.f32 %v1347_v4, %v96_v0  ;;  %v103_v63 = vld [vmem:[%s2834_s0 + $0x2c8] sm:$0xff] }
  0x43   :  { %v1189_v18 = vmax.f32 %v1076_v8, %v1077_v9  ;;  %v870_v19 = vmax.f32 %v614_v10, 0.0  ;;  %v871_v20 = vmax.f32 %v615_v11, 0.0  ;;  %v357_v21 = vmul.f32 %v1347_v4, %v97_v6  ;;  %v88_v6 = vld [vmem:[%s2834_s0 + $0x250] sm:$0xff] }
  0x44   :  { %v600_v23 = vadd.f32 %v1352_v5, %v340_v7  ;;  %v601_v24 = vadd.f32 %v1352_v5, %v341_v15  ;;  %v616_v25 = vadd.f32 %v1352_v5, %v356_v16  ;;  %v342_v27 = vmul.f32 %v1347_v4, %v82_v12  ;;  %v89_v15 = vld [vmem:[%s2834_s0 + $0x258] sm:$0xff]  ;;  %v104_v16 = vld [vmem:[%s2834_s0 + $0x2d0] sm:$0xff] }
  0x45   :  { %1253 = vst [vmem:[%s2837_s3 + $0x78] sm:$0xff] %v1189_v18  ;;  %v1078_v28 = vmax.f32 %v854_v13, %v870_v19  ;;  %v1079_v29 = vmax.f32 %v855_v14, %v871_v20  ;;  %v617_v30 = vadd.f32 %v1352_v5, %v357_v21  ;;  %v343_v31 = vmul.f32 %v1347_v4, %v83_v17  ;;  %v105_v20 = vld [vmem:[%s2834_s0 + $0x2d8] sm:$0xff] }
  0x46   :  { %v856_v33 = vmax.f32 %v600_v23, 0.0  ;;  %v857_v34 = vmax.f32 %v601_v24, 0.0  ;;  %v872_v35 = vmax.f32 %v616_v25, 0.0  ;;  %v358_v36 = vmul.f32 %v1347_v4, %v98_v22 }
  0x47   :  { %v1190_v38 = vmax.f32 %v1078_v28, %v1079_v29  ;;  %v873_v39 = vmax.f32 %v617_v30, 0.0  ;;  %v359_v40 = vmul.f32 %v1347_v4, %v99_v26  ;;  %v602_v41 = vadd.f32 %v1352_v5, %v342_v27  ;;  %v90_v26 = vld [vmem:[%s2834_s0 + $0x260] sm:$0xff] }
  0x48   :  { %v1080_v44 = vmax.f32 %v856_v33, %v872_v35  ;;  %v603_v45 = vadd.f32 %v1352_v5, %v343_v31  ;;  %v618_v46 = vadd.f32 %v1352_v5, %v358_v36  ;;  %v344_v47 = vmul.f32 %v1347_v4, %v84_v32  ;;  %v91_v31 = vld [vmem:[%s2834_s0 + $0x268] sm:$0xff]  ;;  %v106_v36 = vld [vmem:[%s2834_s0 + $0x2e0] sm:$0xff] }
  0x49   :  { %1254 = vst [vmem:[%s2837_s3 + $0x80] sm:$0xff] %v1190_v38  ;;  %v1081_v48 = vmax.f32 %v857_v34, %v873_v39  ;;  %v619_v49 = vadd.f32 %v1352_v5, %v359_v40  ;;  %v858_v50 = vmax.f32 %v602_v41, 0.0  ;;  %v345_v51 = vmul.f32 %v1347_v4, %v85_v37  ;;  %v107_v40 = vld [vmem:[%s2834_s0 + $0x2e8] sm:$0xff] }
  0x4a   :  { %v859_v53 = vmax.f32 %v603_v45, 0.0  ;;  %v874_v54 = vmax.f32 %v618_v46, 0.0  ;;  %v360_v55 = vmul.f32 %v1347_v4, %v100_v42  ;;  %v361_v56 = vmul.f32 %v1347_v4, %v101_v43  ;;  %v92_v46 = vld [vmem:[%s2834_s0 + $0x270] sm:$0xff] }
  0x4b   :  { %v1191_v58 = vmax.f32 %v1080_v44, %v1081_v48  ;;  %v875_v59 = vmax.f32 %v619_v49, 0.0  ;;  %v604_v60 = vadd.f32 %v1352_v5, %v344_v47  ;;  %v605_v61 = vadd.f32 %v1352_v5, %v345_v51  ;;  %v93_v51 = vld [vmem:[%s2834_s0 + $0x278] sm:$0xff] }
  0x4c   :  { %v1082_v0 = vmax.f32 %v858_v50, %v874_v54  ;;  %v620_v1 = vadd.f32 %v1352_v5, %v360_v55  ;;  %v621_v2 = vadd.f32 %v1352_v5, %v361_v56  ;;  %v346_v3 = vmul.f32 %v1347_v4, %v86_v52  ;;  %v108_v56 = vld [vmem:[%s2834_s0 + $0x2f0] sm:$0xff] }
  0x4d   :  { %1255 = vst [vmem:[%s2837_s3 + $0x88] sm:$0xff] %v1191_v58  ;;  %v1083_v7 = vmax.f32 %v859_v53, %v875_v59  ;;  %v860_v8 = vmax.f32 %v604_v60, 0.0  ;;  %v861_v9 = vmax.f32 %v605_v61, 0.0  ;;  %v347_v10 = vmul.f32 %v1347_v4, %v87_v57  ;;  %v109_v57 = vld [vmem:[%s2834_s0 + $0x2f8] sm:$0xff] }
  0x4e   :  { %v876_v11 = vmax.f32 %v620_v1, 0.0  ;;  %v877_v12 = vmax.f32 %v621_v2, 0.0  ;;  %v362_v13 = vmul.f32 %v1347_v4, %v102_v62  ;;  %v363_v14 = vmul.f32 %v1347_v4, %v103_v63  ;;  %v110_v2 = vld [vmem:[%s2834_s0 + $0x300] sm:$0xff] }
  0x4f   :  { %v1192_v17 = vmax.f32 %v1082_v0, %v1083_v7  ;;  %v606_v18 = vadd.f32 %v1352_v5, %v346_v3  ;;  %v607_v19 = vadd.f32 %v1352_v5, %v347_v10  ;;  %v348_v21 = vmul.f32 %v1347_v4, %v88_v6 }
  0x50   :  { %v1084_v22 = vmax.f32 %v860_v8, %v876_v11  ;;  %v1085_v23 = vmax.f32 %v861_v9, %v877_v12  ;;  %v622_v24 = vadd.f32 %v1352_v5, %v362_v13  ;;  %v623_v25 = vadd.f32 %v1352_v5, %v363_v14  ;;  %v111_v9 = vld [vmem:[%s2834_s0 + $0x308] sm:$0xff]  ;;  %v126_v14 = vld [vmem:[%s2834_s0 + $0x380] sm:$0xff] }
  0x51   :  { %1256 = vst [vmem:[%s2837_s3 + $0x90] sm:$0xff] %v1192_v17  ;;  %v862_v27 = vmax.f32 %v606_v18, 0.0  ;;  %v863_v28 = vmax.f32 %v607_v19, 0.0  ;;  %v349_v29 = vmul.f32 %v1347_v4, %v89_v15  ;;  %v364_v30 = vmul.f32 %v1347_v4, %v104_v16  ;;  %v127_v15 = vld [vmem:[%s2834_s0 + $0x388] sm:$0xff] }
  0x52   :  { %v1193_v32 = vmax.f32 %v1084_v22, %v1085_v23  ;;  %v878_v33 = vmax.f32 %v622_v24, 0.0  ;;  %v879_v34 = vmax.f32 %v623_v25, 0.0  ;;  %v365_v35 = vmul.f32 %v1347_v4, %v105_v20  ;;  %v112_v20 = vld [vmem:[%s2834_s0 + $0x310] sm:$0xff] }
  0x53   :  { %v608_v37 = vadd.f32 %v1352_v5, %v348_v21  ;;  %v609_v38 = vadd.f32 %v1352_v5, %v349_v29  ;;  %v624_v39 = vadd.f32 %v1352_v5, %v364_v30  ;;  %v350_v41 = vmul.f32 %v1347_v4, %v90_v26  ;;  %v113_v29 = vld [vmem:[%s2834_s0 + $0x318] sm:$0xff]  ;;  %v128_v30 = vld [vmem:[%s2834_s0 + $0x390] sm:$0xff] }
  0x54   :  { %1257 = vst [vmem:[%s2837_s3 + $0x98] sm:$0xff] %v1193_v32  ;;  %v1086_v42 = vmax.f32 %v862_v27, %v878_v33  ;;  %v1087_v43 = vmax.f32 %v863_v28, %v879_v34  ;;  %v625_v44 = vadd.f32 %v1352_v5, %v365_v35  ;;  %v351_v45 = vmul.f32 %v1347_v4, %v91_v31  ;;  %v129_v34 = vld [vmem:[%s2834_s0 + $0x398] sm:$0xff] }
  0x55   :  { %v864_v47 = vmax.f32 %v608_v37, 0.0  ;;  %v865_v48 = vmax.f32 %v609_v38, 0.0  ;;  %v880_v49 = vmax.f32 %v624_v39, 0.0  ;;  %v366_v50 = vmul.f32 %v1347_v4, %v106_v36 }
  0x56   :  { %v1194_v52 = vmax.f32 %v1086_v42, %v1087_v43  ;;  %v881_v53 = vmax.f32 %v625_v44, 0.0  ;;  %v367_v54 = vmul.f32 %v1347_v4, %v107_v40  ;;  %v610_v55 = vadd.f32 %v1352_v5, %v350_v41  ;;  %v114_v40 = vld [vmem:[%s2834_s0 + $0x320] sm:$0xff] }
  0x57   :  { %v1088_v58 = vmax.f32 %v864_v47, %v880_v49  ;;  %v611_v59 = vadd.f32 %v1352_v5, %v351_v45  ;;  %v626_v60 = vadd.f32 %v1352_v5, %v366_v50  ;;  %v352_v61 = vmul.f32 %v1347_v4, %v92_v46  ;;  %v115_v45 = vld [vmem:[%s2834_s0 + $0x328] sm:$0xff]  ;;  %v130_v50 = vld [vmem:[%s2834_s0 + $0x3a0] sm:$0xff] }
  0x58   :  { %1258 = vst [vmem:[%s2837_s3 + $0xa0] sm:$0xff] %v1194_v52  ;;  %v1089_v62 = vmax.f32 %v865_v48, %v881_v53  ;;  %v627_v63 = vadd.f32 %v1352_v5, %v367_v54  ;;  %v866_v0 = vmax.f32 %v610_v55, 0.0  ;;  %v353_v1 = vmul.f32 %v1347_v4, %v93_v51  ;;  %v131_v54 = vld [vmem:[%s2834_s0 + $0x3a8] sm:$0xff] }
  0x59   :  { %v867_v3 = vmax.f32 %v611_v59, 0.0  ;;  %v882_v6 = vmax.f32 %v626_v60, 0.0  ;;  %v368_v7 = vmul.f32 %v1347_v4, %v108_v56  ;;  %v369_v8 = vmul.f32 %v1347_v4, %v109_v57  ;;  %v116_v60 = vld [vmem:[%s2834_s0 + $0x330] sm:$0xff] }
  0x5a   :  { %v1195_v10 = vmax.f32 %v1088_v58, %v1089_v62  ;;  %v883_v11 = vmax.f32 %v627_v63, 0.0  ;;  %v612_v12 = vadd.f32 %v1352_v5, %v352_v61  ;;  %v613_v13 = vadd.f32 %v1352_v5, %v353_v1  ;;  %v1949_v58 = vld [vmem:[%s2836_s2] ss:$0 sm:$0xff]  ;;  %v117_v1 = vld [vmem:[%s2834_s0 + $0x338] sm:$0xff] }
  0x5b   :  { %v1090_v16 = vmax.f32 %v866_v0, %v882_v6  ;;  %v628_v17 = vadd.f32 %v1352_v5, %v368_v7  ;;  %v629_v18 = vadd.f32 %v1352_v5, %v369_v8  ;;  %v370_v19 = vmul.f32 %v1347_v4, %v110_v2  ;;  %v132_v8 = vld [vmem:[%s2834_s0 + $0x3b0] sm:$0xff] }
  0x5c   :  { %1259 = vst [vmem:[%s2837_s3 + $0xa8] sm:$0xff] %v1195_v10  ;;  %v1091_v21 = vmax.f32 %v867_v3, %v883_v11  ;;  %v868_v22 = vmax.f32 %v612_v12, 0.0  ;;  %v869_v23 = vmax.f32 %v613_v13, 0.0  ;;  %v371_v24 = vmul.f32 %v1347_v4, %v111_v9  ;;  %v133_v9 = vld [vmem:[%s2834_s0 + $0x3b8] sm:$0xff] }
  0x5d   :  { %v884_v25 = vmax.f32 %v628_v17, 0.0  ;;  %v885_v26 = vmax.f32 %v629_v18, 0.0  ;;  %v386_v27 = vmul.f32 %v1347_v4, %v126_v14  ;;  %v387_v28 = vmul.f32 %v1347_v4, %v127_v15  ;;  %v118_v18 = vld [vmem:[%s2834_s0 + $0x340] sm:$0xff] }
  0x5e   :  { %v1196_v31 = vmax.f32 %v1090_v16, %v1091_v21  ;;  %v630_v32 = vadd.f32 %v1352_v5, %v370_v19  ;;  %v631_v33 = vadd.f32 %v1352_v5, %v371_v24  ;;  %v372_v35 = vmul.f32 %v1347_v4, %v112_v20 }
  0x5f   :  { %v1092_v36 = vmax.f32 %v868_v22, %v884_v25  ;;  %v1093_v37 = vmax.f32 %v869_v23, %v885_v26  ;;  %v646_v38 = vadd.f32 %v1352_v5, %v386_v27  ;;  %v647_v39 = vadd.f32 %v1352_v5, %v387_v28  ;;  %v119_v23 = vld [vmem:[%s2834_s0 + $0x348] sm:$0xff]  ;;  %v134_v28 = vld [vmem:[%s2834_s0 + $0x3c0] sm:$0xff] }
  0x60   :  { %1260 = vst [vmem:[%s2837_s3 + $0xb0] sm:$0xff] %v1196_v31  ;;  %v886_v41 = vmax.f32 %v630_v32, 0.0  ;;  %v887_v42 = vmax.f32 %v631_v33, 0.0  ;;  %v373_v43 = vmul.f32 %v1347_v4, %v113_v29  ;;  %v388_v44 = vmul.f32 %v1347_v4, %v128_v30  ;;  %v135_v29 = vld [vmem:[%s2834_s0 + $0x3c8] sm:$0xff] }
  0x61   :  { %v1197_v46 = vmax.f32 %v1092_v36, %v1093_v37  ;;  %v902_v47 = vmax.f32 %v646_v38, 0.0  ;;  %v903_v48 = vmax.f32 %v647_v39, 0.0  ;;  %v389_v49 = vmul.f32 %v1347_v4, %v129_v34  ;;  %v120_v34 = vld [vmem:[%s2834_s0 + $0x350] sm:$0xff] }
  0x62   :  { %v632_v51 = vadd.f32 %v1352_v5, %v372_v35  ;;  %v633_v52 = vadd.f32 %v1352_v5, %v373_v43  ;;  %v648_v53 = vadd.f32 %v1352_v5, %v388_v44  ;;  %v374_v55 = vmul.f32 %v1347_v4, %v114_v40  ;;  %v1955_v5 = vld [vmem:[%s2835_s1] ss:$0 sm:$0xff]  ;;  %v121_v43 = vld [vmem:[%s2834_s0 + $0x358] sm:$0xff]  ;;  %v136_v44 = vld [vmem:[%s2834_s0 + $0x3d0] sm:$0xff] }
  0x63   :  { %1261 = vst [vmem:[%s2837_s3 + $0xb8] sm:$0xff] %v1197_v46  ;;  %v1094_v56 = vmax.f32 %v886_v41, %v902_v47  ;;  %v1095_v57 = vmax.f32 %v887_v42, %v903_v48  ;;  %v649_v59 = vadd.f32 %v1949_v58, %v389_v49  ;;  %v375_v4 = vmul.f32 %v1955_v5, %v115_v45  ;;  %v137_v48 = vld [vmem:[%s2834_s0 + $0x3d8] sm:$0xff] }
  0x64   :  { %v888_v61 = vmax.f32 %v632_v51, 0.0  ;;  %v889_v62 = vmax.f32 %v633_v52, 0.0  ;;  %v904_v63 = vmax.f32 %v648_v53, 0.0  ;;  %v390_v0 = vmul.f32 %v1955_v5, %v130_v50 }
  0x65   :  { %v1198_v2 = vmax.f32 %v1094_v56, %v1095_v57  ;;  %v905_v3 = vmax.f32 %v649_v59, 0.0  ;;  %v391_v6 = vmul.f32 %v1955_v5, %v131_v54  ;;  %v634_v7 = vadd.f32 %v1949_v58, %v374_v55  ;;  %v122_v54 = vld [vmem:[%s2834_s0 + $0x360] sm:$0xff] }
  0x66   :  { %v1096_v10 = vmax.f32 %v888_v61, %v904_v63  ;;  %v635_v11 = vadd.f32 %v1949_v58, %v375_v4  ;;  %v650_v12 = vadd.f32 %v1949_v58, %v390_v0  ;;  %v376_v13 = vmul.f32 %v1955_v5, %v116_v60  ;;  %v123_v4 = vld [vmem:[%s2834_s0 + $0x368] sm:$0xff]  ;;  %v138_v0 = vld [vmem:[%s2834_s0 + $0x3e0] sm:$0xff] }
  0x67   :  { %1262 = vst [vmem:[%s2837_s3 + $0xc0] sm:$0xff] %v1198_v2  ;;  %v1097_v14 = vmax.f32 %v889_v62, %v905_v3  ;;  %v651_v15 = vadd.f32 %v1949_v58, %v391_v6  ;;  %v890_v16 = vmax.f32 %v634_v7, 0.0  ;;  %v377_v17 = vmul.f32 %v1955_v5, %v117_v1  ;;  %v139_v6 = vld [vmem:[%s2834_s0 + $0x3e8] sm:$0xff] }
  0x68   :  { %v891_v19 = vmax.f32 %v635_v11, 0.0  ;;  %v906_v20 = vmax.f32 %v650_v12, 0.0  ;;  %v392_v21 = vmul.f32 %v1955_v5, %v132_v8  ;;  %v393_v22 = vmul.f32 %v1955_v5, %v133_v9  ;;  %v124_v12 = vld [vmem:[%s2834_s0 + $0x370] sm:$0xff] }
  0x69   :  { %v1199_v24 = vmax.f32 %v1096_v10, %v1097_v14  ;;  %v907_v25 = vmax.f32 %v651_v15, 0.0  ;;  %v636_v26 = vadd.f32 %v1949_v58, %v376_v13  ;;  %v637_v27 = vadd.f32 %v1949_v58, %v377_v17  ;;  %v125_v17 = vld [vmem:[%s2834_s0 + $0x378] sm:$0xff] }
  0x6a   :  { %v1098_v30 = vmax.f32 %v890_v16, %v906_v20  ;;  %v652_v31 = vadd.f32 %v1949_v58, %v392_v21  ;;  %v653_v32 = vadd.f32 %v1949_v58, %v393_v22  ;;  %v378_v33 = vmul.f32 %v1955_v5, %v118_v18  ;;  %v140_v22 = vld [vmem:[%s2834_s0 + $0x3f0] sm:$0xff] }
  0x6b   :  { %1263 = vst [vmem:[%s2837_s3 + $0xc8] sm:$0xff] %v1199_v24  ;;  %v1099_v35 = vmax.f32 %v891_v19, %v907_v25  ;;  %v892_v36 = vmax.f32 %v636_v26, 0.0  ;;  %v893_v37 = vmax.f32 %v637_v27, 0.0  ;;  %v379_v38 = vmul.f32 %v1955_v5, %v119_v23  ;;  %v141_v23 = vld [vmem:[%s2834_s0 + $0x3f8] sm:$0xff] }
  0x6c   :  { %v908_v39 = vmax.f32 %v652_v31, 0.0  ;;  %v909_v40 = vmax.f32 %v653_v32, 0.0  ;;  %v394_v41 = vmul.f32 %v1955_v5, %v134_v28  ;;  %v395_v42 = vmul.f32 %v1955_v5, %v135_v29  ;;  %v142_v32 = vld [vmem:[%s2834_s0 + $0x400] sm:$0xff] }
  0x6d   :  { %v1200_v45 = vmax.f32 %v1098_v30, %v1099_v35  ;;  %v638_v46 = vadd.f32 %v1949_v58, %v378_v33  ;;  %v639_v47 = vadd.f32 %v1949_v58, %v379_v38  ;;  %v380_v49 = vmul.f32 %v1955_v5, %v120_v34 }
  0x6e   :  { %v1100_v50 = vmax.f32 %v892_v36, %v908_v39  ;;  %v1101_v51 = vmax.f32 %v893_v37, %v909_v40  ;;  %v654_v52 = vadd.f32 %v1949_v58, %v394_v41  ;;  %v655_v53 = vadd.f32 %v1949_v58, %v395_v42  ;;  %v143_v37 = vld [vmem:[%s2834_s0 + $0x408] sm:$0xff]  ;;  %v158_v42 = vld [vmem:[%s2834_s0 + $0x480] sm:$0xff] }
  0x6f   :  { %1264 = vst [vmem:[%s2837_s3 + $0xd0] sm:$0xff] %v1200_v45  ;;  %v894_v55 = vmax.f32 %v638_v46, 0.0  ;;  %v895_v56 = vmax.f32 %v639_v47, 0.0  ;;  %v381_v57 = vmul.f32 %v1955_v5, %v121_v43  ;;  %v396_v59 = vmul.f32 %v1955_v5, %v136_v44  ;;  %v159_v43 = vld [vmem:[%s2834_s0 + $0x488] sm:$0xff] }
  0x70   :  { %v1201_v60 = vmax.f32 %v1100_v50, %v1101_v51  ;;  %v910_v61 = vmax.f32 %v654_v52, 0.0  ;;  %v911_v62 = vmax.f32 %v655_v53, 0.0  ;;  %v397_v63 = vmul.f32 %v1955_v5, %v137_v48  ;;  %v144_v48 = vld [vmem:[%s2834_s0 + $0x410] sm:$0xff] }
  0x71   :  { %v640_v1 = vadd.f32 %v1949_v58, %v380_v49  ;;  %v641_v2 = vadd.f32 %v1949_v58, %v381_v57  ;;  %v656_v3 = vadd.f32 %v1949_v58, %v396_v59  ;;  %v382_v7 = vmul.f32 %v1955_v5, %v122_v54  ;;  %v145_v57 = vld [vmem:[%s2834_s0 + $0x418] sm:$0xff]  ;;  %v160_v59 = vld [vmem:[%s2834_s0 + $0x490] sm:$0xff] }
  0x72   :  { %1265 = vst [vmem:[%s2837_s3 + $0xd8] sm:$0xff] %v1201_v60  ;;  %v1102_v8 = vmax.f32 %v894_v55, %v910_v61  ;;  %v1103_v9 = vmax.f32 %v895_v56, %v911_v62  ;;  %v657_v10 = vadd.f32 %v1949_v58, %v397_v63  ;;  %v383_v11 = vmul.f32 %v1955_v5, %v123_v4  ;;  %v161_v62 = vld [vmem:[%s2834_s0 + $0x498] sm:$0xff] }
  0x73   :  { %v896_v13 = vmax.f32 %v640_v1, 0.0  ;;  %v897_v14 = vmax.f32 %v641_v2, 0.0  ;;  %v912_v15 = vmax.f32 %v656_v3, 0.0  ;;  %v398_v16 = vmul.f32 %v1955_v5, %v138_v0 }
  0x74   :  { %v1202_v18 = vmax.f32 %v1102_v8, %v1103_v9  ;;  %v913_v19 = vmax.f32 %v657_v10, 0.0  ;;  %v399_v20 = vmul.f32 %v1955_v5, %v139_v6  ;;  %v642_v21 = vadd.f32 %v1949_v58, %v382_v7  ;;  %v146_v6 = vld [vmem:[%s2834_s0 + $0x420] sm:$0xff] }
  0x75   :  { %v1104_v24 = vmax.f32 %v896_v13, %v912_v15  ;;  %v643_v25 = vadd.f32 %v1949_v58, %v383_v11  ;;  %v658_v26 = vadd.f32 %v1949_v58, %v398_v16  ;;  %v384_v27 = vmul.f32 %v1955_v5, %v124_v12  ;;  %v147_v11 = vld [vmem:[%s2834_s0 + $0x428] sm:$0xff]  ;;  %v162_v16 = vld [vmem:[%s2834_s0 + $0x4a0] sm:$0xff] }
  0x76   :  { %1266 = vst [vmem:[%s2837_s3 + $0xe0] sm:$0xff] %v1202_v18  ;;  %v1105_v28 = vmax.f32 %v897_v14, %v913_v19  ;;  %v659_v29 = vadd.f32 %v1949_v58, %v399_v20  ;;  %v898_v30 = vmax.f32 %v642_v21, 0.0  ;;  %v385_v31 = vmul.f32 %v1955_v5, %v125_v17  ;;  %v163_v20 = vld [vmem:[%s2834_s0 + $0x4a8] sm:$0xff] }
  0x77   :  { %v899_v33 = vmax.f32 %v643_v25, 0.0  ;;  %v914_v34 = vmax.f32 %v658_v26, 0.0  ;;  %v400_v35 = vmul.f32 %v1955_v5, %v140_v22  ;;  %v401_v36 = vmul.f32 %v1955_v5, %v141_v23  ;;  %v148_v26 = vld [vmem:[%s2834_s0 + $0x430] sm:$0xff] }
  0x78   :  { %v1203_v38 = vmax.f32 %v1104_v24, %v1105_v28  ;;  %v915_v39 = vmax.f32 %v659_v29, 0.0  ;;  %v644_v40 = vadd.f32 %v1949_v58, %v384_v27  ;;  %v645_v41 = vadd.f32 %v1949_v58, %v385_v31  ;;  %v149_v31 = vld [vmem:[%s2834_s0 + $0x438] sm:$0xff] }
  0x79   :  { %v1106_v44 = vmax.f32 %v898_v30, %v914_v34  ;;  %v660_v45 = vadd.f32 %v1949_v58, %v400_v35  ;;  %v661_v46 = vadd.f32 %v1949_v58, %v401_v36  ;;  %v402_v47 = vmul.f32 %v1955_v5, %v142_v32  ;;  %v164_v36 = vld [vmem:[%s2834_s0 + $0x4b0] sm:$0xff] }
  0x7a   :  { %1267 = vst [vmem:[%s2837_s3 + $0xe8] sm:$0xff] %v1203_v38  ;;  %v1107_v49 = vmax.f32 %v899_v33, %v915_v39  ;;  %v900_v50 = vmax.f32 %v644_v40, 0.0  ;;  %v901_v51 = vmax.f32 %v645_v41, 0.0  ;;  %v403_v52 = vmul.f32 %v1955_v5, %v143_v37  ;;  %v165_v37 = vld [vmem:[%s2834_s0 + $0x4b8] sm:$0xff] }
  0x7b   :  { %v916_v53 = vmax.f32 %v660_v45, 0.0  ;;  %v917_v54 = vmax.f32 %v661_v46, 0.0  ;;  %v418_v55 = vmul.f32 %v1955_v5, %v158_v42  ;;  %v419_v56 = vmul.f32 %v1955_v5, %v159_v43  ;;  %v150_v46 = vld [vmem:[%s2834_s0 + $0x440] sm:$0xff] }
  0x7c   :  { %v1204_v4 = vmax.f32 %v1106_v44, %v1107_v49  ;;  %v662_v60 = vadd.f32 %v1949_v58, %v402_v47  ;;  %v663_v61 = vadd.f32 %v1949_v58, %v403_v52  ;;  %v404_v63 = vmul.f32 %v1955_v5, %v144_v48 }
  0x7d   :  { %v1108_v0 = vmax.f32 %v900_v50, %v916_v53  ;;  %v1109_v1 = vmax.f32 %v901_v51, %v917_v54  ;;  %v678_v2 = vadd.f32 %v1949_v58, %v418_v55  ;;  %v679_v3 = vadd.f32 %v1949_v58, %v419_v56  ;;  %v151_v51 = vld [vmem:[%s2834_s0 + $0x448] sm:$0xff]  ;;  %v166_v56 = vld [vmem:[%s2834_s0 + $0x4c0] sm:$0xff] }
  0x7e   :  { %1268 = vst [vmem:[%s2837_s3 + $0xf0] sm:$0xff] %v1204_v4  ;;  %v918_v7 = vmax.f32 %v662_v60, 0.0  ;;  %v919_v8 = vmax.f32 %v663_v61, 0.0  ;;  %v405_v9 = vmul.f32 %v1955_v5, %v145_v57  ;;  %v420_v10 = vmul.f32 %v1955_v5, %v160_v59  ;;  %v167_v57 = vld [vmem:[%s2834_s0 + $0x4c8] sm:$0xff] }
  0x7f   :  { %v1205_v12 = vmax.f32 %v1108_v0, %v1109_v1  ;;  %v934_v13 = vmax.f32 %v678_v2, 0.0  ;;  %v935_v14 = vmax.f32 %v679_v3, 0.0  ;;  %v421_v15 = vmul.f32 %v1955_v5, %v161_v62  ;;  %v152_v62 = vld [vmem:[%s2834_s0 + $0x450] sm:$0xff] }
  0x80   :  { %v664_v17 = vadd.f32 %v1949_v58, %v404_v63  ;;  %v665_v18 = vadd.f32 %v1949_v58, %v405_v9  ;;  %v680_v19 = vadd.f32 %v1949_v58, %v420_v10  ;;  %v406_v21 = vmul.f32 %v1955_v5, %v146_v6  ;;  %v153_v9 = vld [vmem:[%s2834_s0 + $0x458] sm:$0xff]  ;;  %v168_v10 = vld [vmem:[%s2834_s0 + $0x4d0] sm:$0xff] }
  0x81   :  { %1269 = vst [vmem:[%s2837_s3 + $0xf8] sm:$0xff] %v1205_v12  ;;  %v1110_v22 = vmax.f32 %v918_v7, %v934_v13  ;;  %v1111_v23 = vmax.f32 %v919_v8, %v935_v14  ;;  %v681_v24 = vadd.f32 %v1949_v58, %v421_v15  ;;  %v407_v25 = vmul.f32 %v1955_v5, %v147_v11  ;;  %v169_v14 = vld [vmem:[%s2834_s0 + $0x4d8] sm:$0xff] }
  0x82   :  { %v920_v27 = vmax.f32 %v664_v17, 0.0  ;;  %v921_v28 = vmax.f32 %v665_v18, 0.0  ;;  %v936_v29 = vmax.f32 %v680_v19, 0.0  ;;  %v422_v30 = vmul.f32 %v1955_v5, %v162_v16 }
  0x83   :  { %v1206_v32 = vmax.f32 %v1110_v22, %v1111_v23  ;;  %v937_v33 = vmax.f32 %v681_v24, 0.0  ;;  %v423_v34 = vmul.f32 %v1955_v5, %v163_v20  ;;  %v666_v35 = vadd.f32 %v1949_v58, %v406_v21  ;;  %v154_v20 = vld [vmem:[%s2834_s0 + $0x460] sm:$0xff] }
  0x84   :  { %v1112_v38 = vmax.f32 %v920_v27, %v936_v29  ;;  %v667_v39 = vadd.f32 %v1949_v58, %v407_v25  ;;  %v682_v40 = vadd.f32 %v1949_v58, %v422_v30  ;;  %v408_v41 = vmul.f32 %v1955_v5, %v148_v26  ;;  %v155_v25 = vld [vmem:[%s2834_s0 + $0x468] sm:$0xff]  ;;  %v170_v30 = vld [vmem:[%s2834_s0 + $0x4e0] sm:$0xff] }
  0x85   :  { %1270 = vst [vmem:[%s2837_s3 + $0x100] sm:$0xff] %v1206_v32  ;;  %v1113_v42 = vmax.f32 %v921_v28, %v937_v33  ;;  %v683_v43 = vadd.f32 %v1949_v58, %v423_v34  ;;  %v922_v44 = vmax.f32 %v666_v35, 0.0  ;;  %v409_v45 = vmul.f32 %v1955_v5, %v149_v31  ;;  %v171_v34 = vld [vmem:[%s2834_s0 + $0x4e8] sm:$0xff] }
  0x86   :  { %v923_v47 = vmax.f32 %v667_v39, 0.0  ;;  %v938_v48 = vmax.f32 %v682_v40, 0.0  ;;  %v424_v49 = vmul.f32 %v1955_v5, %v164_v36  ;;  %v425_v50 = vmul.f32 %v1955_v5, %v165_v37  ;;  %v156_v40 = vld [vmem:[%s2834_s0 + $0x470] sm:$0xff] }
  0x87   :  { %v1207_v52 = vmax.f32 %v1112_v38, %v1113_v42  ;;  %v939_v53 = vmax.f32 %v683_v43, 0.0  ;;  %v668_v54 = vadd.f32 %v1949_v58, %v408_v41  ;;  %v669_v55 = vadd.f32 %v1949_v58, %v409_v45  ;;  %v157_v45 = vld [vmem:[%s2834_s0 + $0x478] sm:$0xff] }
  0x88   :  { %v1114_v59 = vmax.f32 %v922_v44, %v938_v48  ;;  %v684_v4 = vadd.f32 %v1949_v58, %v424_v49  ;;  %v685_v60 = vadd.f32 %v1949_v58, %v425_v50  ;;  %v410_v61 = vmul.f32 %v1955_v5, %v150_v46  ;;  %v172_v50 = vld [vmem:[%s2834_s0 + $0x4f0] sm:$0xff] }
  0x89   :  { %1271 = vst [vmem:[%s2837_s3 + $0x108] sm:$0xff] %v1207_v52  ;;  %v1115_v63 = vmax.f32 %v923_v47, %v939_v53  ;;  %v924_v0 = vmax.f32 %v668_v54, 0.0  ;;  %v925_v1 = vmax.f32 %v669_v55, 0.0  ;;  %v411_v2 = vmul.f32 %v1955_v5, %v151_v51  ;;  %v173_v51 = vld [vmem:[%s2834_s0 + $0x4f8] sm:$0xff] }
  0x8a   :  { %v940_v3 = vmax.f32 %v684_v4, 0.0  ;;  %v941_v6 = vmax.f32 %v685_v60, 0.0  ;;  %v426_v7 = vmul.f32 %v1955_v5, %v166_v56  ;;  %v427_v8 = vmul.f32 %v1955_v5, %v167_v57  ;;  %v174_v60 = vld [vmem:[%s2834_s0 + $0x500] sm:$0xff] }
  0x8b   :  { %v1208_v11 = vmax.f32 %v1114_v59, %v1115_v63  ;;  %v670_v12 = vadd.f32 %v1949_v58, %v410_v61  ;;  %v671_v13 = vadd.f32 %v1949_v58, %v411_v2  ;;  %v412_v15 = vmul.f32 %v1955_v5, %v152_v62 }
  0x8c   :  { %v1116_v16 = vmax.f32 %v924_v0, %v940_v3  ;;  %v1117_v17 = vmax.f32 %v925_v1, %v941_v6  ;;  %v686_v18 = vadd.f32 %v1949_v58, %v426_v7  ;;  %v687_v19 = vadd.f32 %v1949_v58, %v427_v8  ;;  %v175_v1 = vld [vmem:[%s2834_s0 + $0x508] sm:$0xff]  ;;  %v190_v8 = vld [vmem:[%s2834_s0 + $0x580] sm:$0xff] }
  0x8d   :  { %1272 = vst [vmem:[%s2837_s3 + $0x110] sm:$0xff] %v1208_v11  ;;  %v926_v21 = vmax.f32 %v670_v12, 0.0  ;;  %v927_v22 = vmax.f32 %v671_v13, 0.0  ;;  %v413_v23 = vmul.f32 %v1955_v5, %v153_v9  ;;  %v428_v24 = vmul.f32 %v1955_v5, %v168_v10  ;;  %v191_v9 = vld [vmem:[%s2834_s0 + $0x588] sm:$0xff] }
  0x8e   :  { %v1209_v26 = vmax.f32 %v1116_v16, %v1117_v17  ;;  %v942_v27 = vmax.f32 %v686_v18, 0.0  ;;  %v943_v28 = vmax.f32 %v687_v19, 0.0  ;;  %v429_v29 = vmul.f32 %v1955_v5, %v169_v14  ;;  %v176_v14 = vld [vmem:[%s2834_s0 + $0x510] sm:$0xff] }
  0x8f   :  { %v672_v31 = vadd.f32 %v1949_v58, %v412_v15  ;;  %v673_v32 = vadd.f32 %v1949_v58, %v413_v23  ;;  %v688_v33 = vadd.f32 %v1949_v58, %v428_v24  ;;  %v414_v35 = vmul.f32 %v1955_v5, %v154_v20  ;;  %v177_v23 = vld [vmem:[%s2834_s0 + $0x518] sm:$0xff]  ;;  %v192_v24 = vld [vmem:[%s2834_s0 + $0x590] sm:$0xff] }
  0x90   :  { %1273 = vst [vmem:[%s2837_s3 + $0x118] sm:$0xff] %v1209_v26  ;;  %v1118_v36 = vmax.f32 %v926_v21, %v942_v27  ;;  %v1119_v37 = vmax.f32 %v927_v22, %v943_v28  ;;  %v689_v38 = vadd.f32 %v1949_v58, %v429_v29  ;;  %v415_v39 = vmul.f32 %v1955_v5, %v155_v25  ;;  %v193_v28 = vld [vmem:[%s2834_s0 + $0x598] sm:$0xff] }
  0x91   :  { %v928_v41 = vmax.f32 %v672_v31, 0.0  ;;  %v929_v42 = vmax.f32 %v673_v32, 0.0  ;;  %v944_v43 = vmax.f32 %v688_v33, 0.0  ;;  %v430_v44 = vmul.f32 %v1955_v5, %v170_v30 }
  0x92   :  { %v1210_v46 = vmax.f32 %v1118_v36, %v1119_v37  ;;  %v945_v47 = vmax.f32 %v689_v38, 0.0  ;;  %v431_v48 = vmul.f32 %v1955_v5, %v171_v34  ;;  %v674_v49 = vadd.f32 %v1949_v58, %v414_v35  ;;  %v178_v34 = vld [vmem:[%s2834_s0 + $0x520] sm:$0xff] }
  0x93   :  { %v1120_v52 = vmax.f32 %v928_v41, %v944_v43  ;;  %v675_v53 = vadd.f32 %v1949_v58, %v415_v39  ;;  %v690_v54 = vadd.f32 %v1949_v58, %v430_v44  ;;  %v416_v55 = vmul.f32 %v1955_v5, %v156_v40  ;;  %v179_v39 = vld [vmem:[%s2834_s0 + $0x528] sm:$0xff]  ;;  %v194_v44 = vld [vmem:[%s2834_s0 + $0x5a0] sm:$0xff] }
  0x94   :  { %1274 = vst [vmem:[%s2837_s3 + $0x120] sm:$0xff] %v1210_v46  ;;  %v1121_v56 = vmax.f32 %v929_v42, %v945_v47  ;;  %v691_v57 = vadd.f32 %v1949_v58, %v431_v48  ;;  %v930_v59 = vmax.f32 %v674_v49, 0.0  ;;  %v417_v4 = vmul.f32 %v1955_v5, %v157_v45  ;;  %v195_v48 = vld [vmem:[%s2834_s0 + $0x5a8] sm:$0xff] }
  0x95   :  { %v931_v61 = vmax.f32 %v675_v53, 0.0  ;;  %v946_v62 = vmax.f32 %v690_v54, 0.0  ;;  %v432_v63 = vmul.f32 %v1955_v5, %v172_v50  ;;  %v433_v0 = vmul.f32 %v1955_v5, %v173_v51  ;;  %v180_v54 = vld [vmem:[%s2834_s0 + $0x530] sm:$0xff] }
  0x96   :  { %v1211_v2 = vmax.f32 %v1120_v52, %v1121_v56  ;;  %v947_v3 = vmax.f32 %v691_v57, 0.0  ;;  %v676_v6 = vadd.f32 %v1949_v58, %v416_v55  ;;  %v677_v7 = vadd.f32 %v1949_v58, %v417_v4  ;;  %v181_v4 = vld [vmem:[%s2834_s0 + $0x538] sm:$0xff] }
  0x97   :  { %v1122_v10 = vmax.f32 %v930_v59, %v946_v62  ;;  %v692_v11 = vadd.f32 %v1949_v58, %v432_v63  ;;  %v693_v12 = vadd.f32 %v1949_v58, %v433_v0  ;;  %v434_v13 = vmul.f32 %v1955_v5, %v174_v60  ;;  %v196_v0 = vld [vmem:[%s2834_s0 + $0x5b0] sm:$0xff] }
  0x98   :  { %1275 = vst [vmem:[%s2837_s3 + $0x128] sm:$0xff] %v1211_v2  ;;  %v1123_v15 = vmax.f32 %v931_v61, %v947_v3  ;;  %v932_v16 = vmax.f32 %v676_v6, 0.0  ;;  %v933_v17 = vmax.f32 %v677_v7, 0.0  ;;  %v435_v18 = vmul.f32 %v1955_v5, %v175_v1  ;;  %v197_v1 = vld [vmem:[%s2834_s0 + $0x5b8] sm:$0xff] }
  0x99   :  { %v948_v19 = vmax.f32 %v692_v11, 0.0  ;;  %v949_v20 = vmax.f32 %v693_v12, 0.0  ;;  %v450_v21 = vmul.f32 %v1955_v5, %v190_v8  ;;  %v451_v22 = vmul.f32 %v1955_v5, %v191_v9  ;;  %v182_v12 = vld [vmem:[%s2834_s0 + $0x540] sm:$0xff] }
  0x9a   :  { %v1212_v25 = vmax.f32 %v1122_v10, %v1123_v15  ;;  %v694_v26 = vadd.f32 %v1949_v58, %v434_v13  ;;  %v695_v27 = vadd.f32 %v1949_v58, %v435_v18  ;;  %v436_v29 = vmul.f32 %v1955_v5, %v176_v14 }
  0x9b   :  { %v1124_v30 = vmax.f32 %v932_v16, %v948_v19  ;;  %v1125_v31 = vmax.f32 %v933_v17, %v949_v20  ;;  %v710_v32 = vadd.f32 %v1949_v58, %v450_v21  ;;  %v711_v33 = vadd.f32 %v1949_v58, %v451_v22  ;;  %v183_v17 = vld [vmem:[%s2834_s0 + $0x548] sm:$0xff]  ;;  %v198_v22 = vld [vmem:[%s2834_s0 + $0x5c0] sm:$0xff] }
  0x9c   :  { %1276 = vst [vmem:[%s2837_s3 + $0x130] sm:$0xff] %v1212_v25  ;;  %v950_v35 = vmax.f32 %v694_v26, 0.0  ;;  %v951_v36 = vmax.f32 %v695_v27, 0.0  ;;  %v437_v37 = vmul.f32 %v1955_v5, %v177_v23  ;;  %v452_v38 = vmul.f32 %v1955_v5, %v192_v24  ;;  %v199_v23 = vld [vmem:[%s2834_s0 + $0x5c8] sm:$0xff] }
  0x9d   :  { %v1213_v40 = vmax.f32 %v1124_v30, %v1125_v31  ;;  %v966_v41 = vmax.f32 %v710_v32, 0.0  ;;  %v967_v42 = vmax.f32 %v711_v33, 0.0  ;;  %v453_v43 = vmul.f32 %v1955_v5, %v193_v28  ;;  %v184_v28 = vld [vmem:[%s2834_s0 + $0x550] sm:$0xff] }
  0x9e   :  { %v696_v45 = vadd.f32 %v1949_v58, %v436_v29  ;;  %v697_v46 = vadd.f32 %v1949_v58, %v437_v37  ;;  %v712_v47 = vadd.f32 %v1949_v58, %v452_v38  ;;  %v438_v49 = vmul.f32 %v1955_v5, %v178_v34  ;;  %v185_v37 = vld [vmem:[%s2834_s0 + $0x558] sm:$0xff]  ;;  %v200_v38 = vld [vmem:[%s2834_s0 + $0x5d0] sm:$0xff] }
  0x9f   :  { %1277 = vst [vmem:[%s2837_s3 + $0x138] sm:$0xff] %v1213_v40  ;;  %v1126_v50 = vmax.f32 %v950_v35, %v966_v41  ;;  %v1127_v51 = vmax.f32 %v951_v36, %v967_v42  ;;  %v713_v52 = vadd.f32 %v1949_v58, %v453_v43  ;;  %v439_v53 = vmul.f32 %v1955_v5, %v179_v39  ;;  %v201_v42 = vld [vmem:[%s2834_s0 + $0x5d8] sm:$0xff] }
  0xa0   :  { %v952_v55 = vmax.f32 %v696_v45, 0.0  ;;  %v953_v56 = vmax.f32 %v697_v46, 0.0  ;;  %v968_v57 = vmax.f32 %v712_v47, 0.0  ;;  %v454_v59 = vmul.f32 %v1955_v5, %v194_v44 }
  0xa1   :  { %v1214_v60 = vmax.f32 %v1126_v50, %v1127_v51  ;;  %v969_v61 = vmax.f32 %v713_v52, 0.0  ;;  %v455_v62 = vmul.f32 %v1955_v5, %v195_v48  ;;  %v698_v63 = vadd.f32 %v1949_v58, %v438_v49  ;;  %v186_v48 = vld [vmem:[%s2834_s0 + $0x560] sm:$0xff] }
  0xa2   :  { %v1128_v2 = vmax.f32 %v952_v55, %v968_v57  ;;  %v699_v3 = vadd.f32 %v1949_v58, %v439_v53  ;;  %v714_v6 = vadd.f32 %v1949_v58, %v454_v59  ;;  %v440_v7 = vmul.f32 %v1955_v5, %v180_v54  ;;  %v187_v53 = vld [vmem:[%s2834_s0 + $0x568] sm:$0xff]  ;;  %v202_v59 = vld [vmem:[%s2834_s0 + $0x5e0] sm:$0xff] }
  0xa3   :  { %1278 = vst [vmem:[%s2837_s3 + $0x140] sm:$0xff] %v1214_v60  ;;  %v1129_v8 = vmax.f32 %v953_v56, %v969_v61  ;;  %v715_v9 = vadd.f32 %v1949_v58, %v455_v62  ;;  %v954_v10 = vmax.f32 %v698_v63, 0.0  ;;  %v441_v11 = vmul.f32 %v1955_v5, %v181_v4  ;;  %v203_v62 = vld [vmem:[%s2834_s0 + $0x5e8] sm:$0xff] }
  0xa4   :  { %v955_v13 = vmax.f32 %v699_v3, 0.0  ;;  %v970_v14 = vmax.f32 %v714_v6, 0.0  ;;  %v456_v15 = vmul.f32 %v1955_v5, %v196_v0  ;;  %v457_v16 = vmul.f32 %v1955_v5, %v197_v1  ;;  %v188_v6 = vld [vmem:[%s2834_s0 + $0x570] sm:$0xff] }
  0xa5   :  { %v1215_v18 = vmax.f32 %v1128_v2, %v1129_v8  ;;  %v971_v19 = vmax.f32 %v715_v9, 0.0  ;;  %v700_v20 = vadd.f32 %v1949_v58, %v440_v7  ;;  %v701_v21 = vadd.f32 %v1949_v58, %v441_v11  ;;  %v189_v11 = vld [vmem:[%s2834_s0 + $0x578] sm:$0xff] }
  0xa6   :  { %v1130_v24 = vmax.f32 %v954_v10, %v970_v14  ;;  %v716_v25 = vadd.f32 %v1949_v58, %v456_v15  ;;  %v717_v26 = vadd.f32 %v1949_v58, %v457_v16  ;;  %v442_v27 = vmul.f32 %v1955_v5, %v182_v12  ;;  %v204_v16 = vld [vmem:[%s2834_s0 + $0x5f0] sm:$0xff] }
  0xa7   :  { %1279 = vst [vmem:[%s2837_s3 + $0x148] sm:$0xff] %v1215_v18  ;;  %v1131_v29 = vmax.f32 %v955_v13, %v971_v19  ;;  %v956_v30 = vmax.f32 %v700_v20, 0.0  ;;  %v957_v31 = vmax.f32 %v701_v21, 0.0  ;;  %v443_v32 = vmul.f32 %v1955_v5, %v183_v17  ;;  %v205_v17 = vld [vmem:[%s2834_s0 + $0x5f8] sm:$0xff] }
  0xa8   :  { %v972_v33 = vmax.f32 %v716_v25, 0.0  ;;  %v973_v34 = vmax.f32 %v717_v26, 0.0  ;;  %v458_v35 = vmul.f32 %v1955_v5, %v198_v22  ;;  %v459_v36 = vmul.f32 %v1955_v5, %v199_v23  ;;  %v206_v26 = vld [vmem:[%s2834_s0 + $0x600] sm:$0xff] }
  0xa9   :  { %v1216_v39 = vmax.f32 %v1130_v24, %v1131_v29  ;;  %v702_v40 = vadd.f32 %v1949_v58, %v442_v27  ;;  %v703_v41 = vadd.f32 %v1949_v58, %v443_v32  ;;  %v444_v43 = vmul.f32 %v1955_v5, %v184_v28 }
  0xaa   :  { %v1132_v44 = vmax.f32 %v956_v30, %v972_v33  ;;  %v1133_v45 = vmax.f32 %v957_v31, %v973_v34  ;;  %v718_v46 = vadd.f32 %v1949_v58, %v458_v35  ;;  %v719_v47 = vadd.f32 %v1949_v58, %v459_v36  ;;  %v207_v31 = vld [vmem:[%s2834_s0 + $0x608] sm:$0xff]  ;;  %v222_v36 = vld [vmem:[%s2834_s0 + $0x680] sm:$0xff] }
  0xab   :  { %1280 = vst [vmem:[%s2837_s3 + $0x150] sm:$0xff] %v1216_v39  ;;  %v958_v49 = vmax.f32 %v702_v40, 0.0  ;;  %v959_v50 = vmax.f32 %v703_v41, 0.0  ;;  %v445_v51 = vmul.f32 %v1955_v5, %v185_v37  ;;  %v460_v52 = vmul.f32 %v1955_v5, %v200_v38  ;;  %v223_v37 = vld [vmem:[%s2834_s0 + $0x688] sm:$0xff] }
  0xac   :  { %v1217_v54 = vmax.f32 %v1132_v44, %v1133_v45  ;;  %v974_v55 = vmax.f32 %v718_v46, 0.0  ;;  %v975_v56 = vmax.f32 %v719_v47, 0.0  ;;  %v461_v57 = vmul.f32 %v1955_v5, %v201_v42  ;;  %v208_v42 = vld [vmem:[%s2834_s0 + $0x610] sm:$0xff] }
  0xad   :  { %v704_v4 = vadd.f32 %v1949_v58, %v444_v43  ;;  %v705_v60 = vadd.f32 %v1949_v58, %v445_v51  ;;  %v720_v61 = vadd.f32 %v1949_v58, %v460_v52  ;;  %v446_v63 = vmul.f32 %v1955_v5, %v186_v48  ;;  %v209_v51 = vld [vmem:[%s2834_s0 + $0x618] sm:$0xff]  ;;  %v224_v52 = vld [vmem:[%s2834_s0 + $0x690] sm:$0xff] }
  0xae   :  { %1281 = vst [vmem:[%s2837_s3 + $0x158] sm:$0xff] %v1217_v54  ;;  %v1134_v0 = vmax.f32 %v958_v49, %v974_v55  ;;  %v1135_v1 = vmax.f32 %v959_v50, %v975_v56  ;;  %v721_v2 = vadd.f32 %v1949_v58, %v461_v57  ;;  %v447_v3 = vmul.f32 %v1955_v5, %v187_v53  ;;  %v225_v56 = vld [vmem:[%s2834_s0 + $0x698] sm:$0xff] }
  0xaf   :  { %v960_v7 = vmax.f32 %v704_v4, 0.0  ;;  %v961_v8 = vmax.f32 %v705_v60, 0.0  ;;  %v976_v9 = vmax.f32 %v720_v61, 0.0  ;;  %v462_v10 = vmul.f32 %v1955_v5, %v202_v59 }
  0xb0   :  { %v1218_v12 = vmax.f32 %v1134_v0, %v1135_v1  ;;  %v977_v13 = vmax.f32 %v721_v2, 0.0  ;;  %v463_v14 = vmul.f32 %v1955_v5, %v203_v62  ;;  %v706_v15 = vadd.f32 %v1949_v58, %v446_v63  ;;  %v210_v62 = vld [vmem:[%s2834_s0 + $0x620] sm:$0xff] }
  0xb1   :  { %v1136_v18 = vmax.f32 %v960_v7, %v976_v9  ;;  %v707_v19 = vadd.f32 %v1949_v58, %v447_v3  ;;  %v722_v20 = vadd.f32 %v1949_v58, %v462_v10  ;;  %v448_v21 = vmul.f32 %v1955_v5, %v188_v6  ;;  %v211_v3 = vld [vmem:[%s2834_s0 + $0x628] sm:$0xff]  ;;  %v226_v10 = vld [vmem:[%s2834_s0 + $0x6a0] sm:$0xff] }
  0xb2   :  { %1282 = vst [vmem:[%s2837_s3 + $0x160] sm:$0xff] %v1218_v12  ;;  %v1137_v22 = vmax.f32 %v961_v8, %v977_v13  ;;  %v723_v23 = vadd.f32 %v1949_v58, %v463_v14  ;;  %v962_v24 = vmax.f32 %v706_v15, 0.0  ;;  %v449_v25 = vmul.f32 %v1955_v5, %v189_v11  ;;  %v227_v14 = vld [vmem:[%s2834_s0 + $0x6a8] sm:$0xff] }
  0xb3   :  { %v963_v27 = vmax.f32 %v707_v19, 0.0  ;;  %v978_v28 = vmax.f32 %v722_v20, 0.0  ;;  %v464_v29 = vmul.f32 %v1955_v5, %v204_v16  ;;  %v465_v30 = vmul.f32 %v1955_v5, %v205_v17  ;;  %v212_v20 = vld [vmem:[%s2834_s0 + $0x630] sm:$0xff] }
  0xb4   :  { %v1219_v32 = vmax.f32 %v1136_v18, %v1137_v22  ;;  %v979_v33 = vmax.f32 %v723_v23, 0.0  ;;  %v708_v34 = vadd.f32 %v1949_v58, %v448_v21  ;;  %v709_v35 = vadd.f32 %v1949_v58, %v449_v25  ;;  %v213_v25 = vld [vmem:[%s2834_s0 + $0x638] sm:$0xff] }
  0xb5   :  { %v1138_v38 = vmax.f32 %v962_v24, %v978_v28  ;;  %v724_v39 = vadd.f32 %v1949_v58, %v464_v29  ;;  %v725_v40 = vadd.f32 %v1949_v58, %v465_v30  ;;  %v466_v41 = vmul.f32 %v1955_v5, %v206_v26  ;;  %v228_v30 = vld [vmem:[%s2834_s0 + $0x6b0] sm:$0xff] }
  0xb6   :  { %1283 = vst [vmem:[%s2837_s3 + $0x168] sm:$0xff] %v1219_v32  ;;  %v1139_v43 = vmax.f32 %v963_v27, %v979_v33  ;;  %v964_v44 = vmax.f32 %v708_v34, 0.0  ;;  %v965_v45 = vmax.f32 %v709_v35, 0.0  ;;  %v467_v46 = vmul.f32 %v1955_v5, %v207_v31  ;;  %v229_v31 = vld [vmem:[%s2834_s0 + $0x6b8] sm:$0xff] }
  0xb7   :  { %v980_v47 = vmax.f32 %v724_v39, 0.0  ;;  %v981_v48 = vmax.f32 %v725_v40, 0.0  ;;  %v482_v49 = vmul.f32 %v1955_v5, %v222_v36  ;;  %v483_v50 = vmul.f32 %v1955_v5, %v223_v37  ;;  %v214_v40 = vld [vmem:[%s2834_s0 + $0x640] sm:$0xff] }
  0xb8   :  { %v1220_v53 = vmax.f32 %v1138_v38, %v1139_v43  ;;  %v726_v54 = vadd.f32 %v1949_v58, %v466_v41  ;;  %v727_v55 = vadd.f32 %v1949_v58, %v467_v46  ;;  %v468_v57 = vmul.f32 %v1955_v5, %v208_v42 }
  0xb9   :  { %v1140_v59 = vmax.f32 %v964_v44, %v980_v47  ;;  %v1141_v4 = vmax.f32 %v965_v45, %v981_v48  ;;  %v742_v60 = vadd.f32 %v1949_v58, %v482_v49  ;;  %v743_v61 = vadd.f32 %v1949_v58, %v483_v50  ;;  %v215_v45 = vld [vmem:[%s2834_s0 + $0x648] sm:$0xff]  ;;  %v2545_v49 = vld [vmem:[%s2836_s2] ss:$0 sm:$0xff] }
  0xba   :  { %1284 = vst [vmem:[%s2837_s3 + $0x170] sm:$0xff] %v1220_v53  ;;  %v982_v63 = vmax.f32 %v726_v54, 0.0  ;;  %v983_v0 = vmax.f32 %v727_v55, 0.0  ;;  %v469_v1 = vmul.f32 %v1955_v5, %v209_v51  ;;  %v484_v2 = vmul.f32 %v1955_v5, %v224_v52  ;;  %v230_v51 = vld [vmem:[%s2834_s0 + $0x6c0] sm:$0xff] }
  0xbb   :  { %v1221_v6 = vmax.f32 %v1140_v59, %v1141_v4  ;;  %v998_v7 = vmax.f32 %v742_v60, 0.0  ;;  %v999_v8 = vmax.f32 %v743_v61, 0.0  ;;  %v485_v9 = vmul.f32 %v1955_v5, %v225_v56  ;;  %v2559_v54 = vld [vmem:[%s2835_s1] ss:$0 sm:$0xff]  ;;  %v216_v56 = vld [vmem:[%s2834_s0 + $0x650] sm:$0xff] }
  0xbc   :  { %v728_v11 = vadd.f32 %v1949_v58, %v468_v57  ;;  %v729_v12 = vadd.f32 %v1949_v58, %v469_v1  ;;  %v744_v13 = vadd.f32 %v1949_v58, %v484_v2  ;;  %v470_v15 = vmul.f32 %v1955_v5, %v210_v62  ;;  %v217_v1 = vld [vmem:[%s2834_s0 + $0x658] sm:$0xff]  ;;  %v232_v2 = vld [vmem:[%s2834_s0 + $0x6d0] sm:$0xff] }
  0xbd   :  { %1285 = vst [vmem:[%s2837_s3 + $0x178] sm:$0xff] %v1221_v6  ;;  %v1142_v16 = vmax.f32 %v982_v63, %v998_v7  ;;  %v1143_v17 = vmax.f32 %v983_v0, %v999_v8  ;;  %v745_v18 = vadd.f32 %v1949_v58, %v485_v9  ;;  %v471_v19 = vmul.f32 %v1955_v5, %v211_v3  ;;  %v233_v8 = vld [vmem:[%s2834_s0 + $0x6d8] sm:$0xff] }
  0xbe   :  { %v984_v21 = vmax.f32 %v728_v11, 0.0  ;;  %v985_v22 = vmax.f32 %v729_v12, 0.0  ;;  %v1000_v23 = vmax.f32 %v744_v13, 0.0  ;;  %v486_v24 = vmul.f32 %v1955_v5, %v226_v10 }
  0xbf   :  { %v1222_v26 = vmax.f32 %v1142_v16, %v1143_v17  ;;  %v1001_v27 = vmax.f32 %v745_v18, 0.0  ;;  %v487_v28 = vmul.f32 %v1955_v5, %v227_v14  ;;  %v730_v29 = vadd.f32 %v1949_v58, %v470_v15  ;;  %v218_v14 = vld [vmem:[%s2834_s0 + $0x660] sm:$0xff] }
  0xc0   :  { %v1144_v32 = vmax.f32 %v984_v21, %v1000_v23  ;;  %v731_v33 = vadd.f32 %v1949_v58, %v471_v19  ;;  %v746_v34 = vadd.f32 %v1949_v58, %v486_v24  ;;  %v472_v35 = vmul.f32 %v1955_v5, %v212_v20  ;;  %v219_v19 = vld [vmem:[%s2834_s0 + $0x668] sm:$0xff]  ;;  %v234_v24 = vld [vmem:[%s2834_s0 + $0x6e0] sm:$0xff] }
  0xc1   :  { %1286 = vst [vmem:[%s2837_s3 + $0x180] sm:$0xff] %v1222_v26  ;;  %v1145_v36 = vmax.f32 %v985_v22, %v1001_v27  ;;  %v747_v37 = vadd.f32 %v1949_v58, %v487_v28  ;;  %v986_v38 = vmax.f32 %v730_v29, 0.0  ;;  %v473_v39 = vmul.f32 %v1955_v5, %v213_v25  ;;  %v235_v28 = vld [vmem:[%s2834_s0 + $0x6e8] sm:$0xff] }
  0xc2   :  { %v987_v41 = vmax.f32 %v731_v33, 0.0  ;;  %v1002_v42 = vmax.f32 %v746_v34, 0.0  ;;  %v488_v43 = vmul.f32 %v1955_v5, %v228_v30  ;;  %v489_v44 = vmul.f32 %v1955_v5, %v229_v31  ;;  %v231_v5 = vld [vmem:[%s2834_s0 + $0x6c8] sm:$0xff]  ;;  %v220_v34 = vld [vmem:[%s2834_s0 + $0x670] sm:$0xff] }
  0xc3   :  { %v1223_v46 = vmax.f32 %v1144_v32, %v1145_v36  ;;  %v1003_v47 = vmax.f32 %v747_v37, 0.0  ;;  %v732_v48 = vadd.f32 %v1949_v58, %v472_v35  ;;  %v733_v50 = vadd.f32 %v2545_v49, %v473_v39  ;;  %v221_v39 = vld [vmem:[%s2834_s0 + $0x678] sm:$0xff] }
  0xc4   :  { %v1146_v52 = vmax.f32 %v986_v38, %v1002_v42  ;;  %v748_v53 = vadd.f32 %v2545_v49, %v488_v43  ;;  %v749_v58 = vadd.f32 %v2545_v49, %v489_v44  ;;  %v474_v55 = vmul.f32 %v2559_v54, %v214_v40  ;;  %v236_v44 = vld [vmem:[%s2834_s0 + $0x6f0] sm:$0xff] }
  0xc5   :  { %1287 = vst [vmem:[%s2837_s3 + $0x188] sm:$0xff] %v1223_v46  ;;  %v1147_v57 = vmax.f32 %v987_v41, %v1003_v47  ;;  %v988_v59 = vmax.f32 %v732_v48, 0.0  ;;  %v989_v4 = vmax.f32 %v733_v50, 0.0  ;;  %v475_v60 = vmul.f32 %v2559_v54, %v215_v45  ;;  %v237_v45 = vld [vmem:[%s2834_s0 + $0x6f8] sm:$0xff] }
  0xc6   :  { %v1004_v61 = vmax.f32 %v748_v53, 0.0  ;;  %v1005_v62 = vmax.f32 %v749_v58, 0.0  ;;  %v490_v63 = vmul.f32 %v2559_v54, %v230_v51  ;;  %v491_v0 = vmul.f32 %v2559_v54, %v231_v5  ;;  %v238_v58 = vld [vmem:[%s2834_s0 + $0x700] sm:$0xff] }
  0xc7   :  { %v1224_v3 = vmax.f32 %v1146_v52, %v1147_v57  ;;  %v734_v6 = vadd.f32 %v2545_v49, %v474_v55  ;;  %v735_v7 = vadd.f32 %v2545_v49, %v475_v60  ;;  %v476_v9 = vmul.f32 %v2559_v54, %v216_v56 }
  0xc8   :  { %v1148_v10 = vmax.f32 %v988_v59, %v1004_v61  ;;  %v1149_v11 = vmax.f32 %v989_v4, %v1005_v62  ;;  %v750_v12 = vadd.f32 %v2545_v49, %v490_v63  ;;  %v751_v13 = vadd.f32 %v2545_v49, %v491_v0  ;;  %v239_v4 = vld [vmem:[%s2834_s0 + $0x708] sm:$0xff]  ;;  %v254_v0 = vld [vmem:[%s2834_s0 + $0x780] sm:$0xff] }
  0xc9   :  { %1288 = vst [vmem:[%s2837_s3 + $0x190] sm:$0xff] %v1224_v3  ;;  %v990_v15 = vmax.f32 %v734_v6, 0.0  ;;  %v991_v16 = vmax.f32 %v735_v7, 0.0  ;;  %v477_v17 = vmul.f32 %v2559_v54, %v217_v1  ;;  %v492_v18 = vmul.f32 %v2559_v54, %v232_v2  ;;  %v255_v1 = vld [vmem:[%s2834_s0 + $0x788] sm:$0xff] }
  0xca   :  { %v1225_v20 = vmax.f32 %v1148_v10, %v1149_v11  ;;  %v1006_v21 = vmax.f32 %v750_v12, 0.0  ;;  %v1007_v22 = vmax.f32 %v751_v13, 0.0  ;;  %v493_v23 = vmul.f32 %v2559_v54, %v233_v8  ;;  %v240_v8 = vld [vmem:[%s2834_s0 + $0x710] sm:$0xff] }
  0xcb   :  { %v736_v25 = vadd.f32 %v2545_v49, %v476_v9  ;;  %v737_v26 = vadd.f32 %v2545_v49, %v477_v17  ;;  %v752_v27 = vadd.f32 %v2545_v49, %v492_v18  ;;  %v478_v29 = vmul.f32 %v2559_v54, %v218_v14  ;;  %v241_v17 = vld [vmem:[%s2834_s0 + $0x718] sm:$0xff]  ;;  %v256_v18 = vld [vmem:[%s2834_s0 + $0x790] sm:$0xff] }
  0xcc   :  { %1289 = vst [vmem:[%s2837_s3 + $0x198] sm:$0xff] %v1225_v20  ;;  %v1150_v30 = vmax.f32 %v990_v15, %v1006_v21  ;;  %v1151_v31 = vmax.f32 %v991_v16, %v1007_v22  ;;  %v753_v32 = vadd.f32 %v2545_v49, %v493_v23  ;;  %v479_v33 = vmul.f32 %v2559_v54, %v219_v19  ;;  %v257_v22 = vld [vmem:[%s2834_s0 + $0x798] sm:$0xff] }
  0xcd   :  { %v992_v35 = vmax.f32 %v736_v25, 0.0  ;;  %v993_v36 = vmax.f32 %v737_v26, 0.0  ;;  %v1008_v37 = vmax.f32 %v752_v27, 0.0  ;;  %v494_v38 = vmul.f32 %v2559_v54, %v234_v24 }
  0xce   :  { %v1226_v40 = vmax.f32 %v1150_v30, %v1151_v31  ;;  %v1009_v41 = vmax.f32 %v753_v32, 0.0  ;;  %v495_v42 = vmul.f32 %v2559_v54, %v235_v28  ;;  %v738_v43 = vadd.f32 %v2545_v49, %v478_v29  ;;  %v242_v28 = vld [vmem:[%s2834_s0 + $0x720] sm:$0xff] }
  0xcf   :  { %v1152_v46 = vmax.f32 %v992_v35, %v1008_v37  ;;  %v739_v47 = vadd.f32 %v2545_v49, %v479_v33  ;;  %v754_v48 = vadd.f32 %v2545_v49, %v494_v38  ;;  %v480_v50 = vmul.f32 %v2559_v54, %v220_v34  ;;  %v243_v33 = vld [vmem:[%s2834_s0 + $0x728] sm:$0xff]  ;;  %v258_v38 = vld [vmem:[%s2834_s0 + $0x7a0] sm:$0xff] }
  0xd0   :  { %1290 = vst [vmem:[%s2837_s3 + $0x1a0] sm:$0xff] %v1226_v40  ;;  %v1153_v51 = vmax.f32 %v993_v36, %v1009_v41  ;;  %v755_v5 = vadd.f32 %v2545_v49, %v495_v42  ;;  %v994_v52 = vmax.f32 %v738_v43, 0.0  ;;  %v481_v53 = vmul.f32 %v2559_v54, %v221_v39  ;;  %v259_v42 = vld [vmem:[%s2834_s0 + $0x7a8] sm:$0xff] }
  0xd1   :  { %v995_v55 = vmax.f32 %v739_v47, 0.0  ;;  %v1010_v56 = vmax.f32 %v754_v48, 0.0  ;;  %v496_v57 = vmul.f32 %v2559_v54, %v236_v44  ;;  %v497_v59 = vmul.f32 %v2559_v54, %v237_v45  ;;  %v244_v48 = vld [vmem:[%s2834_s0 + $0x730] sm:$0xff] }
  0xd2   :  { %v1227_v60 = vmax.f32 %v1152_v46, %v1153_v51  ;;  %v1011_v61 = vmax.f32 %v755_v5, 0.0  ;;  %v740_v62 = vadd.f32 %v2545_v49, %v480_v50  ;;  %v741_v63 = vadd.f32 %v2545_v49, %v481_v53  ;;  %v245_v53 = vld [vmem:[%s2834_s0 + $0x738] sm:$0xff] }
  0xd3   :  { %v1154_v2 = vmax.f32 %v994_v52, %v1010_v56  ;;  %v756_v3 = vadd.f32 %v2545_v49, %v496_v57  ;;  %v757_v6 = vadd.f32 %v2545_v49, %v497_v59  ;;  %v498_v7 = vmul.f32 %v2559_v54, %v238_v58  ;;  %v260_v59 = vld [vmem:[%s2834_s0 + $0x7b0] sm:$0xff] }
  0xd4   :  { %1291 = vst [vmem:[%s2837_s3 + $0x1a8] sm:$0xff] %v1227_v60  ;;  %v1155_v9 = vmax.f32 %v995_v55, %v1011_v61  ;;  %v996_v10 = vmax.f32 %v740_v62, 0.0  ;;  %v997_v11 = vmax.f32 %v741_v63, 0.0  ;;  %v499_v12 = vmul.f32 %v2559_v54, %v239_v4  ;;  %v261_v4 = vld [vmem:[%s2834_s0 + $0x7b8] sm:$0xff] }
  0xd5   :  { %v1012_v13 = vmax.f32 %v756_v3, 0.0  ;;  %v1013_v14 = vmax.f32 %v757_v6, 0.0  ;;  %v514_v15 = vmul.f32 %v2559_v54, %v254_v0  ;;  %v515_v16 = vmul.f32 %v2559_v54, %v255_v1  ;;  %v246_v6 = vld [vmem:[%s2834_s0 + $0x740] sm:$0xff] }
  0xd6   :  { %v1228_v19 = vmax.f32 %v1154_v2, %v1155_v9  ;;  %v758_v20 = vadd.f32 %v2545_v49, %v498_v7  ;;  %v759_v21 = vadd.f32 %v2545_v49, %v499_v12  ;;  %v500_v23 = vmul.f32 %v2559_v54, %v240_v8 }
  0xd7   :  { %v1156_v24 = vmax.f32 %v996_v10, %v1012_v13  ;;  %v1157_v25 = vmax.f32 %v997_v11, %v1013_v14  ;;  %v774_v26 = vadd.f32 %v2545_v49, %v514_v15  ;;  %v775_v27 = vadd.f32 %v2545_v49, %v515_v16  ;;  %v247_v11 = vld [vmem:[%s2834_s0 + $0x748] sm:$0xff]  ;;  %v262_v16 = vld [vmem:[%s2834_s0 + $0x7c0] sm:$0xff] }
  0xd8   :  { %1292 = vst [vmem:[%s2837_s3 + $0x1b0] sm:$0xff] %v1228_v19  ;;  %v1014_v29 = vmax.f32 %v758_v20, 0.0  ;;  %v1015_v30 = vmax.f32 %v759_v21, 0.0  ;;  %v501_v31 = vmul.f32 %v2559_v54, %v241_v17  ;;  %v516_v32 = vmul.f32 %v2559_v54, %v256_v18  ;;  %v263_v17 = vld [vmem:[%s2834_s0 + $0x7c8] sm:$0xff] }
  0xd9   :  { %v1229_v34 = vmax.f32 %v1156_v24, %v1157_v25  ;;  %v1030_v35 = vmax.f32 %v774_v26, 0.0  ;;  %v1031_v36 = vmax.f32 %v775_v27, 0.0  ;;  %v517_v37 = vmul.f32 %v2559_v54, %v257_v22  ;;  %v248_v22 = vld [vmem:[%s2834_s0 + $0x750] sm:$0xff] }
  0xda   :  { %v760_v39 = vadd.f32 %v2545_v49, %v500_v23  ;;  %v761_v40 = vadd.f32 %v2545_v49, %v501_v31  ;;  %v776_v41 = vadd.f32 %v2545_v49, %v516_v32  ;;  %v502_v43 = vmul.f32 %v2559_v54, %v242_v28  ;;  %v249_v31 = vld [vmem:[%s2834_s0 + $0x758] sm:$0xff]  ;;  %v264_v32 = vld [vmem:[%s2834_s0 + $0x7d0] sm:$0xff] }
  0xdb   :  { %1293 = vst [vmem:[%s2837_s3 + $0x1b8] sm:$0xff] %v1229_v34  ;;  %v1158_v44 = vmax.f32 %v1014_v29, %v1030_v35  ;;  %v1159_v45 = vmax.f32 %v1015_v30, %v1031_v36  ;;  %v777_v46 = vadd.f32 %v2545_v49, %v517_v37  ;;  %v503_v47 = vmul.f32 %v2559_v54, %v243_v33  ;;  %v265_v36 = vld [vmem:[%s2834_s0 + $0x7d8] sm:$0xff] }
  0xdc   :  { %v1016_v50 = vmax.f32 %v760_v39, 0.0  ;;  %v1017_v51 = vmax.f32 %v761_v40, 0.0  ;;  %v1032_v5 = vmax.f32 %v776_v41, 0.0  ;;  %v518_v52 = vmul.f32 %v2559_v54, %v258_v38 }
  0xdd   :  { %v1230_v58 = vmax.f32 %v1158_v44, %v1159_v45  ;;  %v1033_v55 = vmax.f32 %v777_v46, 0.0  ;;  %v519_v56 = vmul.f32 %v2559_v54, %v259_v42  ;;  %v762_v57 = vadd.f32 %v2545_v49, %v502_v43  ;;  %v250_v42 = vld [vmem:[%s2834_s0 + $0x760] sm:$0xff] }
  0xde   :  { %v1160_v60 = vmax.f32 %v1016_v50, %v1032_v5  ;;  %v763_v61 = vadd.f32 %v2545_v49, %v503_v47  ;;  %v778_v62 = vadd.f32 %v2545_v49, %v518_v52  ;;  %v504_v63 = vmul.f32 %v2559_v54, %v244_v48  ;;  %v251_v47 = vld [vmem:[%s2834_s0 + $0x768] sm:$0xff]  ;;  %v266_v52 = vld [vmem:[%s2834_s0 + $0x7e0] sm:$0xff] }
  0xdf   :  { %1294 = vst [vmem:[%s2837_s3 + $0x1c0] sm:$0xff] %v1230_v58  ;;  %v1161_v0 = vmax.f32 %v1017_v51, %v1033_v55  ;;  %v779_v1 = vadd.f32 %v2545_v49, %v519_v56  ;;  %v1018_v2 = vmax.f32 %v762_v57, 0.0  ;;  %v505_v3 = vmul.f32 %v2559_v54, %v245_v53  ;;  %v267_v56 = vld [vmem:[%s2834_s0 + $0x7e8] sm:$0xff] }
  0xe0   :  { %v1019_v7 = vmax.f32 %v763_v61, 0.0  ;;  %v1034_v8 = vmax.f32 %v778_v62, 0.0  ;;  %v520_v9 = vmul.f32 %v2559_v54, %v260_v59  ;;  %v521_v10 = vmul.f32 %v2559_v54, %v261_v4  ;;  %v252_v62 = vld [vmem:[%s2834_s0 + $0x770] sm:$0xff] }
  0xe1   :  { %v1231_v12 = vmax.f32 %v1160_v60, %v1161_v0  ;;  %v1035_v13 = vmax.f32 %v779_v1, 0.0  ;;  %v764_v14 = vadd.f32 %v2545_v49, %v504_v63  ;;  %v765_v15 = vadd.f32 %v2545_v49, %v505_v3  ;;  %v253_v3 = vld [vmem:[%s2834_s0 + $0x778] sm:$0xff] }
  0xe2   :  { %v1162_v18 = vmax.f32 %v1018_v2, %v1034_v8  ;;  %v780_v19 = vadd.f32 %v2545_v49, %v520_v9  ;;  %v781_v20 = vadd.f32 %v2545_v49, %v521_v10  ;;  %v506_v21 = vmul.f32 %v2559_v54, %v246_v6  ;;  %v268_v10 = vld [vmem:[%s2834_s0 + $0x7f0] sm:$0xff] }
  0xe3   :  { %1295 = vst [vmem:[%s2837_s3 + $0x1c8] sm:$0xff] %v1231_v12  ;;  %v1163_v23 = vmax.f32 %v1019_v7, %v1035_v13  ;;  %v1020_v24 = vmax.f32 %v764_v14, 0.0  ;;  %v1021_v25 = vmax.f32 %v765_v15, 0.0  ;;  %v507_v26 = vmul.f32 %v2559_v54, %v247_v11  ;;  %v269_v11 = vld [vmem:[%s2834_s0 + $0x7f8] sm:$0xff] }
  0xe4   :  { %v1036_v27 = vmax.f32 %v780_v19, 0.0  ;;  %v1037_v28 = vmax.f32 %v781_v20, 0.0  ;;  %v522_v29 = vmul.f32 %v2559_v54, %v262_v16  ;;  %v523_v30 = vmul.f32 %v2559_v54, %v263_v17 }
  0xe5   :  { %v1232_v33 = vmax.f32 %v1162_v18, %v1163_v23  ;;  %v766_v34 = vadd.f32 %v2545_v49, %v506_v21  ;;  %v767_v35 = vadd.f32 %v2545_v49, %v507_v26  ;;  %v508_v37 = vmul.f32 %v2559_v54, %v248_v22 }
  0xe6   :  { %v1164_v38 = vmax.f32 %v1020_v24, %v1036_v27  ;;  %v1165_v39 = vmax.f32 %v1021_v25, %v1037_v28  ;;  %v782_v40 = vadd.f32 %v2545_v49, %v522_v29  ;;  %v783_v41 = vadd.f32 %v2545_v49, %v523_v30 }
  0xe7   :  { %1296 = vst [vmem:[%s2837_s3 + $0x1d0] sm:$0xff] %v1232_v33  ;;  %v1022_v43 = vmax.f32 %v766_v34, 0.0  ;;  %v1023_v44 = vmax.f32 %v767_v35, 0.0  ;;  %v509_v45 = vmul.f32 %v2559_v54, %v249_v31  ;;  %v524_v46 = vmul.f32 %v2559_v54, %v264_v32 }
  0xe8   :  { %v1233_v48 = vmax.f32 %v1164_v38, %v1165_v39  ;;  %v1038_v50 = vmax.f32 %v782_v40, 0.0  ;;  %v1039_v51 = vmax.f32 %v783_v41, 0.0  ;;  %v525_v5 = vmul.f32 %v2559_v54, %v265_v36 }
  0xe9   :  { %v768_v53 = vadd.f32 %v2545_v49, %v508_v37  ;;  %v769_v58 = vadd.f32 %v2545_v49, %v509_v45  ;;  %v784_v55 = vadd.f32 %v2545_v49, %v524_v46  ;;  %v510_v57 = vmul.f32 %v2559_v54, %v250_v42 }
  0xea   :  { %1297 = vst [vmem:[%s2837_s3 + $0x1d8] sm:$0xff] %v1233_v48  ;;  %v1166_v59 = vmax.f32 %v1022_v43, %v1038_v50  ;;  %v1167_v4 = vmax.f32 %v1023_v44, %v1039_v51  ;;  %v785_v60 = vadd.f32 %v2545_v49, %v525_v5  ;;  %v511_v61 = vmul.f32 %v2559_v54, %v251_v47 }
  0xeb   :  { %v1024_v63 = vmax.f32 %v768_v53, 0.0  ;;  %v1025_v0 = vmax.f32 %v769_v58, 0.0  ;;  %v1040_v1 = vmax.f32 %v784_v55, 0.0  ;;  %v526_v2 = vmul.f32 %v2559_v54, %v266_v52 }
  0xec   :  { %v1234_v6 = vmax.f32 %v1166_v59, %v1167_v4  ;;  %v1041_v7 = vmax.f32 %v785_v60, 0.0  ;;  %v527_v8 = vmul.f32 %v2559_v54, %v267_v56  ;;  %v770_v9 = vadd.f32 %v2545_v49, %v510_v57 }
  0xed   :  { %v1168_v12 = vmax.f32 %v1024_v63, %v1040_v1  ;;  %v771_v13 = vadd.f32 %v2545_v49, %v511_v61  ;;  %v786_v14 = vadd.f32 %v2545_v49, %v526_v2  ;;  %v512_v15 = vmul.f32 %v2559_v54, %v252_v62 }
  0xee   :  { %1298 = vst [vmem:[%s2837_s3 + $0x1e0] sm:$0xff] %v1234_v6  ;;  %v1169_v16 = vmax.f32 %v1025_v0, %v1041_v7  ;;  %v787_v17 = vadd.f32 %v2545_v49, %v527_v8  ;;  %v1026_v18 = vmax.f32 %v770_v9, 0.0  ;;  %v513_v19 = vmul.f32 %v2559_v54, %v253_v3 }
  0xef   :  { %v1027_v20 = vmax.f32 %v771_v13, 0.0  ;;  %v1042_v21 = vmax.f32 %v786_v14, 0.0  ;;  %v528_v22 = vmul.f32 %v2559_v54, %v268_v10  ;;  %v529_v23 = vmul.f32 %v2559_v54, %v269_v11 }
  0xf0   :  { %v1235_v24 = vmax.f32 %v1168_v12, %v1169_v16  ;;  %v1043_v25 = vmax.f32 %v787_v17, 0.0  ;;  %v772_v26 = vadd.f32 %v2545_v49, %v512_v15  ;;  %v773_v27 = vadd.f32 %v2545_v49, %v513_v19 }
  0xf1   :  { %v1170_v28 = vmax.f32 %v1026_v18, %v1042_v21  ;;  %v788_v29 = vadd.f32 %v2545_v49, %v528_v22  ;;  %v789_v30 = vadd.f32 %v2545_v49, %v529_v23 }
  0xf2   :  { %1299 = vst [vmem:[%s2837_s3 + $0x1e8] sm:$0xff] %v1235_v24  ;;  %v1171_v31 = vmax.f32 %v1027_v20, %v1043_v25  ;;  %v1028_v32 = vmax.f32 %v772_v26, 0.0  ;;  %v1029_v33 = vmax.f32 %v773_v27, 0.0 }
  0xf3   :  { %v1044_v34 = vmax.f32 %v788_v29, 0.0  ;;  %v1045_v54 = vmax.f32 %v789_v30, 0.0 }
  0xf4   :  { %v1236_v35 = vmax.f32 %v1170_v28, %v1171_v31 }
  0xf5   :  { %v1172_v36 = vmax.f32 %v1028_v32, %v1044_v34  ;;  %v1173_v37 = vmax.f32 %v1029_v33, %v1045_v54 }
  0xf6   :  { %1300 = vst [vmem:[%s2837_s3 + $0x1f0] sm:$0xff] %v1236_v35 }
  0xf7   :  { %v1237_v38 = vmax.f32 %v1172_v36, %v1173_v37 }
  0xf9   :  { %1301 = vst [vmem:[%s2837_s3 + $0x1f8] sm:$0xff] %v1237_v38 }

</bundles_post_ra>
